<compile_context>
chip_gen: v7x
topology: tpu7x:2x2x1
jax: 0.10.0
libtpu: 0.0.40
codegen_flags: <defaults>
</compile_context>

<pallas_src>
import functools
import math

import numpy as np
import jax
import jax.numpy as jnp
from jax.experimental import pallas as pl
from jax.experimental.pallas import tpu as pltpu

# ---- small, module-consistent configuration ----------------------------------
IMG_SIZE = (16, 16)        # scaled-down analogue of (128, 128)
PATCH_SIZE = (4, 4)        # scaled-down analogue of (8, 8)
NUM_PATCH = int((IMG_SIZE[0] / PATCH_SIZE[0]) ** 2)   # 16
T = int(NUM_PATCH / 4)                                # 4  (after two depth pools)
S_TOK = T + 1                                         # 5  (cls + patch tokens)
HW = PATCH_SIZE[0] * PATCH_SIZE[1]                    # 16

N_FEATURE = 2
EMBED_DIM = 32
HIDDEN_DIM = 64
NUM_HEADS = 4
NUM_LAYERS = 2
NUM_CLASSES = 10
NUM_CHANNELS = 3
BATCH = 2

HEAD_DIM = EMBED_DIM // NUM_HEADS
_SQRT2 = math.sqrt(2.0)

C1_IN, C1_OUT = NUM_CHANNELS, N_FEATURE * 3           # 3  -> 6
C2_IN, C2_OUT = C1_OUT, N_FEATURE * 6                 # 6  -> 12
C3_IN, C3_OUT = C2_OUT, N_FEATURE * 8                 # 12 -> 16
D1, D2, D3 = NUM_PATCH, NUM_PATCH // 2, NUM_PATCH // 4  # 16, 8, 4 (depth = #patches)

# ---- packed small-vector table layout (one VMEM input, sliced in-kernel) ------
VEC_W = 256                       # >= max row width (C3_OUT*HW = 256)
ROW_C1B = 0                       # width C1_OUT*HW
ROW_C2B = 1                       # width C2_OUT*HW
ROW_C3B = 2                       # width C3_OUT*HW
ROW_PEB = 3                       # EMBED_DIM
ROW_CLS = 4                       # EMBED_DIM
ROW_POS = 5                       # S_TOK rows, EMBED_DIM each
ROW_HLN_G = ROW_POS + S_TOK
ROW_HLN_B = ROW_HLN_G + 1
ROW_HEAD_B = ROW_HLN_B + 1
ROW_LAYER0 = ROW_HEAD_B + 1       # then N_LR rows per transformer layer
(LR_LN1G, LR_LN1B, LR_INB, LR_OUTB, LR_LN2G, LR_LN2B, LR_B1, LR_B2) = range(8)
N_LR = 8
N_VEC_ROWS = ROW_LAYER0 + N_LR * NUM_LAYERS
VEC_ROWS_PAD = ((N_VEC_ROWS + 7) // 8) * 8


# ---- in-kernel helpers (pure jnp on values) -----------------------------------
def _ln(x, g, b):
    m = jnp.mean(x, axis=-1, keepdims=True)
    v = jnp.mean(jnp.square(x - m), axis=-1, keepdims=True)
    return (x - m) * jax.lax.rsqrt(v + 1e-5) * g + b


def _gelu(x):   # exact erf-based GELU (matches nn.GELU default)
    return 0.5 * x * (1.0 + jax.lax.erf(x / _SQRT2))


# ---- the single fused kernel ---------------------------------------------------
def _fused_vit_kernel(batch, x_ref, c1w, c2w, c3w, pew, inw, outw, w1, w2,
                      hw_r, vecs, mask_ref, out_ref):
    f32 = jnp.float32
    E = EMBED_DIM
    BS = batch * S_TOK

    def vrow(r, width):                    # one packed-table row as a [1, width] value
        return vecs[r:r + 1, :width]

    def conv3(x, d, w_ref, bias, relu):
        """Batched 3x3x3 conv.  Rows are (batch, depth) of a [B*d, Cin*HW] value;
        three per-depth-tap matmuls over the whole batch.  Depth padding (and
        batch-boundary isolation) comes from masking the shifted operands."""
        n, fin = x.shape
        zrow = jnp.zeros((1, fin), f32)
        up = jnp.concatenate([zrow, x[:n - 1, :]], axis=0)     # row r holds x[r-1]
        dn = jnp.concatenate([x[1:, :], zrow], axis=0)         # row r holds x[r+1]
        ridx = jax.lax.broadcasted_iota(jnp.int32, (n, 1), 0)
        up = jnp.where((ridx % d) != 0, up, 0.0)               # no d-1 at depth 0
        dn = jnp.where((ridx % d) != (d - 1), dn, 0.0)         # no d+1 at depth d-1
        acc = jnp.dot(up, w_ref[0], preferred_element_type=f32)
        acc = acc + jnp.dot(x, w_ref[1], preferred_element_type=f32)
        acc = acc + jnp.dot(dn, w_ref[2], preferred_element_type=f32)
        acc = acc + bias
        return jnp.maximum(acc, 0.0) if relu else acc

    def pool_depth(y):
        """MaxPool3d((2,1,1)) along depth: out[r] = max(y[2r], y[2r+1]).
        Even/odd row selection via 0/1 matmuls built from iota (no strided or
        masked stores; depth is even so pairs never straddle batches)."""
        n = y.shape[0]
        m = n // 2
        ri = jax.lax.broadcasted_iota(jnp.int32, (m, n), 0)
        ci = jax.lax.broadcasted_iota(jnp.int32, (m, n), 1)
        se = jnp.where(ci == 2 * ri, 1.0, 0.0).astype(f32)
        so = jnp.where(ci == 2 * ri + 1, 1.0, 0.0).astype(f32)
        return jnp.maximum(jnp.dot(se, y, preferred_element_type=f32),
                           jnp.dot(so, y, preferred_element_type=f32))

    # ---- conv stack (whole batch per matmul, all values) ----
    x = x_ref[...]                                              # [B*D1, C1_IN*HW]
    x = pool_depth(conv3(x, D1, c1w, vrow(ROW_C1B, C1_OUT * HW), True))
    x = pool_depth(conv3(x, D2, c2w, vrow(ROW_C2B, C2_OUT * HW), True))
    x = conv3(x, D3, c3w, vrow(ROW_C3B, C3_OUT * HW), False)    # [B*T, C3_OUT*HW]

    # ---- patch embedding + cls token + positional embedding ----
    emb = jnp.dot(x, pew[...], preferred_element_type=f32) + vrow(ROW_PEB, E)
    cls_tok = vrow(ROW_CLS, E)
    pos = vecs[ROW_POS:ROW_POS + S_TOK, :E]
    pieces = []
    for b in range(batch):
        pieces.append(cls_tok + pos[0:1, :])
        pieces.append(emb[b * T:(b + 1) * T, :] + pos[1:S_TOK, :])
    xtok = jnp.concatenate(pieces, axis=0)                      # [B*S_TOK, E]
    # Dropout(p=0) is the identity in eval.

    # ---- transformer layers (activations stay register/value resident) ----
    attn_bias = mask_ref[...]            # block-diagonal additive mask (0 / -1e30)
    for l in range(NUM_LAYERS):
        base = ROW_LAYER0 + N_LR * l
        q_in = _ln(xtok, vrow(base + LR_LN1G, E), vrow(base + LR_LN1B, E))
        # 1/sqrt(head_dim) is pre-folded into the Q columns of inw / in-proj bias.
        qkv = (jnp.dot(q_in, inw[l], preferred_element_type=f32)
               + vrow(base + LR_INB, 3 * E))                    # [BS, 3E]
        wo = outw[l]                                            # [E, E]
        attn = jnp.zeros((BS, E), f32)
        for h in range(NUM_HEADS):
            c = h * HEAD_DIM
            q = qkv[:, c:c + HEAD_DIM]
            k = qkv[:, E + c:E + c + HEAD_DIM]
            v = qkv[:, 2 * E + c:2 * E + c + HEAD_DIM]
            s = jax.lax.dot_general(q, k, (((1,), (1,)), ((), ())),
                                    preferred_element_type=f32) + attn_bias
            s = s - jnp.max(s, axis=-1, keepdims=True)
            p = jnp.exp(s)
            p = p / jnp.sum(p, axis=-1, keepdims=True)
            o = jnp.dot(p, v, preferred_element_type=f32)       # [BS, dh]
            # fold the head-concat into the out-projection:
            attn = attn + jnp.dot(o, wo[c:c + HEAD_DIM, :],
                                  preferred_element_type=f32)
        xtok = xtok + attn + vrow(base + LR_OUTB, E)            # residual + out bias
        hmid = _ln(xtok, vrow(base + LR_LN2G, E), vrow(base + LR_LN2B, E))
        hmid = _gelu(jnp.dot(hmid, w1[l], preferred_element_type=f32)
                     + vrow(base + LR_B1, HIDDEN_DIM))
        hmid = jnp.dot(hmid, w2[l], preferred_element_type=f32) + vrow(base + LR_B2, E)
        xtok = xtok + hmid                                      # residual

    # ---- classification head on the B cls tokens, batched ----
    cls_rows = jnp.concatenate(
        [xtok[b * S_TOK:b * S_TOK + 1, :] for b in range(batch)], axis=0)   # [B, E]
    cls_n = _ln(cls_rows, vrow(ROW_HLN_G, E), vrow(ROW_HLN_B, E))
    out_ref[...] = (jnp.dot(cls_n, hw_r[...], preferred_element_type=f32)
                    + vrow(ROW_HEAD_B, NUM_CLASSES))


# ---- one-time (init-time) weight preparation -----------------------------------
def _spatial_lowering(p):
    """S[kh, kw, hp*p+wp, h*p+w] = 1 iff (hp, wp) == (h+kh-1, w+kw-1) in range."""
    hw = p * p
    s = np.zeros((3, 3, hw, hw), np.float32)
    for kh in range(3):
        for kw in range(3):
            for h in range(p):
                for w in range(p):
                    hp, wp = h + kh - 1, w + kw - 1
                    if 0 <= hp < p and 0 <= wp < p:
                        s[kh, kw, hp * p + wp, h * p + w] = 1.0
    return s


def _lower_conv_weight(w, p):
    """[Cout, Cin, 3, 3, 3] -> [3, Cin*p*p, Cout*p*p] per-depth-tap matmul weights
    (spatial taps + H/W zero padding encoded into the matrix)."""
    s = _spatial_lowering(p)
    w = np.asarray(w, np.float32)
    cout, cin = w.shape[0], w.shape[1]
    taps = []
    for kd in range(3):
        m = np.einsum("oiab,abpq->ipoq", w[:, :, kd, :, :], s)   # [Cin, hw, Cout, hw]
        taps.append(m.reshape(cin * p * p, cout * p * p))
    return np.stack(taps, axis=0).astype(np.float32)


def prepare_params(params):
    """Lower conv weights, pre-transpose linears, stack per-layer matrices, fold the
    attention scale into Q, and pack every tiny vector into one [32, 256] table."""
    p = PATCH_SIZE[0]
    E = EMBED_DIM
    scale = 1.0 / math.sqrt(HEAD_DIM)
    L = params["layers"]

    c1w = _lower_conv_weight(params["conv1_w"], p)
    c2w = _lower_conv_weight(params["conv2_w"], p)
    c3w = _lower_conv_weight(params["conv3_w"], p)
    pew = np.asarray(params["pe_w"], np.float32).T
    head_w = np.asarray(params["head_w"], np.float32).T

    inw, outw, w1, w2 = [], [], [], []
    for lp in L:
        wi = np.asarray(lp["in_proj_w"], np.float32).T.copy()   # [E, 3E]
        wi[:, :E] *= scale                                      # fold softmax scale into Q
        inw.append(wi)
        outw.append(np.asarray(lp["out_proj_w"], np.float32).T)
        w1.append(np.asarray(lp["mlp_w1"], np.float32).T)
        w2.append(np.asarray(lp["mlp_w2"], np.float32).T)
    inw, outw = np.stack(inw), np.stack(outw)
    w1, w2 = np.stack(w1), np.stack(w2)

    vecs = np.zeros((VEC_ROWS_PAD, VEC_W), np.float32)

    def put(row, v):
        v = np.asarray(v, np.float32).reshape(-1)
        vecs[row, :v.shape[0]] = v

    put(ROW_C1B, np.repeat(np.asarray(params["conv1_b"], np.float32), HW))
    put(ROW_C2B, np.repeat(np.asarray(params["conv2_b"], np.float32), HW))
    put(ROW_C3B, np.repeat(np.asarray(params["conv3_b"], np.float32), HW))
    put(ROW_PEB, params["pe_b"])
    put(ROW_CLS, params["cls_token"])
    pos = np.asarray(params["pos_embedding"], np.float32)[0, :S_TOK, :]
    for i in range(S_TOK):
        put(ROW_POS + i, pos[i])
    put(ROW_HLN_G, params["head_ln_g"])
    put(ROW_HLN_B, params["head_ln_b"])
    put(ROW_HEAD_B, params["head_b"])
    for l, lp in enumerate(L):
        base = ROW_LAYER0 + N_LR * l
        put(base + LR_LN1G, lp["ln1_g"])
        put(base + LR_LN1B, lp["ln1_b"])
        ipb = np.asarray(lp["in_proj_b"], np.float32).copy()
        ipb[:E] *= scale                                        # fold scale into Q bias
        put(base + LR_INB, ipb)
        put(base + LR_OUTB, lp["out_proj_b"])
        put(base + LR_LN2G, lp["ln2_g"])
        put(base + LR_LN2B, lp["ln2_b"])
        put(base + LR_B1, lp["mlp_b1"])
        put(base + LR_B2, lp["mlp_b2"])

    mats = [c1w, c2w, c3w, pew, inw, outw, w1, w2, head_w, vecs]
    return [jnp.asarray(m, jnp.float32) for m in mats]


# ---- glue + pallas_call ---------------------------------------------------------
def img_to_patch(x, p):
    B, C, H, W = x.shape
    x = x.reshape(B, C, H // p, p, W // p, p)
    x = x.transpose(0, 2, 4, 1, 3, 5)                  # [B, H/p, W/p, C, p, p]
    return x.reshape(B, (H // p) * (W // p), C, p, p)  # [B, N, C, p, p]


def _vmem_spec():
    return pl.BlockSpec(memory_space=pltpu.MemorySpace.VMEM)


def vision_transformer(x, prepared):
    B = x.shape[0]
    # img_to_patch(..., flatten_channels=False).transpose(1,2) is the conv volume
    # [B, C, N, p, p]; the kernel uses the row-major [B*N, C*p*p] layout directly.
    patches = img_to_patch(x, PATCH_SIZE[0])
    x2 = patches.reshape(B * NUM_PATCH, NUM_CHANNELS * HW).astype(jnp.float32)

    # additive block-diagonal attention mask (merged-batch attention)
    blk = np.kron(np.eye(B, dtype=np.float32), np.ones((S_TOK, S_TOK), np.float32))
    mask_bias = jnp.asarray((1.0 - blk) * np.float32(-1e30))

    args = (x2, *prepared, mask_bias)
    return pl.pallas_call(
        functools.partial(_fused_vit_kernel, B),
        out_shape=jax.ShapeDtypeStruct((B, NUM_CLASSES), jnp.float32),
        in_specs=[_vmem_spec() for _ in args],
        out_specs=_vmem_spec(),
    )(*args)


# ---- deterministic parameter init (PyTorch-layout weights) ----------------------
def init_params(key):
    keys = iter(jax.random.split(key, 64))

    def nrm(shape, scale=0.02):
        return (scale * jax.random.normal(next(keys), shape)).astype(jnp.float32)

    nf = N_FEATURE
    params = {
        "conv1_w": nrm((nf * 3, 3, 3, 3, 3)),       "conv1_b": nrm((nf * 3,)),
        "conv2_w": nrm((nf * 6, nf * 3, 3, 3, 3)),  "conv2_b": nrm((nf * 6,)),
        "conv3_w": nrm((nf * 8, nf * 6, 3, 3, 3)),  "conv3_b": nrm((nf * 8,)),
        "pe_w": nrm((EMBED_DIM, nf * 8 * PATCH_SIZE[0] * PATCH_SIZE[0])),
        "pe_b": nrm((EMBED_DIM,)),
        "cls_token": nrm((1, 1, EMBED_DIM), 1.0),
        "pos_embedding": nrm((1, 1 + T, EMBED_DIM), 1.0),
        "head_ln_g": jnp.ones((EMBED_DIM,), jnp.float32),
        "head_ln_b": jnp.zeros((EMBED_DIM,), jnp.float32),
        "head_w": nrm((NUM_CLASSES, EMBED_DIM)),
        "head_b": nrm((NUM_CLASSES,)),
        "layers": [],
    }
    for _ in range(NUM_LAYERS):
        params["layers"].append({
            "ln1_g": jnp.ones((EMBED_DIM,), jnp.float32),
            "ln1_b": jnp.zeros((EMBED_DIM,), jnp.float32),
            "in_proj_w": nrm((3 * EMBED_DIM, EMBED_DIM)),
            "in_proj_b": nrm((3 * EMBED_DIM,)),
            "out_proj_w": nrm((EMBED_DIM, EMBED_DIM)),
            "out_proj_b": nrm((EMBED_DIM,)),
            "ln2_g": jnp.ones((EMBED_DIM,), jnp.float32),
            "ln2_b": jnp.zeros((EMBED_DIM,), jnp.float32),
            "mlp_w1": nrm((HIDDEN_DIM, EMBED_DIM)),
            "mlp_b1": nrm((HIDDEN_DIM,)),
            "mlp_w2": nrm((EMBED_DIM, HIDDEN_DIM)),
            "mlp_b2": nrm((EMBED_DIM,)),
        })
    return params


if __name__ == "__main__":
    key = jax.random.PRNGKey(0)
    pkey, xkey = jax.random.split(key)
    params = init_params(pkey)
    prepared = prepare_params(params)          # one-time weight lowering / packing
    x = jax.random.normal(
        xkey, (BATCH, NUM_CHANNELS, IMG_SIZE[0], IMG_SIZE[1]), jnp.float32)

    fwd = jax.jit(vision_transformer)
    out = fwd(x, prepared)
    out = jax.block_until_ready(out)
    assert out.shape == (BATCH, NUM_CLASSES), out.shape
    assert bool(jnp.all(jnp.isfinite(out)))
    print("KERNEL_OK")
</pallas_src>

<mosaic_0001>
module attributes {stable_mosaic.version = 11 : i64} {
  func.func @_fused_vit_kernel(%arg0: memref<32x48xf32, #tpu.memory_space<vmem>>, %arg1: memref<3x48x96xf32, #tpu.memory_space<vmem>>, %arg2: memref<3x96x192xf32, #tpu.memory_space<vmem>>, %arg3: memref<3x192x256xf32, #tpu.memory_space<vmem>>, %arg4: memref<256x32xf32, #tpu.memory_space<vmem>>, %arg5: memref<2x32x96xf32, #tpu.memory_space<vmem>>, %arg6: memref<2x32x32xf32, #tpu.memory_space<vmem>>, %arg7: memref<2x32x64xf32, #tpu.memory_space<vmem>>, %arg8: memref<2x64x32xf32, #tpu.memory_space<vmem>>, %arg9: memref<32x10xf32, #tpu.memory_space<vmem>>, %arg10: memref<32x256xf32, #tpu.memory_space<vmem>>, %arg11: memref<10x10xf32, #tpu.memory_space<vmem>>, %arg12: memref<2x10xf32, #tpu.memory_space<vmem>>) attributes {dimension_semantics = [], scalar_prefetch = 0 : i64, scratch_operands = 0 : i64, tpu.core_type = #tpu.core_type<tc>} {
    %c0 = arith.constant 0 : index
    %c0_0 = arith.constant 0 : index
    %0 = vector.load %arg0[%c0, %c0_0] : memref<32x48xf32, #tpu.memory_space<vmem>>, vector<32x48xf32>
    %c0_1 = arith.constant 0 : index
    %c0_2 = arith.constant 0 : index
    %1 = vector.load %arg10[%c0_1, %c0_2] : memref<32x256xf32, #tpu.memory_space<vmem>>, vector<1x96xf32>
    %cst = arith.constant 0.000000e+00 : f32
    %2 = vector.broadcast %cst : f32 to vector<1x48xf32>
    %3 = vector.extract_strided_slice %0 {offsets = [0, 0], sizes = [31, 48], strides = [1, 1]} : vector<32x48xf32> to vector<31x48xf32>
    %4 = tpu.concatenate %2, %3 in 0 : vector<1x48xf32>, vector<31x48xf32> -> vector<32x48xf32>
    %5 = vector.extract_strided_slice %0 {offsets = [1, 0], sizes = [31, 48], strides = [1, 1]} : vector<32x48xf32> to vector<31x48xf32>
    %6 = tpu.concatenate %5, %2 in 0 : vector<31x48xf32>, vector<1x48xf32> -> vector<32x48xf32>
    %7 = tpu.iota {dimensions = array<i32: 0>} : vector<32x1xi32>
    %c16_i32 = arith.constant 16 : i32
    %c0_i32 = arith.constant 0 : i32
    %8 = arith.cmpi eq, %c16_i32, %c0_i32 : i32
    %c1_i32 = arith.constant 1 : i32
    %9 = arith.select %8, %c1_i32, %c16_i32 : i32
    %10 = vector.broadcast %9 : i32 to vector<32x1xi32>
    %11 = arith.remsi %7, %10 : vector<32x1xi32>
    %c0_i32_3 = arith.constant 0 : i32
    %12 = vector.broadcast %c0_i32_3 : i32 to vector<32x1xi32>
    %13 = arith.cmpi ne, %11, %12 : vector<32x1xi32>
    %c0_i32_4 = arith.constant 0 : i32
    %14 = vector.broadcast %c0_i32_4 : i32 to vector<32x1xi32>
    %15 = arith.cmpi slt, %11, %14 : vector<32x1xi32>
    %c0_i32_5 = arith.constant 0 : i32
    %16 = arith.cmpi slt, %9, %c0_i32_5 : i32
    %17 = vector.broadcast %16 : i1 to vector<32x1xi1>
    %18 = vector.broadcast %17 : vector<32x1xi1> to vector<32x1xi1>
    %19 = arith.xori %15, %18 : vector<32x1xi1>
    %20 = arith.andi %19, %13 : vector<32x1xi1>
    %21 = vector.broadcast %9 : i32 to vector<32x1xi32>
    %22 = arith.addi %11, %21 : vector<32x1xi32>
    %23 = arith.select %20, %22, %11 : vector<32x1xi1>, vector<32x1xi32>
    %c0_i32_6 = arith.constant 0 : i32
    %24 = vector.broadcast %c0_i32_6 : i32 to vector<32x1xi32>
    %25 = arith.cmpi ne, %23, %24 : vector<32x1xi32>
    %cst_7 = arith.constant 0.000000e+00 : f32
    %26 = vector.shape_cast %25 : vector<32x1xi1> to vector<32x1xi1>
    %27 = vector.broadcast %26 : vector<32x1xi1> to vector<32x48xi1>
    %28 = vector.broadcast %cst_7 : f32 to vector<32x48xf32>
    %29 = arith.select %27, %4, %28 : vector<32x48xi1>, vector<32x48xf32>
    %c16_i32_8 = arith.constant 16 : i32
    %c0_i32_9 = arith.constant 0 : i32
    %30 = arith.cmpi eq, %c16_i32_8, %c0_i32_9 : i32
    %c1_i32_10 = arith.constant 1 : i32
    %31 = arith.select %30, %c1_i32_10, %c16_i32_8 : i32
    %32 = vector.broadcast %31 : i32 to vector<32x1xi32>
    %33 = arith.remsi %7, %32 : vector<32x1xi32>
    %c0_i32_11 = arith.constant 0 : i32
    %34 = vector.broadcast %c0_i32_11 : i32 to vector<32x1xi32>
    %35 = arith.cmpi ne, %33, %34 : vector<32x1xi32>
    %c0_i32_12 = arith.constant 0 : i32
    %36 = vector.broadcast %c0_i32_12 : i32 to vector<32x1xi32>
    %37 = arith.cmpi slt, %33, %36 : vector<32x1xi32>
    %c0_i32_13 = arith.constant 0 : i32
    %38 = arith.cmpi slt, %31, %c0_i32_13 : i32
    %39 = vector.broadcast %38 : i1 to vector<32x1xi1>
    %40 = vector.broadcast %39 : vector<32x1xi1> to vector<32x1xi1>
    %41 = arith.xori %37, %40 : vector<32x1xi1>
    %42 = arith.andi %41, %35 : vector<32x1xi1>
    %43 = vector.broadcast %31 : i32 to vector<32x1xi32>
    %44 = arith.addi %33, %43 : vector<32x1xi32>
    %45 = arith.select %42, %44, %33 : vector<32x1xi1>, vector<32x1xi32>
    %c15_i32 = arith.constant 15 : i32
    %46 = vector.broadcast %c15_i32 : i32 to vector<32x1xi32>
    %47 = arith.cmpi ne, %45, %46 : vector<32x1xi32>
    %cst_14 = arith.constant 0.000000e+00 : f32
    %48 = vector.shape_cast %47 : vector<32x1xi1> to vector<32x1xi1>
    %49 = vector.broadcast %48 : vector<32x1xi1> to vector<32x48xi1>
    %50 = vector.broadcast %cst_14 : f32 to vector<32x48xf32>
    %51 = arith.select %49, %6, %50 : vector<32x48xi1>, vector<32x48xf32>
    %c0_15 = arith.constant 0 : index
    %c0_16 = arith.constant 0 : index
    %c0_17 = arith.constant 0 : index
    %52 = vector.load %arg1[%c0_15, %c0_16, %c0_17] : memref<3x48x96xf32, #tpu.memory_space<vmem>>, vector<1x48x96xf32>
    %53 = vector.shape_cast %52 : vector<1x48x96xf32> to vector<48x96xf32>
    %cst_18 = arith.constant dense<0.000000e+00> : vector<32x96xf32>
    %54 = tpu.matmul %29, %53, %cst_18 {dimension_numbers = #tpu.dot_dimension_numbers<[1], [0], [0], [1], [0, 0, 1, 1], [], []>} : vector<32x48xf32>, vector<48x96xf32>, vector<32x96xf32> -> vector<32x96xf32>
    %c1 = arith.constant 1 : index
    %c0_19 = arith.constant 0 : index
    %c0_20 = arith.constant 0 : index
    %55 = vector.load %arg1[%c1, %c0_19, %c0_20] : memref<3x48x96xf32, #tpu.memory_space<vmem>>, vector<1x48x96xf32>
    %56 = vector.shape_cast %55 : vector<1x48x96xf32> to vector<48x96xf32>
    %cst_21 = arith.constant dense<0.000000e+00> : vector<32x96xf32>
    %57 = tpu.matmul %0, %56, %cst_21 {dimension_numbers = #tpu.dot_dimension_numbers<[1], [0], [0], [1], [0, 0, 1, 1], [], []>} : vector<32x48xf32>, vector<48x96xf32>, vector<32x96xf32> -> vector<32x96xf32>
    %58 = arith.addf %54, %57 : vector<32x96xf32>
    %c2 = arith.constant 2 : index
    %c0_22 = arith.constant 0 : index
    %c0_23 = arith.constant 0 : index
    %59 = vector.load %arg1[%c2, %c0_22, %c0_23] : memref<3x48x96xf32, #tpu.memory_space<vmem>>, vector<1x48x96xf32>
    %60 = vector.shape_cast %59 : vector<1x48x96xf32> to vector<48x96xf32>
    %cst_24 = arith.constant dense<0.000000e+00> : vector<32x96xf32>
    %61 = tpu.matmul %51, %60, %cst_24 {dimension_numbers = #tpu.dot_dimension_numbers<[1], [0], [0], [1], [0, 0, 1, 1], [], []>} : vector<32x48xf32>, vector<48x96xf32>, vector<32x96xf32> -> vector<32x96xf32>
    %62 = arith.addf %58, %61 : vector<32x96xf32>
    %63 = vector.broadcast %1 : vector<1x96xf32> to vector<32x96xf32>
    %64 = arith.addf %62, %63 : vector<32x96xf32>
    %cst_25 = arith.constant 0.000000e+00 : f32
    %65 = vector.broadcast %cst_25 : f32 to vector<32x96xf32>
    %66 = arith.maximumf %64, %65 : vector<32x96xf32>
    %67 = tpu.iota {dimensions = array<i32: 0>} : vector<16x32xi32>
    %68 = tpu.iota {dimensions = array<i32: 1>} : vector<16x32xi32>
    %c2_i32 = arith.constant 2 : i32
    %69 = vector.broadcast %c2_i32 : i32 to vector<16x32xi32>
    %70 = arith.muli %69, %67 : vector<16x32xi32>
    %71 = arith.cmpi eq, %68, %70 : vector<16x32xi32>
    %cst_26 = arith.constant 1.000000e+00 : f32
    %cst_27 = arith.constant 0.000000e+00 : f32
    %72 = vector.broadcast %cst_26 : f32 to vector<16x32xf32>
    %73 = vector.broadcast %cst_27 : f32 to vector<16x32xf32>
    %74 = arith.select %71, %72, %73 : vector<16x32xi1>, vector<16x32xf32>
    %c2_i32_28 = arith.constant 2 : i32
    %75 = vector.broadcast %c2_i32_28 : i32 to vector<16x32xi32>
    %76 = arith.muli %75, %67 : vector<16x32xi32>
    %c1_i32_29 = arith.constant 1 : i32
    %77 = vector.broadcast %c1_i32_29 : i32 to vector<16x32xi32>
    %78 = arith.addi %76, %77 : vector<16x32xi32>
    %79 = arith.cmpi eq, %68, %78 : vector<16x32xi32>
    %cst_30 = arith.constant 1.000000e+00 : f32
    %cst_31 = arith.constant 0.000000e+00 : f32
    %80 = vector.broadcast %cst_30 : f32 to vector<16x32xf32>
    %81 = vector.broadcast %cst_31 : f32 to vector<16x32xf32>
    %82 = arith.select %79, %80, %81 : vector<16x32xi1>, vector<16x32xf32>
    %cst_32 = arith.constant dense<0.000000e+00> : vector<16x96xf32>
    %83 = tpu.matmul %74, %66, %cst_32 {dimension_numbers = #tpu.dot_dimension_numbers<[1], [0], [0], [1], [0, 0, 1, 1], [], []>} : vector<16x32xf32>, vector<32x96xf32>, vector<16x96xf32> -> vector<16x96xf32>
    %cst_33 = arith.constant dense<0.000000e+00> : vector<16x96xf32>
    %84 = tpu.matmul %82, %66, %cst_33 {dimension_numbers = #tpu.dot_dimension_numbers<[1], [0], [0], [1], [0, 0, 1, 1], [], []>} : vector<16x32xf32>, vector<32x96xf32>, vector<16x96xf32> -> vector<16x96xf32>
    %85 = arith.maximumf %83, %84 : vector<16x96xf32>
    %c1_34 = arith.constant 1 : index
    %c0_35 = arith.constant 0 : index
    %86 = vector.load %arg10[%c1_34, %c0_35] : memref<32x256xf32, #tpu.memory_space<vmem>>, vector<1x192xf32>
    %cst_36 = arith.constant 0.000000e+00 : f32
    %87 = vector.broadcast %cst_36 : f32 to vector<1x96xf32>
    %88 = vector.extract_strided_slice %85 {offsets = [0, 0], sizes = [15, 96], strides = [1, 1]} : vector<16x96xf32> to vector<15x96xf32>
    %89 = tpu.concatenate %87, %88 in 0 : vector<1x96xf32>, vector<15x96xf32> -> vector<16x96xf32>
    %90 = vector.extract_strided_slice %85 {offsets = [1, 0], sizes = [15, 96], strides = [1, 1]} : vector<16x96xf32> to vector<15x96xf32>
    %91 = tpu.concatenate %90, %87 in 0 : vector<15x96xf32>, vector<1x96xf32> -> vector<16x96xf32>
    %92 = tpu.iota {dimensions = array<i32: 0>} : vector<16x1xi32>
    %c8_i32 = arith.constant 8 : i32
    %c0_i32_37 = arith.constant 0 : i32
    %93 = arith.cmpi eq, %c8_i32, %c0_i32_37 : i32
    %c1_i32_38 = arith.constant 1 : i32
    %94 = arith.select %93, %c1_i32_38, %c8_i32 : i32
    %95 = vector.broadcast %94 : i32 to vector<16x1xi32>
    %96 = arith.remsi %92, %95 : vector<16x1xi32>
    %c0_i32_39 = arith.constant 0 : i32
    %97 = vector.broadcast %c0_i32_39 : i32 to vector<16x1xi32>
    %98 = arith.cmpi ne, %96, %97 : vector<16x1xi32>
    %c0_i32_40 = arith.constant 0 : i32
    %99 = vector.broadcast %c0_i32_40 : i32 to vector<16x1xi32>
    %100 = arith.cmpi slt, %96, %99 : vector<16x1xi32>
    %c0_i32_41 = arith.constant 0 : i32
    %101 = arith.cmpi slt, %94, %c0_i32_41 : i32
    %102 = vector.broadcast %101 : i1 to vector<16x1xi1>
    %103 = vector.broadcast %102 : vector<16x1xi1> to vector<16x1xi1>
    %104 = arith.xori %100, %103 : vector<16x1xi1>
    %105 = arith.andi %104, %98 : vector<16x1xi1>
    %106 = vector.broadcast %94 : i32 to vector<16x1xi32>
    %107 = arith.addi %96, %106 : vector<16x1xi32>
    %108 = arith.select %105, %107, %96 : vector<16x1xi1>, vector<16x1xi32>
    %c0_i32_42 = arith.constant 0 : i32
    %109 = vector.broadcast %c0_i32_42 : i32 to vector<16x1xi32>
    %110 = arith.cmpi ne, %108, %109 : vector<16x1xi32>
    %cst_43 = arith.constant 0.000000e+00 : f32
    %111 = vector.shape_cast %110 : vector<16x1xi1> to vector<16x1xi1>
    %112 = vector.broadcast %111 : vector<16x1xi1> to vector<16x96xi1>
    %113 = vector.broadcast %cst_43 : f32 to vector<16x96xf32>
    %114 = arith.select %112, %89, %113 : vector<16x96xi1>, vector<16x96xf32>
    %c8_i32_44 = arith.constant 8 : i32
    %c0_i32_45 = arith.constant 0 : i32
    %115 = arith.cmpi eq, %c8_i32_44, %c0_i32_45 : i32
    %c1_i32_46 = arith.constant 1 : i32
    %116 = arith.select %115, %c1_i32_46, %c8_i32_44 : i32
    %117 = vector.broadcast %116 : i32 to vector<16x1xi32>
    %118 = arith.remsi %92, %117 : vector<16x1xi32>
    %c0_i32_47 = arith.constant 0 : i32
    %119 = vector.broadcast %c0_i32_47 : i32 to vector<16x1xi32>
    %120 = arith.cmpi ne, %118, %119 : vector<16x1xi32>
    %c0_i32_48 = arith.constant 0 : i32
    %121 = vector.broadcast %c0_i32_48 : i32 to vector<16x1xi32>
    %122 = arith.cmpi slt, %118, %121 : vector<16x1xi32>
    %c0_i32_49 = arith.constant 0 : i32
    %123 = arith.cmpi slt, %116, %c0_i32_49 : i32
    %124 = vector.broadcast %123 : i1 to vector<16x1xi1>
    %125 = vector.broadcast %124 : vector<16x1xi1> to vector<16x1xi1>
    %126 = arith.xori %122, %125 : vector<16x1xi1>
    %127 = arith.andi %126, %120 : vector<16x1xi1>
    %128 = vector.broadcast %116 : i32 to vector<16x1xi32>
    %129 = arith.addi %118, %128 : vector<16x1xi32>
    %130 = arith.select %127, %129, %118 : vector<16x1xi1>, vector<16x1xi32>
    %c7_i32 = arith.constant 7 : i32
    %131 = vector.broadcast %c7_i32 : i32 to vector<16x1xi32>
    %132 = arith.cmpi ne, %130, %131 : vector<16x1xi32>
    %cst_50 = arith.constant 0.000000e+00 : f32
    %133 = vector.shape_cast %132 : vector<16x1xi1> to vector<16x1xi1>
    %134 = vector.broadcast %133 : vector<16x1xi1> to vector<16x96xi1>
    %135 = vector.broadcast %cst_50 : f32 to vector<16x96xf32>
    %136 = arith.select %134, %91, %135 : vector<16x96xi1>, vector<16x96xf32>
    %c0_51 = arith.constant 0 : index
    %c0_52 = arith.constant 0 : index
    %c0_53 = arith.constant 0 : index
    %137 = vector.load %arg2[%c0_51, %c0_52, %c0_53] : memref<3x96x192xf32, #tpu.memory_space<vmem>>, vector<1x96x192xf32>
    %138 = vector.shape_cast %137 : vector<1x96x192xf32> to vector<96x192xf32>
    %cst_54 = arith.constant dense<0.000000e+00> : vector<16x192xf32>
    %139 = tpu.matmul %114, %138, %cst_54 {dimension_numbers = #tpu.dot_dimension_numbers<[1], [0], [0], [1], [0, 0, 1, 1], [], []>} : vector<16x96xf32>, vector<96x192xf32>, vector<16x192xf32> -> vector<16x192xf32>
    %c1_55 = arith.constant 1 : index
    %c0_56 = arith.constant 0 : index
    %c0_57 = arith.constant 0 : index
    %140 = vector.load %arg2[%c1_55, %c0_56, %c0_57] : memref<3x96x192xf32, #tpu.memory_space<vmem>>, vector<1x96x192xf32>
    %141 = vector.shape_cast %140 : vector<1x96x192xf32> to vector<96x192xf32>
    %cst_58 = arith.constant dense<0.000000e+00> : vector<16x192xf32>
    %142 = tpu.matmul %85, %141, %cst_58 {dimension_numbers = #tpu.dot_dimension_numbers<[1], [0], [0], [1], [0, 0, 1, 1], [], []>} : vector<16x96xf32>, vector<96x192xf32>, vector<16x192xf32> -> vector<16x192xf32>
    %143 = arith.addf %139, %142 : vector<16x192xf32>
    %c2_59 = arith.constant 2 : index
    %c0_60 = arith.constant 0 : index
    %c0_61 = arith.constant 0 : index
    %144 = vector.load %arg2[%c2_59, %c0_60, %c0_61] : memref<3x96x192xf32, #tpu.memory_space<vmem>>, vector<1x96x192xf32>
    %145 = vector.shape_cast %144 : vector<1x96x192xf32> to vector<96x192xf32>
    %cst_62 = arith.constant dense<0.000000e+00> : vector<16x192xf32>
    %146 = tpu.matmul %136, %145, %cst_62 {dimension_numbers = #tpu.dot_dimension_numbers<[1], [0], [0], [1], [0, 0, 1, 1], [], []>} : vector<16x96xf32>, vector<96x192xf32>, vector<16x192xf32> -> vector<16x192xf32>
    %147 = arith.addf %143, %146 : vector<16x192xf32>
    %148 = vector.broadcast %86 : vector<1x192xf32> to vector<16x192xf32>
    %149 = arith.addf %147, %148 : vector<16x192xf32>
    %cst_63 = arith.constant 0.000000e+00 : f32
    %150 = vector.broadcast %cst_63 : f32 to vector<16x192xf32>
    %151 = arith.maximumf %149, %150 : vector<16x192xf32>
    %152 = tpu.iota {dimensions = array<i32: 0>} : vector<8x16xi32>
    %153 = tpu.iota {dimensions = array<i32: 1>} : vector<8x16xi32>
    %c2_i32_64 = arith.constant 2 : i32
    %154 = vector.broadcast %c2_i32_64 : i32 to vector<8x16xi32>
    %155 = arith.muli %154, %152 : vector<8x16xi32>
    %156 = arith.cmpi eq, %153, %155 : vector<8x16xi32>
    %cst_65 = arith.constant 1.000000e+00 : f32
    %cst_66 = arith.constant 0.000000e+00 : f32
    %157 = vector.broadcast %cst_65 : f32 to vector<8x16xf32>
    %158 = vector.broadcast %cst_66 : f32 to vector<8x16xf32>
    %159 = arith.select %156, %157, %158 : vector<8x16xi1>, vector<8x16xf32>
    %c2_i32_67 = arith.constant 2 : i32
    %160 = vector.broadcast %c2_i32_67 : i32 to vector<8x16xi32>
    %161 = arith.muli %160, %152 : vector<8x16xi32>
    %c1_i32_68 = arith.constant 1 : i32
    %162 = vector.broadcast %c1_i32_68 : i32 to vector<8x16xi32>
    %163 = arith.addi %161, %162 : vector<8x16xi32>
    %164 = arith.cmpi eq, %153, %163 : vector<8x16xi32>
    %cst_69 = arith.constant 1.000000e+00 : f32
    %cst_70 = arith.constant 0.000000e+00 : f32
    %165 = vector.broadcast %cst_69 : f32 to vector<8x16xf32>
    %166 = vector.broadcast %cst_70 : f32 to vector<8x16xf32>
    %167 = arith.select %164, %165, %166 : vector<8x16xi1>, vector<8x16xf32>
    %cst_71 = arith.constant dense<0.000000e+00> : vector<8x192xf32>
    %168 = tpu.matmul %159, %151, %cst_71 {dimension_numbers = #tpu.dot_dimension_numbers<[1], [0], [0], [1], [0, 0, 1, 1], [], []>} : vector<8x16xf32>, vector<16x192xf32>, vector<8x192xf32> -> vector<8x192xf32>
    %cst_72 = arith.constant dense<0.000000e+00> : vector<8x192xf32>
    %169 = tpu.matmul %167, %151, %cst_72 {dimension_numbers = #tpu.dot_dimension_numbers<[1], [0], [0], [1], [0, 0, 1, 1], [], []>} : vector<8x16xf32>, vector<16x192xf32>, vector<8x192xf32> -> vector<8x192xf32>
    %170 = arith.maximumf %168, %169 : vector<8x192xf32>
    %c2_73 = arith.constant 2 : index
    %c0_74 = arith.constant 0 : index
    %171 = vector.load %arg10[%c2_73, %c0_74] : memref<32x256xf32, #tpu.memory_space<vmem>>, vector<1x256xf32>
    %cst_75 = arith.constant 0.000000e+00 : f32
    %172 = vector.broadcast %cst_75 : f32 to vector<1x192xf32>
    %173 = vector.extract_strided_slice %170 {offsets = [0, 0], sizes = [7, 192], strides = [1, 1]} : vector<8x192xf32> to vector<7x192xf32>
    %174 = tpu.concatenate %172, %173 in 0 : vector<1x192xf32>, vector<7x192xf32> -> vector<8x192xf32>
    %175 = vector.extract_strided_slice %170 {offsets = [1, 0], sizes = [7, 192], strides = [1, 1]} : vector<8x192xf32> to vector<7x192xf32>
    %176 = tpu.concatenate %175, %172 in 0 : vector<7x192xf32>, vector<1x192xf32> -> vector<8x192xf32>
    %177 = tpu.iota {dimensions = array<i32: 0>} : vector<8x1xi32>
    %c4_i32 = arith.constant 4 : i32
    %c0_i32_76 = arith.constant 0 : i32
    %178 = arith.cmpi eq, %c4_i32, %c0_i32_76 : i32
    %c1_i32_77 = arith.constant 1 : i32
    %179 = arith.select %178, %c1_i32_77, %c4_i32 : i32
    %180 = vector.broadcast %179 : i32 to vector<8x1xi32>
    %181 = arith.remsi %177, %180 : vector<8x1xi32>
    %c0_i32_78 = arith.constant 0 : i32
    %182 = vector.broadcast %c0_i32_78 : i32 to vector<8x1xi32>
    %183 = arith.cmpi ne, %181, %182 : vector<8x1xi32>
    %c0_i32_79 = arith.constant 0 : i32
    %184 = vector.broadcast %c0_i32_79 : i32 to vector<8x1xi32>
    %185 = arith.cmpi slt, %181, %184 : vector<8x1xi32>
    %c0_i32_80 = arith.constant 0 : i32
    %186 = arith.cmpi slt, %179, %c0_i32_80 : i32
    %187 = vector.broadcast %186 : i1 to vector<8x1xi1>
    %188 = vector.broadcast %187 : vector<8x1xi1> to vector<8x1xi1>
    %189 = arith.xori %185, %188 : vector<8x1xi1>
    %190 = arith.andi %189, %183 : vector<8x1xi1>
    %191 = vector.broadcast %179 : i32 to vector<8x1xi32>
    %192 = arith.addi %181, %191 : vector<8x1xi32>
    %193 = arith.select %190, %192, %181 : vector<8x1xi1>, vector<8x1xi32>
    %c0_i32_81 = arith.constant 0 : i32
    %194 = vector.broadcast %c0_i32_81 : i32 to vector<8x1xi32>
    %195 = arith.cmpi ne, %193, %194 : vector<8x1xi32>
    %cst_82 = arith.constant 0.000000e+00 : f32
    %196 = vector.shape_cast %195 : vector<8x1xi1> to vector<8x1xi1>
    %197 = vector.broadcast %196 : vector<8x1xi1> to vector<8x192xi1>
    %198 = vector.broadcast %cst_82 : f32 to vector<8x192xf32>
    %199 = arith.select %197, %174, %198 : vector<8x192xi1>, vector<8x192xf32>
    %c4_i32_83 = arith.constant 4 : i32
    %c0_i32_84 = arith.constant 0 : i32
    %200 = arith.cmpi eq, %c4_i32_83, %c0_i32_84 : i32
    %c1_i32_85 = arith.constant 1 : i32
    %201 = arith.select %200, %c1_i32_85, %c4_i32_83 : i32
    %202 = vector.broadcast %201 : i32 to vector<8x1xi32>
    %203 = arith.remsi %177, %202 : vector<8x1xi32>
    %c0_i32_86 = arith.constant 0 : i32
    %204 = vector.broadcast %c0_i32_86 : i32 to vector<8x1xi32>
    %205 = arith.cmpi ne, %203, %204 : vector<8x1xi32>
    %c0_i32_87 = arith.constant 0 : i32
    %206 = vector.broadcast %c0_i32_87 : i32 to vector<8x1xi32>
    %207 = arith.cmpi slt, %203, %206 : vector<8x1xi32>
    %c0_i32_88 = arith.constant 0 : i32
    %208 = arith.cmpi slt, %201, %c0_i32_88 : i32
    %209 = vector.broadcast %208 : i1 to vector<8x1xi1>
    %210 = vector.broadcast %209 : vector<8x1xi1> to vector<8x1xi1>
    %211 = arith.xori %207, %210 : vector<8x1xi1>
    %212 = arith.andi %211, %205 : vector<8x1xi1>
    %213 = vector.broadcast %201 : i32 to vector<8x1xi32>
    %214 = arith.addi %203, %213 : vector<8x1xi32>
    %215 = arith.select %212, %214, %203 : vector<8x1xi1>, vector<8x1xi32>
    %c3_i32 = arith.constant 3 : i32
    %216 = vector.broadcast %c3_i32 : i32 to vector<8x1xi32>
    %217 = arith.cmpi ne, %215, %216 : vector<8x1xi32>
    %cst_89 = arith.constant 0.000000e+00 : f32
    %218 = vector.shape_cast %217 : vector<8x1xi1> to vector<8x1xi1>
    %219 = vector.broadcast %218 : vector<8x1xi1> to vector<8x192xi1>
    %220 = vector.broadcast %cst_89 : f32 to vector<8x192xf32>
    %221 = arith.select %219, %176, %220 : vector<8x192xi1>, vector<8x192xf32>
    %c0_90 = arith.constant 0 : index
    %c0_91 = arith.constant 0 : index
    %c0_92 = arith.constant 0 : index
    %222 = vector.load %arg3[%c0_90, %c0_91, %c0_92] : memref<3x192x256xf32, #tpu.memory_space<vmem>>, vector<1x192x256xf32>
    %223 = vector.shape_cast %222 : vector<1x192x256xf32> to vector<192x256xf32>
    %cst_93 = arith.constant dense<0.000000e+00> : vector<8x256xf32>
    %224 = tpu.matmul %199, %223, %cst_93 {dimension_numbers = #tpu.dot_dimension_numbers<[1], [0], [0], [1], [0, 0, 1, 1], [], []>} : vector<8x192xf32>, vector<192x256xf32>, vector<8x256xf32> -> vector<8x256xf32>
    %c1_94 = arith.constant 1 : index
    %c0_95 = arith.constant 0 : index
    %c0_96 = arith.constant 0 : index
    %225 = vector.load %arg3[%c1_94, %c0_95, %c0_96] : memref<3x192x256xf32, #tpu.memory_space<vmem>>, vector<1x192x256xf32>
    %226 = vector.shape_cast %225 : vector<1x192x256xf32> to vector<192x256xf32>
    %cst_97 = arith.constant dense<0.000000e+00> : vector<8x256xf32>
    %227 = tpu.matmul %170, %226, %cst_97 {dimension_numbers = #tpu.dot_dimension_numbers<[1], [0], [0], [1], [0, 0, 1, 1], [], []>} : vector<8x192xf32>, vector<192x256xf32>, vector<8x256xf32> -> vector<8x256xf32>
    %228 = arith.addf %224, %227 : vector<8x256xf32>
    %c2_98 = arith.constant 2 : index
    %c0_99 = arith.constant 0 : index
    %c0_100 = arith.constant 0 : index
    %229 = vector.load %arg3[%c2_98, %c0_99, %c0_100] : memref<3x192x256xf32, #tpu.memory_space<vmem>>, vector<1x192x256xf32>
    %230 = vector.shape_cast %229 : vector<1x192x256xf32> to vector<192x256xf32>
    %cst_101 = arith.constant dense<0.000000e+00> : vector<8x256xf32>
    %231 = tpu.matmul %221, %230, %cst_101 {dimension_numbers = #tpu.dot_dimension_numbers<[1], [0], [0], [1], [0, 0, 1, 1], [], []>} : vector<8x192xf32>, vector<192x256xf32>, vector<8x256xf32> -> vector<8x256xf32>
    %232 = arith.addf %228, %231 : vector<8x256xf32>
    %233 = vector.broadcast %171 : vector<1x256xf32> to vector<8x256xf32>
    %234 = arith.addf %232, %233 : vector<8x256xf32>
    %c0_102 = arith.constant 0 : index
    %c0_103 = arith.constant 0 : index
    %235 = vector.load %arg4[%c0_102, %c0_103] : memref<256x32xf32, #tpu.memory_space<vmem>>, vector<256x32xf32>
    %cst_104 = arith.constant dense<0.000000e+00> : vector<8x32xf32>
    %236 = tpu.matmul %234, %235, %cst_104 {dimension_numbers = #tpu.dot_dimension_numbers<[1], [0], [0], [1], [0, 0, 1, 1], [], []>} : vector<8x256xf32>, vector<256x32xf32>, vector<8x32xf32> -> vector<8x32xf32>
    %c3 = arith.constant 3 : index
    %c0_105 = arith.constant 0 : index
    %237 = vector.load %arg10[%c3, %c0_105] : memref<32x256xf32, #tpu.memory_space<vmem>>, vector<1x32xf32>
    %238 = vector.broadcast %237 : vector<1x32xf32> to vector<8x32xf32>
    %239 = arith.addf %236, %238 : vector<8x32xf32>
    %c4 = arith.constant 4 : index
    %c0_106 = arith.constant 0 : index
    %240 = vector.load %arg10[%c4, %c0_106] : memref<32x256xf32, #tpu.memory_space<vmem>>, vector<1x32xf32>
    %c5 = arith.constant 5 : index
    %c0_107 = arith.constant 0 : index
    %241 = vector.load %arg10[%c5, %c0_107] : memref<32x256xf32, #tpu.memory_space<vmem>>, vector<5x32xf32>
    %242 = vector.extract_strided_slice %241 {offsets = [0, 0], sizes = [1, 32], strides = [1, 1]} : vector<5x32xf32> to vector<1x32xf32>
    %243 = arith.addf %240, %242 : vector<1x32xf32>
    %244 = vector.extract_strided_slice %239 {offsets = [0, 0], sizes = [4, 32], strides = [1, 1]} : vector<8x32xf32> to vector<4x32xf32>
    %245 = vector.extract_strided_slice %241 {offsets = [1, 0], sizes = [4, 32], strides = [1, 1]} : vector<5x32xf32> to vector<4x32xf32>
    %246 = arith.addf %244, %245 : vector<4x32xf32>
    %247 = vector.extract_strided_slice %241 {offsets = [0, 0], sizes = [1, 32], strides = [1, 1]} : vector<5x32xf32> to vector<1x32xf32>
    %248 = arith.addf %240, %247 : vector<1x32xf32>
    %249 = vector.extract_strided_slice %239 {offsets = [4, 0], sizes = [4, 32], strides = [1, 1]} : vector<8x32xf32> to vector<4x32xf32>
    %250 = vector.extract_strided_slice %241 {offsets = [1, 0], sizes = [4, 32], strides = [1, 1]} : vector<5x32xf32> to vector<4x32xf32>
    %251 = arith.addf %249, %250 : vector<4x32xf32>
    %252 = tpu.concatenate %243, %246, %248, %251 in 0 : vector<1x32xf32>, vector<4x32xf32>, vector<1x32xf32>, vector<4x32xf32> -> vector<10x32xf32>
    %c0_108 = arith.constant 0 : index
    %c0_109 = arith.constant 0 : index
    %253 = vector.load %arg11[%c0_108, %c0_109] : memref<10x10xf32, #tpu.memory_space<vmem>>, vector<10x10xf32>
    %c13 = arith.constant 13 : index
    %c0_110 = arith.constant 0 : index
    %254 = vector.load %arg10[%c13, %c0_110] : memref<32x256xf32, #tpu.memory_space<vmem>>, vector<1x32xf32>
    %c14 = arith.constant 14 : index
    %c0_111 = arith.constant 0 : index
    %255 = vector.load %arg10[%c14, %c0_111] : memref<32x256xf32, #tpu.memory_space<vmem>>, vector<1x32xf32>
    %cst_112 = arith.constant dense<0.000000e+00> : vector<10xf32>
    %256 = vector.multi_reduction <add>, %252, %cst_112 [1] : vector<10x32xf32> to vector<10xf32>
    %257 = vector.shape_cast %256 : vector<10xf32> to vector<10x1xf32>
    %cst_113 = arith.constant 3.200000e+01 : f32
    %258 = vector.broadcast %cst_113 : f32 to vector<10x1xf32>
    %259 = arith.divf %257, %258 : vector<10x1xf32>
    %260 = vector.broadcast %259 : vector<10x1xf32> to vector<10x32xf32>
    %261 = arith.subf %252, %260 : vector<10x32xf32>
    %262 = arith.mulf %261, %261 : vector<10x32xf32>
    %cst_114 = arith.constant dense<0.000000e+00> : vector<10xf32>
    %263 = vector.multi_reduction <add>, %262, %cst_114 [1] : vector<10x32xf32> to vector<10xf32>
    %264 = vector.shape_cast %263 : vector<10xf32> to vector<10x1xf32>
    %cst_115 = arith.constant 3.200000e+01 : f32
    %265 = vector.broadcast %cst_115 : f32 to vector<10x1xf32>
    %266 = arith.divf %264, %265 : vector<10x1xf32>
    %267 = vector.broadcast %259 : vector<10x1xf32> to vector<10x32xf32>
    %268 = arith.subf %252, %267 : vector<10x32xf32>
    %cst_116 = arith.constant 9.99999974E-6 : f32
    %269 = vector.broadcast %cst_116 : f32 to vector<10x1xf32>
    %270 = arith.addf %266, %269 : vector<10x1xf32>
    %271 = math.rsqrt %270 : vector<10x1xf32>
    %272 = vector.broadcast %271 : vector<10x1xf32> to vector<10x32xf32>
    %273 = arith.mulf %268, %272 : vector<10x32xf32>
    %274 = vector.broadcast %254 : vector<1x32xf32> to vector<10x32xf32>
    %275 = arith.mulf %273, %274 : vector<10x32xf32>
    %276 = vector.broadcast %255 : vector<1x32xf32> to vector<10x32xf32>
    %277 = arith.addf %275, %276 : vector<10x32xf32>
    %c0_117 = arith.constant 0 : index
    %c0_118 = arith.constant 0 : index
    %c0_119 = arith.constant 0 : index
    %278 = vector.load %arg5[%c0_117, %c0_118, %c0_119] : memref<2x32x96xf32, #tpu.memory_space<vmem>>, vector<1x32x96xf32>
    %279 = vector.shape_cast %278 : vector<1x32x96xf32> to vector<32x96xf32>
    %cst_120 = arith.constant dense<0.000000e+00> : vector<10x96xf32>
    %280 = tpu.matmul %277, %279, %cst_120 {dimension_numbers = #tpu.dot_dimension_numbers<[1], [0], [0], [1], [0, 0, 1, 1], [], []>} : vector<10x32xf32>, vector<32x96xf32>, vector<10x96xf32> -> vector<10x96xf32>
    %c15 = arith.constant 15 : index
    %c0_121 = arith.constant 0 : index
    %281 = vector.load %arg10[%c15, %c0_121] : memref<32x256xf32, #tpu.memory_space<vmem>>, vector<1x96xf32>
    %282 = vector.broadcast %281 : vector<1x96xf32> to vector<10x96xf32>
    %283 = arith.addf %280, %282 : vector<10x96xf32>
    %c0_122 = arith.constant 0 : index
    %c0_123 = arith.constant 0 : index
    %c0_124 = arith.constant 0 : index
    %284 = vector.load %arg6[%c0_122, %c0_123, %c0_124] : memref<2x32x32xf32, #tpu.memory_space<vmem>>, vector<1x32x32xf32>
    %285 = vector.shape_cast %284 : vector<1x32x32xf32> to vector<32x32xf32>
    %cst_125 = arith.constant 0.000000e+00 : f32
    %286 = vector.broadcast %cst_125 : f32 to vector<10x32xf32>
    %287 = vector.extract_strided_slice %283 {offsets = [0, 0], sizes = [10, 8], strides = [1, 1]} : vector<10x96xf32> to vector<10x8xf32>
    %288 = vector.extract_strided_slice %283 {offsets = [0, 32], sizes = [10, 8], strides = [1, 1]} : vector<10x96xf32> to vector<10x8xf32>
    %289 = vector.extract_strided_slice %283 {offsets = [0, 64], sizes = [10, 8], strides = [1, 1]} : vector<10x96xf32> to vector<10x8xf32>
    %cst_126 = arith.constant dense<0.000000e+00> : vector<10x10xf32>
    %290 = tpu.matmul %287, %288, %cst_126 {dimension_numbers = #tpu.dot_dimension_numbers<[1], [1], [0], [0], [0, 0, 1, 0], [], []>} : vector<10x8xf32>, vector<10x8xf32>, vector<10x10xf32> -> vector<10x10xf32>
    %291 = arith.addf %290, %253 : vector<10x10xf32>
    %cst_127 = arith.constant dense<0xFF800000> : vector<10xf32>
    %292 = vector.multi_reduction <maximumf>, %291, %cst_127 [1] : vector<10x10xf32> to vector<10xf32>
    %293 = vector.shape_cast %292 : vector<10xf32> to vector<10x1xf32>
    %294 = vector.broadcast %293 : vector<10x1xf32> to vector<10x10xf32>
    %295 = arith.subf %291, %294 : vector<10x10xf32>
    %296 = math.exp %295 : vector<10x10xf32>
    %cst_128 = arith.constant dense<0.000000e+00> : vector<10xf32>
    %297 = vector.multi_reduction <add>, %296, %cst_128 [1] : vector<10x10xf32> to vector<10xf32>
    %298 = vector.shape_cast %297 : vector<10xf32> to vector<10x1xf32>
    %299 = vector.broadcast %298 : vector<10x1xf32> to vector<10x10xf32>
    %300 = arith.divf %296, %299 : vector<10x10xf32>
    %cst_129 = arith.constant dense<0.000000e+00> : vector<10x8xf32>
    %301 = tpu.matmul %300, %289, %cst_129 {dimension_numbers = #tpu.dot_dimension_numbers<[1], [0], [0], [1], [0, 0, 1, 1], [], []>} : vector<10x10xf32>, vector<10x8xf32>, vector<10x8xf32> -> vector<10x8xf32>
    %302 = vector.extract_strided_slice %285 {offsets = [0, 0], sizes = [8, 32], strides = [1, 1]} : vector<32x32xf32> to vector<8x32xf32>
    %cst_130 = arith.constant dense<0.000000e+00> : vector<10x32xf32>
    %303 = tpu.matmul %301, %302, %cst_130 {dimension_numbers = #tpu.dot_dimension_numbers<[1], [0], [0], [1], [0, 0, 1, 1], [], []>} : vector<10x8xf32>, vector<8x32xf32>, vector<10x32xf32> -> vector<10x32xf32>
    %304 = arith.addf %286, %303 : vector<10x32xf32>
    %305 = vector.extract_strided_slice %283 {offsets = [0, 8], sizes = [10, 8], strides = [1, 1]} : vector<10x96xf32> to vector<10x8xf32>
    %306 = vector.extract_strided_slice %283 {offsets = [0, 40], sizes = [10, 8], strides = [1, 1]} : vector<10x96xf32> to vector<10x8xf32>
    %307 = vector.extract_strided_slice %283 {offsets = [0, 72], sizes = [10, 8], strides = [1, 1]} : vector<10x96xf32> to vector<10x8xf32>
    %cst_131 = arith.constant dense<0.000000e+00> : vector<10x10xf32>
    %308 = tpu.matmul %305, %306, %cst_131 {dimension_numbers = #tpu.dot_dimension_numbers<[1], [1], [0], [0], [0, 0, 1, 0], [], []>} : vector<10x8xf32>, vector<10x8xf32>, vector<10x10xf32> -> vector<10x10xf32>
    %309 = arith.addf %308, %253 : vector<10x10xf32>
    %cst_132 = arith.constant dense<0xFF800000> : vector<10xf32>
    %310 = vector.multi_reduction <maximumf>, %309, %cst_132 [1] : vector<10x10xf32> to vector<10xf32>
    %311 = vector.shape_cast %310 : vector<10xf32> to vector<10x1xf32>
    %312 = vector.broadcast %311 : vector<10x1xf32> to vector<10x10xf32>
    %313 = arith.subf %309, %312 : vector<10x10xf32>
    %314 = math.exp %313 : vector<10x10xf32>
    %cst_133 = arith.constant dense<0.000000e+00> : vector<10xf32>
    %315 = vector.multi_reduction <add>, %314, %cst_133 [1] : vector<10x10xf32> to vector<10xf32>
    %316 = vector.shape_cast %315 : vector<10xf32> to vector<10x1xf32>
    %317 = vector.broadcast %316 : vector<10x1xf32> to vector<10x10xf32>
    %318 = arith.divf %314, %317 : vector<10x10xf32>
    %cst_134 = arith.constant dense<0.000000e+00> : vector<10x8xf32>
    %319 = tpu.matmul %318, %307, %cst_134 {dimension_numbers = #tpu.dot_dimension_numbers<[1], [0], [0], [1], [0, 0, 1, 1], [], []>} : vector<10x10xf32>, vector<10x8xf32>, vector<10x8xf32> -> vector<10x8xf32>
    %320 = vector.extract_strided_slice %285 {offsets = [8, 0], sizes = [8, 32], strides = [1, 1]} : vector<32x32xf32> to vector<8x32xf32>
    %cst_135 = arith.constant dense<0.000000e+00> : vector<10x32xf32>
    %321 = tpu.matmul %319, %320, %cst_135 {dimension_numbers = #tpu.dot_dimension_numbers<[1], [0], [0], [1], [0, 0, 1, 1], [], []>} : vector<10x8xf32>, vector<8x32xf32>, vector<10x32xf32> -> vector<10x32xf32>
    %322 = arith.addf %304, %321 : vector<10x32xf32>
    %323 = vector.extract_strided_slice %283 {offsets = [0, 16], sizes = [10, 8], strides = [1, 1]} : vector<10x96xf32> to vector<10x8xf32>
    %324 = vector.extract_strided_slice %283 {offsets = [0, 48], sizes = [10, 8], strides = [1, 1]} : vector<10x96xf32> to vector<10x8xf32>
    %325 = vector.extract_strided_slice %283 {offsets = [0, 80], sizes = [10, 8], strides = [1, 1]} : vector<10x96xf32> to vector<10x8xf32>
    %cst_136 = arith.constant dense<0.000000e+00> : vector<10x10xf32>
    %326 = tpu.matmul %323, %324, %cst_136 {dimension_numbers = #tpu.dot_dimension_numbers<[1], [1], [0], [0], [0, 0, 1, 0], [], []>} : vector<10x8xf32>, vector<10x8xf32>, vector<10x10xf32> -> vector<10x10xf32>
    %327 = arith.addf %326, %253 : vector<10x10xf32>
    %cst_137 = arith.constant dense<0xFF800000> : vector<10xf32>
    %328 = vector.multi_reduction <maximumf>, %327, %cst_137 [1] : vector<10x10xf32> to vector<10xf32>
    %329 = vector.shape_cast %328 : vector<10xf32> to vector<10x1xf32>
    %330 = vector.broadcast %329 : vector<10x1xf32> to vector<10x10xf32>
    %331 = arith.subf %327, %330 : vector<10x10xf32>
    %332 = math.exp %331 : vector<10x10xf32>
    %cst_138 = arith.constant dense<0.000000e+00> : vector<10xf32>
    %333 = vector.multi_reduction <add>, %332, %cst_138 [1] : vector<10x10xf32> to vector<10xf32>
    %334 = vector.shape_cast %333 : vector<10xf32> to vector<10x1xf32>
    %335 = vector.broadcast %334 : vector<10x1xf32> to vector<10x10xf32>
    %336 = arith.divf %332, %335 : vector<10x10xf32>
    %cst_139 = arith.constant dense<0.000000e+00> : vector<10x8xf32>
    %337 = tpu.matmul %336, %325, %cst_139 {dimension_numbers = #tpu.dot_dimension_numbers<[1], [0], [0], [1], [0, 0, 1, 1], [], []>} : vector<10x10xf32>, vector<10x8xf32>, vector<10x8xf32> -> vector<10x8xf32>
    %338 = vector.extract_strided_slice %285 {offsets = [16, 0], sizes = [8, 32], strides = [1, 1]} : vector<32x32xf32> to vector<8x32xf32>
    %cst_140 = arith.constant dense<0.000000e+00> : vector<10x32xf32>
    %339 = tpu.matmul %337, %338, %cst_140 {dimension_numbers = #tpu.dot_dimension_numbers<[1], [0], [0], [1], [0, 0, 1, 1], [], []>} : vector<10x8xf32>, vector<8x32xf32>, vector<10x32xf32> -> vector<10x32xf32>
    %340 = arith.addf %322, %339 : vector<10x32xf32>
    %341 = vector.extract_strided_slice %283 {offsets = [0, 24], sizes = [10, 8], strides = [1, 1]} : vector<10x96xf32> to vector<10x8xf32>
    %342 = vector.extract_strided_slice %283 {offsets = [0, 56], sizes = [10, 8], strides = [1, 1]} : vector<10x96xf32> to vector<10x8xf32>
    %343 = vector.extract_strided_slice %283 {offsets = [0, 88], sizes = [10, 8], strides = [1, 1]} : vector<10x96xf32> to vector<10x8xf32>
    %cst_141 = arith.constant dense<0.000000e+00> : vector<10x10xf32>
    %344 = tpu.matmul %341, %342, %cst_141 {dimension_numbers = #tpu.dot_dimension_numbers<[1], [1], [0], [0], [0, 0, 1, 0], [], []>} : vector<10x8xf32>, vector<10x8xf32>, vector<10x10xf32> -> vector<10x10xf32>
    %345 = arith.addf %344, %253 : vector<10x10xf32>
    %cst_142 = arith.constant dense<0xFF800000> : vector<10xf32>
    %346 = vector.multi_reduction <maximumf>, %345, %cst_142 [1] : vector<10x10xf32> to vector<10xf32>
    %347 = vector.shape_cast %346 : vector<10xf32> to vector<10x1xf32>
    %348 = vector.broadcast %347 : vector<10x1xf32> to vector<10x10xf32>
    %349 = arith.subf %345, %348 : vector<10x10xf32>
    %350 = math.exp %349 : vector<10x10xf32>
    %cst_143 = arith.constant dense<0.000000e+00> : vector<10xf32>
    %351 = vector.multi_reduction <add>, %350, %cst_143 [1] : vector<10x10xf32> to vector<10xf32>
    %352 = vector.shape_cast %351 : vector<10xf32> to vector<10x1xf32>
    %353 = vector.broadcast %352 : vector<10x1xf32> to vector<10x10xf32>
    %354 = arith.divf %350, %353 : vector<10x10xf32>
    %cst_144 = arith.constant dense<0.000000e+00> : vector<10x8xf32>
    %355 = tpu.matmul %354, %343, %cst_144 {dimension_numbers = #tpu.dot_dimension_numbers<[1], [0], [0], [1], [0, 0, 1, 1], [], []>} : vector<10x10xf32>, vector<10x8xf32>, vector<10x8xf32> -> vector<10x8xf32>
    %356 = vector.extract_strided_slice %285 {offsets = [24, 0], sizes = [8, 32], strides = [1, 1]} : vector<32x32xf32> to vector<8x32xf32>
    %cst_145 = arith.constant dense<0.000000e+00> : vector<10x32xf32>
    %357 = tpu.matmul %355, %356, %cst_145 {dimension_numbers = #tpu.dot_dimension_numbers<[1], [0], [0], [1], [0, 0, 1, 1], [], []>} : vector<10x8xf32>, vector<8x32xf32>, vector<10x32xf32> -> vector<10x32xf32>
    %358 = arith.addf %340, %357 : vector<10x32xf32>
    %359 = arith.addf %252, %358 : vector<10x32xf32>
    %c16 = arith.constant 16 : index
    %c0_146 = arith.constant 0 : index
    %360 = vector.load %arg10[%c16, %c0_146] : memref<32x256xf32, #tpu.memory_space<vmem>>, vector<1x32xf32>
    %361 = vector.broadcast %360 : vector<1x32xf32> to vector<10x32xf32>
    %362 = arith.addf %359, %361 : vector<10x32xf32>
    %c17 = arith.constant 17 : index
    %c0_147 = arith.constant 0 : index
    %363 = vector.load %arg10[%c17, %c0_147] : memref<32x256xf32, #tpu.memory_space<vmem>>, vector<1x32xf32>
    %c18 = arith.constant 18 : index
    %c0_148 = arith.constant 0 : index
    %364 = vector.load %arg10[%c18, %c0_148] : memref<32x256xf32, #tpu.memory_space<vmem>>, vector<1x32xf32>
    %cst_149 = arith.constant dense<0.000000e+00> : vector<10xf32>
    %365 = vector.multi_reduction <add>, %362, %cst_149 [1] : vector<10x32xf32> to vector<10xf32>
    %366 = vector.shape_cast %365 : vector<10xf32> to vector<10x1xf32>
    %cst_150 = arith.constant 3.200000e+01 : f32
    %367 = vector.broadcast %cst_150 : f32 to vector<10x1xf32>
    %368 = arith.divf %366, %367 : vector<10x1xf32>
    %369 = vector.broadcast %368 : vector<10x1xf32> to vector<10x32xf32>
    %370 = arith.subf %362, %369 : vector<10x32xf32>
    %371 = arith.mulf %370, %370 : vector<10x32xf32>
    %cst_151 = arith.constant dense<0.000000e+00> : vector<10xf32>
    %372 = vector.multi_reduction <add>, %371, %cst_151 [1] : vector<10x32xf32> to vector<10xf32>
    %373 = vector.shape_cast %372 : vector<10xf32> to vector<10x1xf32>
    %cst_152 = arith.constant 3.200000e+01 : f32
    %374 = vector.broadcast %cst_152 : f32 to vector<10x1xf32>
    %375 = arith.divf %373, %374 : vector<10x1xf32>
    %376 = vector.broadcast %368 : vector<10x1xf32> to vector<10x32xf32>
    %377 = arith.subf %362, %376 : vector<10x32xf32>
    %cst_153 = arith.constant 9.99999974E-6 : f32
    %378 = vector.broadcast %cst_153 : f32 to vector<10x1xf32>
    %379 = arith.addf %375, %378 : vector<10x1xf32>
    %380 = math.rsqrt %379 : vector<10x1xf32>
    %381 = vector.broadcast %380 : vector<10x1xf32> to vector<10x32xf32>
    %382 = arith.mulf %377, %381 : vector<10x32xf32>
    %383 = vector.broadcast %363 : vector<1x32xf32> to vector<10x32xf32>
    %384 = arith.mulf %382, %383 : vector<10x32xf32>
    %385 = vector.broadcast %364 : vector<1x32xf32> to vector<10x32xf32>
    %386 = arith.addf %384, %385 : vector<10x32xf32>
    %c0_154 = arith.constant 0 : index
    %c0_155 = arith.constant 0 : index
    %c0_156 = arith.constant 0 : index
    %387 = vector.load %arg7[%c0_154, %c0_155, %c0_156] : memref<2x32x64xf32, #tpu.memory_space<vmem>>, vector<1x32x64xf32>
    %388 = vector.shape_cast %387 : vector<1x32x64xf32> to vector<32x64xf32>
    %cst_157 = arith.constant dense<0.000000e+00> : vector<10x64xf32>
    %389 = tpu.matmul %386, %388, %cst_157 {dimension_numbers = #tpu.dot_dimension_numbers<[1], [0], [0], [1], [0, 0, 1, 1], [], []>} : vector<10x32xf32>, vector<32x64xf32>, vector<10x64xf32> -> vector<10x64xf32>
    %c19 = arith.constant 19 : index
    %c0_158 = arith.constant 0 : index
    %390 = vector.load %arg10[%c19, %c0_158] : memref<32x256xf32, #tpu.memory_space<vmem>>, vector<1x64xf32>
    %391 = vector.broadcast %390 : vector<1x64xf32> to vector<10x64xf32>
    %392 = arith.addf %389, %391 : vector<10x64xf32>
    %cst_159 = arith.constant 5.000000e-01 : f32
    %393 = vector.broadcast %cst_159 : f32 to vector<10x64xf32>
    %394 = arith.mulf %393, %392 : vector<10x64xf32>
    %cst_160 = arith.constant 1.41421354 : f32
    %395 = vector.broadcast %cst_160 : f32 to vector<10x64xf32>
    %396 = arith.divf %392, %395 : vector<10x64xf32>
    %397 = math.erf %396 : vector<10x64xf32>
    %cst_161 = arith.constant 1.000000e+00 : f32
    %398 = vector.broadcast %cst_161 : f32 to vector<10x64xf32>
    %399 = arith.addf %398, %397 : vector<10x64xf32>
    %400 = arith.mulf %394, %399 : vector<10x64xf32>
    %c0_162 = arith.constant 0 : index
    %c0_163 = arith.constant 0 : index
    %c0_164 = arith.constant 0 : index
    %401 = vector.load %arg8[%c0_162, %c0_163, %c0_164] : memref<2x64x32xf32, #tpu.memory_space<vmem>>, vector<1x64x32xf32>
    %402 = vector.shape_cast %401 : vector<1x64x32xf32> to vector<64x32xf32>
    %cst_165 = arith.constant dense<0.000000e+00> : vector<10x32xf32>
    %403 = tpu.matmul %400, %402, %cst_165 {dimension_numbers = #tpu.dot_dimension_numbers<[1], [0], [0], [1], [0, 0, 1, 1], [], []>} : vector<10x64xf32>, vector<64x32xf32>, vector<10x32xf32> -> vector<10x32xf32>
    %c20 = arith.constant 20 : index
    %c0_166 = arith.constant 0 : index
    %404 = vector.load %arg10[%c20, %c0_166] : memref<32x256xf32, #tpu.memory_space<vmem>>, vector<1x32xf32>
    %405 = vector.broadcast %404 : vector<1x32xf32> to vector<10x32xf32>
    %406 = arith.addf %403, %405 : vector<10x32xf32>
    %407 = arith.addf %362, %406 : vector<10x32xf32>
    %c21 = arith.constant 21 : index
    %c0_167 = arith.constant 0 : index
    %408 = vector.load %arg10[%c21, %c0_167] : memref<32x256xf32, #tpu.memory_space<vmem>>, vector<1x32xf32>
    %c22 = arith.constant 22 : index
    %c0_168 = arith.constant 0 : index
    %409 = vector.load %arg10[%c22, %c0_168] : memref<32x256xf32, #tpu.memory_space<vmem>>, vector<1x32xf32>
    %cst_169 = arith.constant dense<0.000000e+00> : vector<10xf32>
    %410 = vector.multi_reduction <add>, %407, %cst_169 [1] : vector<10x32xf32> to vector<10xf32>
    %411 = vector.shape_cast %410 : vector<10xf32> to vector<10x1xf32>
    %cst_170 = arith.constant 3.200000e+01 : f32
    %412 = vector.broadcast %cst_170 : f32 to vector<10x1xf32>
    %413 = arith.divf %411, %412 : vector<10x1xf32>
    %414 = vector.broadcast %413 : vector<10x1xf32> to vector<10x32xf32>
    %415 = arith.subf %407, %414 : vector<10x32xf32>
    %416 = arith.mulf %415, %415 : vector<10x32xf32>
    %cst_171 = arith.constant dense<0.000000e+00> : vector<10xf32>
    %417 = vector.multi_reduction <add>, %416, %cst_171 [1] : vector<10x32xf32> to vector<10xf32>
    %418 = vector.shape_cast %417 : vector<10xf32> to vector<10x1xf32>
    %cst_172 = arith.constant 3.200000e+01 : f32
    %419 = vector.broadcast %cst_172 : f32 to vector<10x1xf32>
    %420 = arith.divf %418, %419 : vector<10x1xf32>
    %421 = vector.broadcast %413 : vector<10x1xf32> to vector<10x32xf32>
    %422 = arith.subf %407, %421 : vector<10x32xf32>
    %cst_173 = arith.constant 9.99999974E-6 : f32
    %423 = vector.broadcast %cst_173 : f32 to vector<10x1xf32>
    %424 = arith.addf %420, %423 : vector<10x1xf32>
    %425 = math.rsqrt %424 : vector<10x1xf32>
    %426 = vector.broadcast %425 : vector<10x1xf32> to vector<10x32xf32>
    %427 = arith.mulf %422, %426 : vector<10x32xf32>
    %428 = vector.broadcast %408 : vector<1x32xf32> to vector<10x32xf32>
    %429 = arith.mulf %427, %428 : vector<10x32xf32>
    %430 = vector.broadcast %409 : vector<1x32xf32> to vector<10x32xf32>
    %431 = arith.addf %429, %430 : vector<10x32xf32>
    %c1_174 = arith.constant 1 : index
    %c0_175 = arith.constant 0 : index
    %c0_176 = arith.constant 0 : index
    %432 = vector.load %arg5[%c1_174, %c0_175, %c0_176] : memref<2x32x96xf32, #tpu.memory_space<vmem>>, vector<1x32x96xf32>
    %433 = vector.shape_cast %432 : vector<1x32x96xf32> to vector<32x96xf32>
    %cst_177 = arith.constant dense<0.000000e+00> : vector<10x96xf32>
    %434 = tpu.matmul %431, %433, %cst_177 {dimension_numbers = #tpu.dot_dimension_numbers<[1], [0], [0], [1], [0, 0, 1, 1], [], []>} : vector<10x32xf32>, vector<32x96xf32>, vector<10x96xf32> -> vector<10x96xf32>
    %c23 = arith.constant 23 : index
    %c0_178 = arith.constant 0 : index
    %435 = vector.load %arg10[%c23, %c0_178] : memref<32x256xf32, #tpu.memory_space<vmem>>, vector<1x96xf32>
    %436 = vector.broadcast %435 : vector<1x96xf32> to vector<10x96xf32>
    %437 = arith.addf %434, %436 : vector<10x96xf32>
    %c1_179 = arith.constant 1 : index
    %c0_180 = arith.constant 0 : index
    %c0_181 = arith.constant 0 : index
    %438 = vector.load %arg6[%c1_179, %c0_180, %c0_181] : memref<2x32x32xf32, #tpu.memory_space<vmem>>, vector<1x32x32xf32>
    %439 = vector.shape_cast %438 : vector<1x32x32xf32> to vector<32x32xf32>
    %cst_182 = arith.constant 0.000000e+00 : f32
    %440 = vector.broadcast %cst_182 : f32 to vector<10x32xf32>
    %441 = vector.extract_strided_slice %437 {offsets = [0, 0], sizes = [10, 8], strides = [1, 1]} : vector<10x96xf32> to vector<10x8xf32>
    %442 = vector.extract_strided_slice %437 {offsets = [0, 32], sizes = [10, 8], strides = [1, 1]} : vector<10x96xf32> to vector<10x8xf32>
    %443 = vector.extract_strided_slice %437 {offsets = [0, 64], sizes = [10, 8], strides = [1, 1]} : vector<10x96xf32> to vector<10x8xf32>
    %cst_183 = arith.constant dense<0.000000e+00> : vector<10x10xf32>
    %444 = tpu.matmul %441, %442, %cst_183 {dimension_numbers = #tpu.dot_dimension_numbers<[1], [1], [0], [0], [0, 0, 1, 0], [], []>} : vector<10x8xf32>, vector<10x8xf32>, vector<10x10xf32> -> vector<10x10xf32>
    %445 = arith.addf %444, %253 : vector<10x10xf32>
    %cst_184 = arith.constant dense<0xFF800000> : vector<10xf32>
    %446 = vector.multi_reduction <maximumf>, %445, %cst_184 [1] : vector<10x10xf32> to vector<10xf32>
    %447 = vector.shape_cast %446 : vector<10xf32> to vector<10x1xf32>
    %448 = vector.broadcast %447 : vector<10x1xf32> to vector<10x10xf32>
    %449 = arith.subf %445, %448 : vector<10x10xf32>
    %450 = math.exp %449 : vector<10x10xf32>
    %cst_185 = arith.constant dense<0.000000e+00> : vector<10xf32>
    %451 = vector.multi_reduction <add>, %450, %cst_185 [1] : vector<10x10xf32> to vector<10xf32>
    %452 = vector.shape_cast %451 : vector<10xf32> to vector<10x1xf32>
    %453 = vector.broadcast %452 : vector<10x1xf32> to vector<10x10xf32>
    %454 = arith.divf %450, %453 : vector<10x10xf32>
    %cst_186 = arith.constant dense<0.000000e+00> : vector<10x8xf32>
    %455 = tpu.matmul %454, %443, %cst_186 {dimension_numbers = #tpu.dot_dimension_numbers<[1], [0], [0], [1], [0, 0, 1, 1], [], []>} : vector<10x10xf32>, vector<10x8xf32>, vector<10x8xf32> -> vector<10x8xf32>
    %456 = vector.extract_strided_slice %439 {offsets = [0, 0], sizes = [8, 32], strides = [1, 1]} : vector<32x32xf32> to vector<8x32xf32>
    %cst_187 = arith.constant dense<0.000000e+00> : vector<10x32xf32>
    %457 = tpu.matmul %455, %456, %cst_187 {dimension_numbers = #tpu.dot_dimension_numbers<[1], [0], [0], [1], [0, 0, 1, 1], [], []>} : vector<10x8xf32>, vector<8x32xf32>, vector<10x32xf32> -> vector<10x32xf32>
    %458 = arith.addf %440, %457 : vector<10x32xf32>
    %459 = vector.extract_strided_slice %437 {offsets = [0, 8], sizes = [10, 8], strides = [1, 1]} : vector<10x96xf32> to vector<10x8xf32>
    %460 = vector.extract_strided_slice %437 {offsets = [0, 40], sizes = [10, 8], strides = [1, 1]} : vector<10x96xf32> to vector<10x8xf32>
    %461 = vector.extract_strided_slice %437 {offsets = [0, 72], sizes = [10, 8], strides = [1, 1]} : vector<10x96xf32> to vector<10x8xf32>
    %cst_188 = arith.constant dense<0.000000e+00> : vector<10x10xf32>
    %462 = tpu.matmul %459, %460, %cst_188 {dimension_numbers = #tpu.dot_dimension_numbers<[1], [1], [0], [0], [0, 0, 1, 0], [], []>} : vector<10x8xf32>, vector<10x8xf32>, vector<10x10xf32> -> vector<10x10xf32>
    %463 = arith.addf %462, %253 : vector<10x10xf32>
    %cst_189 = arith.constant dense<0xFF800000> : vector<10xf32>
    %464 = vector.multi_reduction <maximumf>, %463, %cst_189 [1] : vector<10x10xf32> to vector<10xf32>
    %465 = vector.shape_cast %464 : vector<10xf32> to vector<10x1xf32>
    %466 = vector.broadcast %465 : vector<10x1xf32> to vector<10x10xf32>
    %467 = arith.subf %463, %466 : vector<10x10xf32>
    %468 = math.exp %467 : vector<10x10xf32>
    %cst_190 = arith.constant dense<0.000000e+00> : vector<10xf32>
    %469 = vector.multi_reduction <add>, %468, %cst_190 [1] : vector<10x10xf32> to vector<10xf32>
    %470 = vector.shape_cast %469 : vector<10xf32> to vector<10x1xf32>
    %471 = vector.broadcast %470 : vector<10x1xf32> to vector<10x10xf32>
    %472 = arith.divf %468, %471 : vector<10x10xf32>
    %cst_191 = arith.constant dense<0.000000e+00> : vector<10x8xf32>
    %473 = tpu.matmul %472, %461, %cst_191 {dimension_numbers = #tpu.dot_dimension_numbers<[1], [0], [0], [1], [0, 0, 1, 1], [], []>} : vector<10x10xf32>, vector<10x8xf32>, vector<10x8xf32> -> vector<10x8xf32>
    %474 = vector.extract_strided_slice %439 {offsets = [8, 0], sizes = [8, 32], strides = [1, 1]} : vector<32x32xf32> to vector<8x32xf32>
    %cst_192 = arith.constant dense<0.000000e+00> : vector<10x32xf32>
    %475 = tpu.matmul %473, %474, %cst_192 {dimension_numbers = #tpu.dot_dimension_numbers<[1], [0], [0], [1], [0, 0, 1, 1], [], []>} : vector<10x8xf32>, vector<8x32xf32>, vector<10x32xf32> -> vector<10x32xf32>
    %476 = arith.addf %458, %475 : vector<10x32xf32>
    %477 = vector.extract_strided_slice %437 {offsets = [0, 16], sizes = [10, 8], strides = [1, 1]} : vector<10x96xf32> to vector<10x8xf32>
    %478 = vector.extract_strided_slice %437 {offsets = [0, 48], sizes = [10, 8], strides = [1, 1]} : vector<10x96xf32> to vector<10x8xf32>
    %479 = vector.extract_strided_slice %437 {offsets = [0, 80], sizes = [10, 8], strides = [1, 1]} : vector<10x96xf32> to vector<10x8xf32>
    %cst_193 = arith.constant dense<0.000000e+00> : vector<10x10xf32>
    %480 = tpu.matmul %477, %478, %cst_193 {dimension_numbers = #tpu.dot_dimension_numbers<[1], [1], [0], [0], [0, 0, 1, 0], [], []>} : vector<10x8xf32>, vector<10x8xf32>, vector<10x10xf32> -> vector<10x10xf32>
    %481 = arith.addf %480, %253 : vector<10x10xf32>
    %cst_194 = arith.constant dense<0xFF800000> : vector<10xf32>
    %482 = vector.multi_reduction <maximumf>, %481, %cst_194 [1] : vector<10x10xf32> to vector<10xf32>
    %483 = vector.shape_cast %482 : vector<10xf32> to vector<10x1xf32>
    %484 = vector.broadcast %483 : vector<10x1xf32> to vector<10x10xf32>
    %485 = arith.subf %481, %484 : vector<10x10xf32>
    %486 = math.exp %485 : vector<10x10xf32>
    %cst_195 = arith.constant dense<0.000000e+00> : vector<10xf32>
    %487 = vector.multi_reduction <add>, %486, %cst_195 [1] : vector<10x10xf32> to vector<10xf32>
    %488 = vector.shape_cast %487 : vector<10xf32> to vector<10x1xf32>
    %489 = vector.broadcast %488 : vector<10x1xf32> to vector<10x10xf32>
    %490 = arith.divf %486, %489 : vector<10x10xf32>
    %cst_196 = arith.constant dense<0.000000e+00> : vector<10x8xf32>
    %491 = tpu.matmul %490, %479, %cst_196 {dimension_numbers = #tpu.dot_dimension_numbers<[1], [0], [0], [1], [0, 0, 1, 1], [], []>} : vector<10x10xf32>, vector<10x8xf32>, vector<10x8xf32> -> vector<10x8xf32>
    %492 = vector.extract_strided_slice %439 {offsets = [16, 0], sizes = [8, 32], strides = [1, 1]} : vector<32x32xf32> to vector<8x32xf32>
    %cst_197 = arith.constant dense<0.000000e+00> : vector<10x32xf32>
    %493 = tpu.matmul %491, %492, %cst_197 {dimension_numbers = #tpu.dot_dimension_numbers<[1], [0], [0], [1], [0, 0, 1, 1], [], []>} : vector<10x8xf32>, vector<8x32xf32>, vector<10x32xf32> -> vector<10x32xf32>
    %494 = arith.addf %476, %493 : vector<10x32xf32>
    %495 = vector.extract_strided_slice %437 {offsets = [0, 24], sizes = [10, 8], strides = [1, 1]} : vector<10x96xf32> to vector<10x8xf32>
    %496 = vector.extract_strided_slice %437 {offsets = [0, 56], sizes = [10, 8], strides = [1, 1]} : vector<10x96xf32> to vector<10x8xf32>
    %497 = vector.extract_strided_slice %437 {offsets = [0, 88], sizes = [10, 8], strides = [1, 1]} : vector<10x96xf32> to vector<10x8xf32>
    %cst_198 = arith.constant dense<0.000000e+00> : vector<10x10xf32>
    %498 = tpu.matmul %495, %496, %cst_198 {dimension_numbers = #tpu.dot_dimension_numbers<[1], [1], [0], [0], [0, 0, 1, 0], [], []>} : vector<10x8xf32>, vector<10x8xf32>, vector<10x10xf32> -> vector<10x10xf32>
    %499 = arith.addf %498, %253 : vector<10x10xf32>
    %cst_199 = arith.constant dense<0xFF800000> : vector<10xf32>
    %500 = vector.multi_reduction <maximumf>, %499, %cst_199 [1] : vector<10x10xf32> to vector<10xf32>
    %501 = vector.shape_cast %500 : vector<10xf32> to vector<10x1xf32>
    %502 = vector.broadcast %501 : vector<10x1xf32> to vector<10x10xf32>
    %503 = arith.subf %499, %502 : vector<10x10xf32>
    %504 = math.exp %503 : vector<10x10xf32>
    %cst_200 = arith.constant dense<0.000000e+00> : vector<10xf32>
    %505 = vector.multi_reduction <add>, %504, %cst_200 [1] : vector<10x10xf32> to vector<10xf32>
    %506 = vector.shape_cast %505 : vector<10xf32> to vector<10x1xf32>
    %507 = vector.broadcast %506 : vector<10x1xf32> to vector<10x10xf32>
    %508 = arith.divf %504, %507 : vector<10x10xf32>
    %cst_201 = arith.constant dense<0.000000e+00> : vector<10x8xf32>
    %509 = tpu.matmul %508, %497, %cst_201 {dimension_numbers = #tpu.dot_dimension_numbers<[1], [0], [0], [1], [0, 0, 1, 1], [], []>} : vector<10x10xf32>, vector<10x8xf32>, vector<10x8xf32> -> vector<10x8xf32>
    %510 = vector.extract_strided_slice %439 {offsets = [24, 0], sizes = [8, 32], strides = [1, 1]} : vector<32x32xf32> to vector<8x32xf32>
    %cst_202 = arith.constant dense<0.000000e+00> : vector<10x32xf32>
    %511 = tpu.matmul %509, %510, %cst_202 {dimension_numbers = #tpu.dot_dimension_numbers<[1], [0], [0], [1], [0, 0, 1, 1], [], []>} : vector<10x8xf32>, vector<8x32xf32>, vector<10x32xf32> -> vector<10x32xf32>
    %512 = arith.addf %494, %511 : vector<10x32xf32>
    %513 = arith.addf %407, %512 : vector<10x32xf32>
    %c24 = arith.constant 24 : index
    %c0_203 = arith.constant 0 : index
    %514 = vector.load %arg10[%c24, %c0_203] : memref<32x256xf32, #tpu.memory_space<vmem>>, vector<1x32xf32>
    %515 = vector.broadcast %514 : vector<1x32xf32> to vector<10x32xf32>
    %516 = arith.addf %513, %515 : vector<10x32xf32>
    %c25 = arith.constant 25 : index
    %c0_204 = arith.constant 0 : index
    %517 = vector.load %arg10[%c25, %c0_204] : memref<32x256xf32, #tpu.memory_space<vmem>>, vector<1x32xf32>
    %c26 = arith.constant 26 : index
    %c0_205 = arith.constant 0 : index
    %518 = vector.load %arg10[%c26, %c0_205] : memref<32x256xf32, #tpu.memory_space<vmem>>, vector<1x32xf32>
    %cst_206 = arith.constant dense<0.000000e+00> : vector<10xf32>
    %519 = vector.multi_reduction <add>, %516, %cst_206 [1] : vector<10x32xf32> to vector<10xf32>
    %520 = vector.shape_cast %519 : vector<10xf32> to vector<10x1xf32>
    %cst_207 = arith.constant 3.200000e+01 : f32
    %521 = vector.broadcast %cst_207 : f32 to vector<10x1xf32>
    %522 = arith.divf %520, %521 : vector<10x1xf32>
    %523 = vector.broadcast %522 : vector<10x1xf32> to vector<10x32xf32>
    %524 = arith.subf %516, %523 : vector<10x32xf32>
    %525 = arith.mulf %524, %524 : vector<10x32xf32>
    %cst_208 = arith.constant dense<0.000000e+00> : vector<10xf32>
    %526 = vector.multi_reduction <add>, %525, %cst_208 [1] : vector<10x32xf32> to vector<10xf32>
    %527 = vector.shape_cast %526 : vector<10xf32> to vector<10x1xf32>
    %cst_209 = arith.constant 3.200000e+01 : f32
    %528 = vector.broadcast %cst_209 : f32 to vector<10x1xf32>
    %529 = arith.divf %527, %528 : vector<10x1xf32>
    %530 = vector.broadcast %522 : vector<10x1xf32> to vector<10x32xf32>
    %531 = arith.subf %516, %530 : vector<10x32xf32>
    %cst_210 = arith.constant 9.99999974E-6 : f32
    %532 = vector.broadcast %cst_210 : f32 to vector<10x1xf32>
    %533 = arith.addf %529, %532 : vector<10x1xf32>
    %534 = math.rsqrt %533 : vector<10x1xf32>
    %535 = vector.broadcast %534 : vector<10x1xf32> to vector<10x32xf32>
    %536 = arith.mulf %531, %535 : vector<10x32xf32>
    %537 = vector.broadcast %517 : vector<1x32xf32> to vector<10x32xf32>
    %538 = arith.mulf %536, %537 : vector<10x32xf32>
    %539 = vector.broadcast %518 : vector<1x32xf32> to vector<10x32xf32>
    %540 = arith.addf %538, %539 : vector<10x32xf32>
    %c1_211 = arith.constant 1 : index
    %c0_212 = arith.constant 0 : index
    %c0_213 = arith.constant 0 : index
    %541 = vector.load %arg7[%c1_211, %c0_212, %c0_213] : memref<2x32x64xf32, #tpu.memory_space<vmem>>, vector<1x32x64xf32>
    %542 = vector.shape_cast %541 : vector<1x32x64xf32> to vector<32x64xf32>
    %cst_214 = arith.constant dense<0.000000e+00> : vector<10x64xf32>
    %543 = tpu.matmul %540, %542, %cst_214 {dimension_numbers = #tpu.dot_dimension_numbers<[1], [0], [0], [1], [0, 0, 1, 1], [], []>} : vector<10x32xf32>, vector<32x64xf32>, vector<10x64xf32> -> vector<10x64xf32>
    %c27 = arith.constant 27 : index
    %c0_215 = arith.constant 0 : index
    %544 = vector.load %arg10[%c27, %c0_215] : memref<32x256xf32, #tpu.memory_space<vmem>>, vector<1x64xf32>
    %545 = vector.broadcast %544 : vector<1x64xf32> to vector<10x64xf32>
    %546 = arith.addf %543, %545 : vector<10x64xf32>
    %cst_216 = arith.constant 5.000000e-01 : f32
    %547 = vector.broadcast %cst_216 : f32 to vector<10x64xf32>
    %548 = arith.mulf %547, %546 : vector<10x64xf32>
    %cst_217 = arith.constant 1.41421354 : f32
    %549 = vector.broadcast %cst_217 : f32 to vector<10x64xf32>
    %550 = arith.divf %546, %549 : vector<10x64xf32>
    %551 = math.erf %550 : vector<10x64xf32>
    %cst_218 = arith.constant 1.000000e+00 : f32
    %552 = vector.broadcast %cst_218 : f32 to vector<10x64xf32>
    %553 = arith.addf %552, %551 : vector<10x64xf32>
    %554 = arith.mulf %548, %553 : vector<10x64xf32>
    %c1_219 = arith.constant 1 : index
    %c0_220 = arith.constant 0 : index
    %c0_221 = arith.constant 0 : index
    %555 = vector.load %arg8[%c1_219, %c0_220, %c0_221] : memref<2x64x32xf32, #tpu.memory_space<vmem>>, vector<1x64x32xf32>
    %556 = vector.shape_cast %555 : vector<1x64x32xf32> to vector<64x32xf32>
    %cst_222 = arith.constant dense<0.000000e+00> : vector<10x32xf32>
    %557 = tpu.matmul %554, %556, %cst_222 {dimension_numbers = #tpu.dot_dimension_numbers<[1], [0], [0], [1], [0, 0, 1, 1], [], []>} : vector<10x64xf32>, vector<64x32xf32>, vector<10x32xf32> -> vector<10x32xf32>
    %c28 = arith.constant 28 : index
    %c0_223 = arith.constant 0 : index
    %558 = vector.load %arg10[%c28, %c0_223] : memref<32x256xf32, #tpu.memory_space<vmem>>, vector<1x32xf32>
    %559 = vector.broadcast %558 : vector<1x32xf32> to vector<10x32xf32>
    %560 = arith.addf %557, %559 : vector<10x32xf32>
    %561 = arith.addf %516, %560 : vector<10x32xf32>
    %562 = vector.extract_strided_slice %561 {offsets = [0, 0], sizes = [1, 32], strides = [1, 1]} : vector<10x32xf32> to vector<1x32xf32>
    %563 = vector.extract_strided_slice %561 {offsets = [5, 0], sizes = [1, 32], strides = [1, 1]} : vector<10x32xf32> to vector<1x32xf32>
    %564 = tpu.concatenate %562, %563 in 0 : vector<1x32xf32>, vector<1x32xf32> -> vector<2x32xf32>
    %c10 = arith.constant 10 : index
    %c0_224 = arith.constant 0 : index
    %565 = vector.load %arg10[%c10, %c0_224] : memref<32x256xf32, #tpu.memory_space<vmem>>, vector<1x32xf32>
    %c11 = arith.constant 11 : index
    %c0_225 = arith.constant 0 : index
    %566 = vector.load %arg10[%c11, %c0_225] : memref<32x256xf32, #tpu.memory_space<vmem>>, vector<1x32xf32>
    %cst_226 = arith.constant dense<0.000000e+00> : vector<2xf32>
    %567 = vector.multi_reduction <add>, %564, %cst_226 [1] : vector<2x32xf32> to vector<2xf32>
    %568 = vector.shape_cast %567 : vector<2xf32> to vector<2x1xf32>
    %cst_227 = arith.constant 3.200000e+01 : f32
    %569 = vector.broadcast %cst_227 : f32 to vector<2x1xf32>
    %570 = arith.divf %568, %569 : vector<2x1xf32>
    %571 = vector.broadcast %570 : vector<2x1xf32> to vector<2x32xf32>
    %572 = arith.subf %564, %571 : vector<2x32xf32>
    %573 = arith.mulf %572, %572 : vector<2x32xf32>
    %cst_228 = arith.constant dense<0.000000e+00> : vector<2xf32>
    %574 = vector.multi_reduction <add>, %573, %cst_228 [1] : vector<2x32xf32> to vector<2xf32>
    %575 = vector.shape_cast %574 : vector<2xf32> to vector<2x1xf32>
    %cst_229 = arith.constant 3.200000e+01 : f32
    %576 = vector.broadcast %cst_229 : f32 to vector<2x1xf32>
    %577 = arith.divf %575, %576 : vector<2x1xf32>
    %578 = vector.broadcast %570 : vector<2x1xf32> to vector<2x32xf32>
    %579 = arith.subf %564, %578 : vector<2x32xf32>
    %cst_230 = arith.constant 9.99999974E-6 : f32
    %580 = vector.broadcast %cst_230 : f32 to vector<2x1xf32>
    %581 = arith.addf %577, %580 : vector<2x1xf32>
    %582 = math.rsqrt %581 : vector<2x1xf32>
    %583 = vector.broadcast %582 : vector<2x1xf32> to vector<2x32xf32>
    %584 = arith.mulf %579, %583 : vector<2x32xf32>
    %585 = vector.broadcast %565 : vector<1x32xf32> to vector<2x32xf32>
    %586 = arith.mulf %584, %585 : vector<2x32xf32>
    %587 = vector.broadcast %566 : vector<1x32xf32> to vector<2x32xf32>
    %588 = arith.addf %586, %587 : vector<2x32xf32>
    %c0_231 = arith.constant 0 : index
    %c0_232 = arith.constant 0 : index
    %589 = vector.load %arg9[%c0_231, %c0_232] : memref<32x10xf32, #tpu.memory_space<vmem>>, vector<32x10xf32>
    %cst_233 = arith.constant dense<0.000000e+00> : vector<2x10xf32>
    %590 = tpu.matmul %588, %589, %cst_233 {dimension_numbers = #tpu.dot_dimension_numbers<[1], [0], [0], [1], [0, 0, 1, 1], [], []>} : vector<2x32xf32>, vector<32x10xf32>, vector<2x10xf32> -> vector<2x10xf32>
    %c12 = arith.constant 12 : index
    %c0_234 = arith.constant 0 : index
    %591 = vector.load %arg10[%c12, %c0_234] : memref<32x256xf32, #tpu.memory_space<vmem>>, vector<1x10xf32>
    %592 = vector.broadcast %591 : vector<1x10xf32> to vector<2x10xf32>
    %593 = arith.addf %590, %592 : vector<2x10xf32>
    %c0_235 = arith.constant 0 : index
    %c0_236 = arith.constant 0 : index
    %594 = vector.load %arg12[%c0_235, %c0_236] : memref<2x10xf32, #tpu.memory_space<vmem>>, vector<2x10xf32>
    tpu.vector_store %arg12[%c0_235, %c0_236], %593 {strides = array<i32>} : memref<2x10xf32, #tpu.memory_space<vmem>>, vector<2x10xf32>,
    return
  }
}

</mosaic_0001>

<bundles_post_ra>
// kernel: vision_transformer.1
= control target key start
LH: loop header
LB: loop body
LE: loop exit
PB: predicated region body
PF: predicated region fallthrough
CT: control target
= control target key end

     0   :  { %17 = vsyncpa [#allocation3], 0  ;;  %s7973_s0 = inlined_call_operand.vmem [shape: f32[32,48], index: 0, kind: input, shape index: {}]   ;;  %s7974_s1 = inlined_call_operand.vmem [shape: f32[3,48,96], index: 1, kind: input, shape index: {}]   ;;  %s7975_s2 = inlined_call_operand.vmem [shape: f32[3,96,192], index: 2, kind: input, shape index: {}]   ;;  %s7976_s3 = inlined_call_operand.vmem [shape: f32[3,192,256], index: 3, kind: input, shape index: {}]   ;;  %s7977_s4 = inlined_call_operand.vmem [shape: f32[256,32], index: 4, kind: input, shape index: {}]   ;;  %s7978_s5 = inlined_call_operand.vmem [shape: f32[2,32,96], index: 5, kind: input, shape index: {}]   ;;  %s7979_s6 = inlined_call_operand.vmem [shape: f32[2,32,32], index: 6, kind: input, shape index: {}]   ;;  %s7980_s7 = inlined_call_operand.vmem [shape: f32[2,32,64], index: 7, kind: input, shape index: {}]   ;;  %s7981_s8 = inlined_call_operand.vmem [shape: f32[2,64,32], index: 8, kind: input, shape index: {}]   ;;  %s7982_s9 = inlined_call_operand.vmem [shape: f32[32,10], index: 9, kind: input, shape index: {}]   ;;  %s7983_s10 = inlined_call_operand.hbm [shape: f32[32,256], index: 10, kind: input, shape index: {}]   ;;  %s7984_s11 = inlined_call_operand.vmem [shape: f32[10,10], index: 11, kind: input, shape index: {}]   ;;  %s7985_s12 = inlined_call_operand.hbm [shape: f32[2,10], index: 12, kind: output, shape index: {}]  }
   0x1   :  { %18 = vsyncpa [#allocation4], 0  ;;  %s6429_s21 = smov [#allocation2]   ;;  %s6381_s25 = scalar_lea.hbm %s7983_s10, 1024 }
   0x2   :  { %s44_s22 = sshll.u32 %s6429_s21, 4  ;;  %p6382_p0 = scmp.ne.s32.totalorder %s7983_s10, %s6381_s25  ;;  %s45_s22 = int_to_ptr.vmem [resolvable:$true] %s44_s22 }
   0x3   :  { %p6385_p1 = scmp.lt.u32.totalorder %s6381_s25, %s7983_s10 }
   0x5   :  { %p6387_p2 = pnand %p6385_p1, %p6382_p0 }
   0x7   :  { %6390 = shalt.err (!%p6387_p2)
}
   0x8   :  { %s6391_s30 = scalar_lea.vmem %s45_s22, 1024  ;;  %p6396_p4 = scmp.lt.s32.totalorder %s45_s22, %s45_s22 }
   0x9   :  { %p6392_p3 = scmp.ne.s32.totalorder %s45_s22, %s6391_s30  ;;  %p6397_p5 = scmp.lt.s32.totalorder %s6391_s30, %s6391_s30 }
   0xb   :  { %p6398_p6 = por %p6397_p5, %p6396_p4 }
   0xd   :  { %p6399_p7 = pnand %p6398_p6, %p6392_p3 }
   0xf   :  { %6402 = shalt.err (!%p6399_p7)
}
  0x10   :  { %s6430_s13 = smov 256   ;;  %s6431_s14 = smov 16  }
  0x11   :  { %50 = dma.hbm_to_vmem [thread:$0]  %s7983_s10, 1024, %s45_s22, [#allocation3], %s6430_s13, %s6430_s13, %s6431_s14  }
  0x12   :  { %6425 = dma.done.wait [#allocation3], 1024  }
  0x13   :  { %6426 = vsyncadd [#allocation3], 4294966272  ;;  %v4859_v0 = vld [vmem:[%s7974_s1 + $0x30] sm:$0xff]  ;;  %v4860_v1 = vld [vmem:[%s7974_s1 + $0x38] sm:$0xff]  ;;  %vm189_vm0 = vcmask 392192   ;;  %v91_v9 = vlaneseq  ;;  %vm65_vm1 = vcmask 1040384  }
  0x14   :  { %v4861_v2 = vld [vmem:[%s7974_s1 + $0x40] sm:$0xff]  ;;  %v5684_v3 = vpack.c.bf16 %v4860_v1, %v4859_v0  ;;  %v4862_v4 = vld [vmem:[%s7974_s1 + $0x48] sm:$0xff]  ;;  %v4863_v6 = vld [vmem:[%s7974_s1 + $0x50] sm:$0xff]  ;;  %vm78_vm4 = vcmask 1046528   ;;  %v6432_v0 = vmov 0.0   ;;  %vm510_vm8 = vcmask 261120  }
  0x15   :  { %v5688_v5 = vpack.c.bf16 %v4862_v4, %v4861_v2  ;;  %v4864_v7 = vld [vmem:[%s7974_s1 + $0x58] sm:$0xff]  ;;  %v6546_v8 = vld [vmem:[%s7973_s0] sm:$0xff]  ;;  %v177_v12 = vld [vmem:[%s7974_s1 + $0x8] sm:$0xff]  ;;  %v6557_v13 = vshrl.u32 %v91_v9, 7  ;;  %v497_v62 = vand.u32 127, %v91_v9  ;;  %vm780_vm12 = vcmask 785408  }
  0x16   :  { %5685 = vmatprep.subr.bf16.mxu0 %v5684_v3  ;;  %5375 = vmatprep.mubr.msk.f32.mxu0 %vm189_vm0, %v6546_v8  ;;  %v5692_v10 = vpack.c.bf16 %v4864_v7, %v4863_v6  ;;  %v176_v11 = vld [vmem:[%s7974_s1] sm:$0xff]  ;;  %v66_v15 = vrot.slane %v6546_v8, 7  ;;  %v178_v16 = vld [vmem:[%s7974_s1 + $0x10] sm:$0xff]  ;;  %v179_v17 = vld [vmem:[%s7974_s1 + $0x18] sm:$0xff]  ;;  %v79_v43 = vrot.slane %v6546_v8, 1  ;;  %s6433_s24 = smov 96  }
  0x17   :  { %5687 = vmatpush3.bf16.msra.mxu0 %v5684_v3  ;;  %v5696_v14 = vpack.c.bf16 %v177_v12, %v176_v11  ;;  %v100_v18 = vand.u32 15, %v6557_v13  ;;  %v57_v19 = vld [vmem:[%s7973_s0 + $0x8] sm:$0xff]  ;;  %v5700_v20 = vpack.c.bf16 %v179_v17, %v178_v16  ;;  %v58_v21 = vld [vmem:[%s7973_s0 + $0x10] sm:$0xff]  ;;  %v180_v22 = vld [vmem:[%s7974_s1 + $0x20] sm:$0xff]  ;;  %v94_v26 = vadd.s32 16, %v6557_v13  ;;  %s6434_s25 = smov 88  }
  0x18   :  { %5689 = vmatprep.subr.bf16.mxu0 %v5688_v5  ;;  %v181_v23 = vld [vmem:[%s7974_s1 + $0x28] sm:$0xff]  ;;  %v77_v24 = vsel %vm65_vm1, 0.0, %v66_v15  ;;  %v59_v27 = vld [vmem:[%s7973_s0 + $0x18] sm:$0xff]  ;;  %v69_v30 = vrot.slane %v58_v21, 7  ;;  %v4873_v31 = vld [vmem:[%s7974_s1 + $0x60] sm:$0xff]  ;;  %v67_v34 = vrot.slane %v57_v19, 7 }
  0x19   :  { %vm6580_vm2 = vcmp.ne.s32.totalorder %v100_v18, 0  ;;  %v5704_v28 = vpack.c.bf16 %v181_v23, %v180_v22  ;;  %v4874_v32 = vld [vmem:[%s7974_s1 + $0x68] sm:$0xff]  ;;  %v114_v33 = vand.u32 15, %v94_v26  ;;  %v4875_v36 = vld [vmem:[%s7974_s1 + $0x70] sm:$0xff]  ;;  %v4876_v37 = vld [vmem:[%s7974_s1 + $0x78] sm:$0xff]  ;;  %v71_v40 = vrot.slane %v59_v27, 7 }
  0x1a   :  { %v156_v29 = vsel %vm6580_vm2, %v77_v24, 0.0  ;;  %v5708_v35 = vpack.c.bf16 %v4874_v32, %v4873_v31  ;;  %v70_v38 = vsel %vm65_vm1, %v67_v34, %v69_v30  ;;  %v68_v41 = vsel %vm65_vm1, %v66_v15, %v67_v34  ;;  %v4877_v47 = vld [vmem:[%s7974_s1 + $0x80] sm:$0xff]  ;;  %v4878_v48 = vld [vmem:[%s7974_s1 + $0x88] sm:$0xff]  ;;  %v4890_v24 = vld [vmem:[%s7975_s2 + $0xd8] sm:$0xff]  ;;  %s6435_s10 = smov 120   ;;  %s6436_s29 = smov 64  }
  0x1b   :  { %5691 = vmatpush3.bf16.msra.mxu0 %v5688_v5  ;;  %vm6607_vm3 = vcmp.ne.s32.totalorder %v114_v33, 0  ;;  %v6613_v42 = vadd.s32 8, %v6557_v13  ;;  %v80_v44 = vrot.slane %v57_v19, 1  ;;  %v5712_v45 = vpack.c.bf16 %v4876_v37, %v4875_v36  ;;  %v60_v3 = vld [vmem:[#allocation2] ss:$0 sm:$0xff]  ;;  %v4888_v23 = vld [vmem:[%s7975_s2 + $0xc8] sm:$0xff] }
  0x1c   :  { %5693 = vmatprep.subr.bf16.mxu0 %v5692_v10  ;;  %v158_v46 = vsel %vm6607_vm3, %v70_v38, 0.0  ;;  %v72_v49 = vsel %vm65_vm1, %v69_v30, %v71_v40  ;;  %v95_v50 = vadd.s32 24, %v6557_v13  ;;  %v82_v51 = vrot.slane %v58_v21, 1  ;;  %v4887_v26 = vld [vmem:[%s7975_s2 + $0xc0] sm:$0xff]  ;;  %v4893_v34 = vld [vmem:[%s7975_s2 + $0xf0] sm:$0xff]  ;;  %v4898_v36 = vld [vmem:[%s7975_s2 + $0x118] sm:$0xff] }
  0x1d   :  { %v5716_v52 = vpack.c.bf16 %v4878_v48, %v4877_v47  ;;  %v81_v53 = vsel %vm78_vm4, %v79_v43, %v80_v44  ;;  %v107_v54 = vand.u32 15, %v6613_v42  ;;  %v84_v55 = vrot.slane %v59_v27, 1  ;;  %v4891_v33 = vld [vmem:[%s7975_s2 + $0xe0] sm:$0xff]  ;;  %v4897_v40 = vld [vmem:[%s7975_s2 + $0x110] sm:$0xff]  ;;  %v4902_v43 = vld [vmem:[%s7975_s2 + $0x138] sm:$0xff]  ;;  %s6438_s30 = smov 56  }
  0x1e   :  { %v83_v56 = vsel %vm78_vm4, %v80_v44, %v82_v51  ;;  %v121_v57 = vand.u32 15, %v95_v50  ;;  %v498_v63 = vmul.u32 2, %v6557_v13  ;;  %v499_v16 = vmul.u32 2, %v6613_v42  ;;  %v4895_v39 = vld [vmem:[%s7975_s2 + $0x100] sm:$0xff]  ;;  %v4901_v47 = vld [vmem:[%s7975_s2 + $0x130] sm:$0xff]  ;;  %v4906_v50 = vld [vmem:[%s7975_s2 + $0x158] sm:$0xff] }
  0x1f   :  { %5695 = vmatpush3.bf16.msra.mxu0 %v5692_v10  ;;  %vm161_vm5 = vcmp.ne.s32.totalorder %v107_v54, 15  ;;  %v85_v59 = vsel %vm78_vm4, %v82_v51, %v84_v55  ;;  %v90_v60 = vsel %vm78_vm4, %v84_v55, 0.0  ;;  %v5736_v25 = vpack.c.bf16 %v4890_v24, %v4888_v23  ;;  %v4908_v54 = vld [vmem:[%s7975_s2 + $0x168] sm:$0xff]  ;;  %s6439_s13 = smov 112   ;;  %s6440_s14 = smov 80  }
  0x20   :  { %5697 = vmatprep.subr.bf16.mxu0 %v5696_v14  ;;  %v173_v58 = vsel %vm161_vm5, %v83_v56, 0.0  ;;  %vm163_vm6 = vcmp.ne.s32.totalorder %v121_v57, 15  ;;  %vm500_vm7 = vcmp.eq.s32.totalorder %v497_v62, %v498_v63  ;;  %v504_v2 = vadd.s32 1, %v498_v63  ;;  %v4910_v56 = vld [vmem:[%s7975_s2 + $0x178] sm:$0xff]  ;;  %s6441_s17 = smov 48   ;;  %s6443_s18 = smov 72  }
  0x21   :  { %v175_v61 = vsel %vm163_vm6, %v90_v60, 0.0  ;;  %v6641_v1 = vsel %vm500_vm7, 1.0, %v6432_v0  ;;  %vm501_vm10 = vcmp.eq.s32.totalorder %v497_v62, %v499_v16  ;;  %v5742_v37 = vpack.c.bf16 %v4893_v34, %v4891_v33  ;;  %v743_v34 = vld [vmem:[%s7975_s2 + $0x60] sm:$0xff]  ;;  %s6444_s20 = smov 40   ;;  %s6447_s15 = smov [#allocation5]  }
  0x22   :  { %5376 = vmatmul.mubr.msk.f32.vlgmr.msra.gmra.mrb[0].mxu0 %vm189_vm0, %v57_v19  ;;  %5425 = vmatprep.mubr.msk.f32.mxu1 %vm510_vm8, %v6641_v1  ;;  %vm506_vm9 = vcmp.eq.s32.totalorder %v497_v62, %v504_v2  ;;  %v5746_v44 = vpack.c.bf16 %v4897_v40, %v4895_v39  ;;  %v5756_v57 = vpack.c.bf16 %v4910_v56, %v4908_v54  ;;  %v747_v40 = vld [vmem:[%s7975_s2 + $0x80] sm:$0xff]  ;;  %v4920_v56 = vld [vmem:[%s7975_s2 + $0x1a8] sm:$0xff]  ;;  %vm1076_vm2 = vcmask 130048  }
  0x23   :  { %5699 = vmatpush3.bf16.msra.mxu0 %v5696_v14  ;;  %5378 = vmatprep.mubr.msk.f32.mxu0 %vm189_vm0, %v58_v21  ;;  %v505_v21 = vadd.s32 1, %v499_v16  ;;  %v6650_v22 = vsel %vm506_vm9, 1.0, %v6432_v0  ;;  %v737_v16 = vld [vmem:[%s7975_s2 + $0x30] sm:$0xff]  ;;  %v4915_v54 = vld [vmem:[%s7975_s2 + $0x180] sm:$0xff]  ;;  %vm1360_vm3 = vcmask 523264   ;;  %vm1761_vm7 = vcmask 1045504  }
  0x24   :  { %5701 = vmatprep.subr.bf16.mxu0 %v5700_v20  ;;  %vm1777_vm9 = vcmask 1044480  }
  0x25   :  { %vm507_vm11 = vcmp.eq.s32.totalorder %v497_v62, %v505_v21  ;;  %v734_v62 = vld [vmem:[%s7975_s2 + $0x18] sm:$0xff] }
  0x26   :  { %5379 = vmatmul.mubr.msk.f32.gmra.mrb[2].mxu0 %vm189_vm0, %v59_v27  ;;  %v4889_v27 = vld [vmem:[%s7975_s2 + $0xd0] sm:$0xff]  ;;  %v509_v30 = vsel %vm507_vm11, 1.0, %v6432_v0  ;;  %vm1912_vm11 = vcmask 64512  }
  0x27   :  { %5703 = vmatpush3.bf16.msra.mxu0 %v5700_v20  ;;  %5393 = vmatprep.mubr.msk.f32.mxu0 %vm189_vm0, %v156_v29  ;;  %v503_v20 = vsel %vm501_vm10, 1.0, %v6432_v0  ;;  %v4894_v29 = vld [vmem:[%s7975_s2 + $0xf8] sm:$0xff]  ;;  %v5738_v31 = vpack.c.bf16 %v4889_v27, %v4887_v26  ;;  %v739_v26 = vld [vmem:[%s7975_s2 + $0x40] sm:$0xff]  ;;  %v741_v27 = vld [vmem:[%s7975_s2 + $0x50] sm:$0xff]  ;;  %vm1787_vm10 = vcmask 254976  }
  0x28   :  { %5705 = vmatprep.subr.bf16.mxu0 %v5704_v28 }
  0x2b   :  { %5707 = vmatpush3.bf16.msra.mxu0 %v5704_v28  ;;  %v4892_v28 = vld [vmem:[%s7975_s2 + $0xe8] sm:$0xff] }
  0x2c   :  { %5709 = vmatprep.subr.bf16.mxu0 %v5708_v35  ;;  %v5740_v32 = vpack.c.bf16 %v4894_v29, %v4892_v28 }
  0x2e   :  { %5394 = vmatmul.mubr.msk.f32.vlgmr.msra.gmra.mrb[0].mxu0 %vm189_vm0, %v68_v41  ;;  %v4900_v41 = vld [vmem:[%s7975_s2 + $0x128] sm:$0xff] }
  0x2f   :  { %5711 = vmatpush3.bf16.msra.mxu0 %v5708_v35  ;;  %5396 = vmatprep.mubr.msk.f32.mxu0 %vm189_vm0, %v158_v46  ;;  %v4896_v35 = vld [vmem:[%s7975_s2 + $0x108] sm:$0xff]  ;;  %v4899_v46 = vld [vmem:[%s7975_s2 + $0x120] sm:$0xff] }
  0x30   :  { %5713 = vmatprep.subr.bf16.mxu0 %v5712_v45  ;;  %v5744_v38 = vpack.c.bf16 %v4898_v36, %v4896_v35  ;;  %v5750_v48 = vpack.c.bf16 %v4901_v47, %v4899_v46  ;;  %v745_v35 = vld [vmem:[%s7975_s2 + $0x70] sm:$0xff]  ;;  %v748_v36 = vld [vmem:[%s7975_s2 + $0x88] sm:$0xff]  ;;  %v751_v47 = vld [vmem:[%s7975_s2 + $0xa0] sm:$0xff] }
  0x32   :  { %5397 = vmatmul.mubr.msk.f32.gmra.mrb[2].mxu0 %vm189_vm0, %v72_v49  ;;  %v4904_v49 = vld [vmem:[%s7975_s2 + $0x148] sm:$0xff] }
  0x33   :  { %5715 = vmatpush3.bf16.msra.mxu0 %v5712_v45  ;;  %5411 = vmatprep.mubr.msk.f32.mxu0 %vm189_vm0, %v81_v53  ;;  %v5748_v45 = vpack.c.bf16 %v4902_v43, %v4900_v41  ;;  %v5752_v51 = vpack.c.bf16 %v4906_v50, %v4904_v49  ;;  %v4905_v53 = vld [vmem:[%s7975_s2 + $0x150] sm:$0xff]  ;;  %v752_v43 = vld [vmem:[%s7975_s2 + $0xa8] sm:$0xff]  ;;  %v4918_v50 = vld [vmem:[%s7975_s2 + $0x198] sm:$0xff] }
  0x34   :  { %5717 = vmatprep.subr.bf16.mxu0 %v5716_v52  ;;  %v749_v41 = vld [vmem:[%s7975_s2 + $0x90] sm:$0xff]  ;;  %v4916_v49 = vld [vmem:[%s7975_s2 + $0x188] sm:$0xff] }
  0x37   :  { %5719 = vmatpush3.bf16.msra.mxu0 %v5716_v52  ;;  %v4903_v52 = vld [vmem:[%s7975_s2 + $0x140] sm:$0xff] }
  0x38   :  { %v5754_v55 = vpack.c.bf16 %v4905_v53, %v4903_v52  ;;  %v5784_v53 = vpack.c.bf16 %v4918_v50, %v4916_v49 }
  0x3a   :  { %5412 = vmatmul.mubr.msk.f32.vlgmr.msra.gmra.mrb[0].mxu0 %vm189_vm0, %v173_v58  ;;  %v4907_v58 = vld [vmem:[%s7975_s2 + $0x160] sm:$0xff] }
  0x3b   :  { %5414 = vmatprep.mubr.msk.f32.mxu0 %vm189_vm0, %v85_v59  ;;  %v4909_v59 = vld [vmem:[%s7975_s2 + $0x170] sm:$0xff] }
  0x3c   :  { %v5758_v60 = vpack.c.bf16 %v4909_v59, %v4907_v58  ;;  %v702_v59 = vand.u32 7, %v6613_v42  ;;  %v4926_v42 = vld [vmem:[%s7975_s2 + $0x1d8] sm:$0xff] }
  0x3e   :  { %5415 = vmatmul.mubr.msk.f32.gmra.mrb[2].mxu0 %vm189_vm0, %v175_v61  ;;  %v732_v61 = vld [vmem:[%s7975_s2 + $0x8] sm:$0xff]  ;;  %vm716_vm14 = vcmp.ne.s32.totalorder %v702_v59, 0  ;;  %vm724_vm0 = vcmp.ne.s32.totalorder %v702_v59, 7  ;;  %v4950_v59 = vld [vmem:[%s7976_s3 + $0x1b8] sm:$0xff] }
  0x3f   :  { %1143 = vmatprep.mubr.f32.mxu0 %v6432_v0  ;;  %v5760_v63 = vpack.c.bf16 %v734_v62, %v732_v61  ;;  %v4919_v62 = vld [vmem:[%s7975_s2 + $0x1a0] sm:$0xff] }
 0x10d   :  { %v5413_v4 = vpop.f32.mrb[0].mxu0 }
 0x10e   :  { %v489_v5 = vadd.f32 %v5413_v4, %v60_v3  ;;  %v465_v6 = vpop.f32.mrb[1].mxu0  ;;  %v731_v4 = vld [vmem:[%s7975_s2] sm:$0xff] }
 0x10f   :  { %v488_v7 = vadd.f32 %v465_v6, %v60_v3  ;;  %v736_v6 = vld [vmem:[%s7975_s2 + $0x28] sm:$0xff] }
 0x110   :  { %v493_v8 = vmax.f32 %v489_v5, 0.0  ;;  %v733_v5 = vld [vmem:[%s7975_s2 + $0x10] sm:$0xff] }
 0x111   :  { %v492_v9 = vmax.f32 %v488_v7, 0.0  ;;  %v5416_v10 = vpop.f32.mrb[2].mxu0  ;;  %v738_v7 = vld [vmem:[%s7975_s2 + $0x38] sm:$0xff] }
 0x112   :  { %v491_v11 = vadd.f32 %v5416_v10, %v60_v3  ;;  %v475_v12 = vpop.f32.mrb[3].mxu0 }
 0x113   :  { %v5720_v14 = vpack.c.bf16 %v493_v8, %v492_v9  ;;  %v490_v15 = vadd.f32 %v475_v12, %v60_v3 }
 0x114   :  { %v495_v17 = vmax.f32 %v491_v11, 0.0  ;;  %v5762_v11 = vpack.c.bf16 %v733_v5, %v731_v4 }
 0x115   :  { %v494_v18 = vmax.f32 %v490_v15, 0.0  ;;  %5721 = vmatprep.subr.bf16.mxu1 %v5720_v14  ;;  %v735_v15 = vld [vmem:[%s7975_s2 + $0x20] sm:$0xff] }
 0x116   :  { %5723 = vmatpush3.bf16.msra.mxu1 %v5720_v14  ;;  %v5766_v24 = vpack.c.bf16 %v737_v16, %v735_v15  ;;  %v4927_v15 = vld [vmem:[%s7975_s2 + $0x1e0] sm:$0xff]  ;;  %v4929_v16 = vld [vmem:[%s7975_s2 + $0x1f0] sm:$0xff] }
 0x117   :  { %v5724_v19 = vpack.c.bf16 %v495_v17, %v494_v18 }
 0x119   :  { %5725 = vmatprep.subr.bf16.mxu1 %v5724_v19 }
 0x11a   :  { %5727 = vmatpush3.bf16.msra.mxu1 %v5724_v19 }
 0x11b   :  { %5729 = vmatprep.subr.bf16.mxu1 %v5720_v14 }
 0x11d   :  { %5426 = vmatmul.mubr.msk.f32.vlgmr.msra.gmra.mrb[0].mxu1 %vm510_vm8, %v503_v20  ;;  %v742_v20 = vld [vmem:[%s7975_s2 + $0x58] sm:$0xff] }
 0x11e   :  { %5731 = vmatpush3.bf16.msra.mxu1 %v5720_v14  ;;  %5436 = vmatprep.mubr.msk.f32.mxu1 %vm510_vm8, %v6650_v22  ;;  %v5764_v14 = vpack.c.bf16 %v738_v7, %v736_v6  ;;  %v4923_v6 = vld [vmem:[%s7975_s2 + $0x1c0] sm:$0xff]  ;;  %v4925_v7 = vld [vmem:[%s7975_s2 + $0x1d0] sm:$0xff] }
 0x11f   :  { %5733 = vmatprep.subr.bf16.mxu1 %v5724_v19 }
 0x122   :  { %5735 = vmatpush3.bf16.msra.mxu1 %v5724_v19  ;;  %v740_v19 = vld [vmem:[%s7975_s2 + $0x48] sm:$0xff] }
 0x123   :  { %5737 = vmatprep.subr.bf16.mxu1 %v5736_v25  ;;  %v5768_v25 = vpack.c.bf16 %v742_v20, %v740_v19  ;;  %v4934_v19 = vld [vmem:[%s7975_s2 + $0x218] sm:$0xff]  ;;  %v5798_v20 = vpack.c.bf16 %v4929_v16, %v4927_v15 }
 0x125   :  { %5437 = vmatmul.mubr.msk.f32.vlgmr.msra.gmra.mrb[2].mxu1 %vm510_vm8, %v509_v30  ;;  %v744_v30 = vld [vmem:[%s7975_s2 + $0x68] sm:$0xff] }
 0x126   :  { %5739 = vmatpush1.bf16.msra.mxu1 %v5738_v31  ;;  %849 = vmatprep.mubr.f32.mxu1 %v6432_v0  ;;  %v746_v31 = vld [vmem:[%s7975_s2 + $0x78] sm:$0xff] }
 0x127   :  { %5741 = vmatprep.subr.bf16.mxu1 %v5740_v32  ;;  %v5770_v32 = vpack.c.bf16 %v741_v27, %v739_v26  ;;  %v5772_v33 = vpack.c.bf16 %v746_v31, %v744_v30  ;;  %v4938_v26 = vld [vmem:[%s7975_s2 + $0x238] sm:$0xff]  ;;  %v4935_v30 = vld [vmem:[%s7975_s2 + $0x220] sm:$0xff]  ;;  %v4937_v31 = vld [vmem:[%s7975_s2 + $0x230] sm:$0xff] }
 0x12a   :  { %5743 = vmatpush1.bf16.msra.mxu1 %v5742_v37  ;;  %v750_v37 = vld [vmem:[%s7975_s2 + $0x98] sm:$0xff] }
 0x12b   :  { %5745 = vmatprep.subr.bf16.mxu1 %v5744_v38  ;;  %v5774_v38 = vpack.c.bf16 %v745_v35, %v743_v34  ;;  %v5776_v39 = vpack.c.bf16 %v750_v37, %v748_v36  ;;  %v1060_v36 = vsub.s32 0, %v6557_v13  ;;  %v676_v37 = vld [vmem:[#allocation2 + $0x1] ss:$8 sm:$0x3] }
 0x12e   :  { %5747 = vmatpush1.bf16.msra.mxu1 %v5746_v44  ;;  %v754_v44 = vld [vmem:[%s7975_s2 + $0xb8] sm:$0xff] }
 0x12f   :  { %5749 = vmatprep.subr.bf16.mxu1 %v5748_v45  ;;  %v5778_v45 = vpack.c.bf16 %v749_v41, %v747_v40  ;;  %v5780_v46 = vpack.c.bf16 %v754_v44, %v752_v43 }
 0x132   :  { %5751 = vmatpush1.bf16.msra.mxu1 %v5750_v48  ;;  %v753_v48 = vld [vmem:[%s7975_s2 + $0xb0] sm:$0xff] }
 0x133   :  { %5753 = vmatprep.subr.bf16.mxu1 %v5752_v51  ;;  %v695_v51 = vand.u32 7, %v6557_v13  ;;  %v5782_v52 = vpack.c.bf16 %v753_v48, %v751_v47 }
 0x135   :  { %vm715_vm13 = vcmp.ne.s32.totalorder %v695_v51, 0  ;;  %vm723_vm15 = vcmp.ne.s32.totalorder %v695_v51, 7 }
 0x136   :  { %5755 = vmatpush1.bf16.msra.mxu1 %v5754_v55  ;;  %v4917_v55 = vld [vmem:[%s7975_s2 + $0x190] sm:$0xff] }
 0x137   :  { %5757 = vmatprep.subr.bf16.mxu1 %v5756_v57  ;;  %v4922_v57 = vld [vmem:[%s7975_s2 + $0x1b8] sm:$0xff] }
 0x138   :  { %v5788_v61 = vpack.c.bf16 %v4922_v57, %v4920_v56  ;;  %v4943_v56 = vld [vmem:[%s7976_s3 + $0x180] sm:$0xff]  ;;  %v4945_v57 = vld [vmem:[%s7976_s3 + $0x190] sm:$0xff] }
 0x13a   :  { %5759 = vmatpush1.bf16.msra.mxu1 %v5758_v60  ;;  %v5786_v60 = vpack.c.bf16 %v4917_v55, %v4915_v54  ;;  %v4946_v54 = vld [vmem:[%s7976_s3 + $0x198] sm:$0xff] }
 0x13b   :  { %5761 = vmatprep.subr.bf16.mxu1 %v5760_v63  ;;  %v4921_v63 = vld [vmem:[%s7975_s2 + $0x1b0] sm:$0xff] }
 0x13c   :  { %v5790_v4 = vpack.c.bf16 %v4921_v63, %v4919_v62  ;;  %v4947_v62 = vld [vmem:[%s7976_s3 + $0x1a0] sm:$0xff]  ;;  %v4949_v63 = vld [vmem:[%s7976_s3 + $0x1b0] sm:$0xff] }
 0x1f0   :  { %v5427_v2 = vpop.f32.mrb[0].mxu1 }
 0x1f1   :  { %v583_v3 = vpop.f32.mrb[1].mxu1 }
 0x1f8   :  { %v5438_v8 = vpop.f32.mrb[2].mxu1 }
 0x1f9   :  { %v6748_v9 = vmax.f32 %v5427_v2, %v5438_v8  ;;  %v664_v10 = vpop.f32.mrb[3].mxu1 }
 0x1fa   :  { %v673_v12 = vmax.f32 %v583_v3, %v664_v10  ;;  %v4924_v3 = vld [vmem:[%s7975_s2 + $0x1c8] sm:$0xff] }
 0x1fb   :  { %v680_v17 = vrot.slane %v6748_v9, 7  ;;  %v686_v18 = vrot.slane %v6748_v9, 1  ;;  %v5792_v5 = vpack.c.bf16 %v4926_v42, %v4924_v3  ;;  %v4928_v10 = vld [vmem:[%s7975_s2 + $0x1e8] sm:$0xff]  ;;  %v5822_v3 = vpack.c.bf16 %v4949_v63, %v4947_v62  ;;  %v4987_v62 = vld [vmem:[%s7976_s3 + $0x2e0] sm:$0xff]  ;;  %v4989_v63 = vld [vmem:[%s7976_s3 + $0x2f0] sm:$0xff] }
 0x1fc   :  { %v679_v21 = vrot.slane %v673_v12, 7  ;;  %v685_v23 = vrot.slane %v673_v12, 1  ;;  %4911 = vmatmul.mubr.msk.f32.vlgmr.msra.gmra.mrb[4].mxu1 %vm780_vm12, %v673_v12  ;;  %v5794_v12 = vpack.c.bf16 %v4925_v7, %v4923_v6  ;;  %v4956_v6 = vld [vmem:[%s7976_s3 + $0x1e8] sm:$0xff] }
 0x1fd   :  { %5763 = vmatpush1.bf16.msra.mxu1 %v5762_v11  ;;  %855 = vmatprep.mubr.f32.mxu1 %v6432_v0  ;;  %v4930_v11 = vld [vmem:[%s7975_s2 + $0x1f8] sm:$0xff]  ;;  %v690_v34 = vsel %vm78_vm4, %v686_v18, 0.0 }
 0x1fe   :  { %5765 = vmatprep.subr.bf16.mxu1 %v5764_v14  ;;  %v6773_v28 = vsel %vm65_vm1, %v679_v21, %v680_v17  ;;  %v6778_v29 = vsel %vm78_vm4, %v685_v23, %v686_v18  ;;  %v684_v58 = vsel %vm65_vm1, 0.0, %v679_v21  ;;  %v5796_v14 = vpack.c.bf16 %v4930_v11, %v4928_v10  ;;  %v4932_v17 = vld [vmem:[%s7975_s2 + $0x208] sm:$0xff]  ;;  %v4931_v23 = vld [vmem:[%s7975_s2 + $0x200] sm:$0xff]  ;;  %v4957_v11 = vld [vmem:[%s7976_s3 + $0x1f0] sm:$0xff] }
 0x1ff   :  { %v721_v2 = vsel %vm715_vm13, %v684_v58, 0.0  ;;  %v722_v8 = vsel %vm716_vm14, %v6773_v28, 0.0  ;;  %v5800_v21 = vpack.c.bf16 %v4934_v19, %v4932_v17  ;;  %v730_v35 = vsel %vm724_vm0, %v690_v34, 0.0  ;;  %v4948_v58 = vld [vmem:[%s7976_s3 + $0x1a8] sm:$0xff]  ;;  %v4955_v10 = vld [vmem:[%s7976_s3 + $0x1e0] sm:$0xff]  ;;  %v4961_v19 = vld [vmem:[%s7976_s3 + $0x210] sm:$0xff] }
 0x200   :  { %4912 = vmatmul.mubr.msk.f32.gmra.mrb[6].mxu1 %vm780_vm12, %v6748_v9  ;;  %v5830_v15 = vpack.c.bf16 %v4957_v11, %v4955_v10  ;;  %v4959_v17 = vld [vmem:[%s7976_s3 + $0x200] sm:$0xff]  ;;  %v4972_v34 = vld [vmem:[%s7976_s3 + $0x268] sm:$0xff]  ;;  %v1665_v10 = vld [vmem:[%s7977_s4 + $0x98] sm:$0xff]  ;;  %vm1996_vm13 = vcmask 80896   ;;  %vm2000_vm14 = vcmask 74752  }
 0x201   :  { %5767 = vmatpush1.bf16.msra.mxu1 %v5766_v24  ;;  %932 = vmatprep.mubr.f32.mxu1 %v6432_v0  ;;  %v4933_v24 = vld [vmem:[%s7975_s2 + $0x210] sm:$0xff] }
 0x202   :  { %5769 = vmatprep.subr.bf16.mxu1 %v5768_v25  ;;  %v4936_v25 = vld [vmem:[%s7975_s2 + $0x228] sm:$0xff]  ;;  %v5802_v27 = vpack.c.bf16 %v4933_v24, %v4931_v23  ;;  %v5834_v23 = vpack.c.bf16 %v4961_v19, %v4959_v17 }
 0x203   :  { %v5804_v28 = vpack.c.bf16 %v4938_v26, %v4936_v25  ;;  %v4963_v25 = vld [vmem:[%s7976_s3 + $0x220] sm:$0xff]  ;;  %v4965_v26 = vld [vmem:[%s7976_s3 + $0x230] sm:$0xff]  ;;  %v1667_v17 = vld [vmem:[%s7977_s4 + $0xa8] sm:$0xff] }
 0x205   :  { %5771 = vmatpush1.bf16.msra.mxu1 %v5770_v32  ;;  %v5806_v32 = vpack.c.bf16 %v4937_v31, %v4935_v30  ;;  %v5838_v30 = vpack.c.bf16 %v4965_v26, %v4963_v25  ;;  %v1669_v25 = vld [vmem:[%s7977_s4 + $0xb8] sm:$0xff] }
 0x206   :  { %5773 = vmatprep.subr.bf16.mxu1 %v5772_v33  ;;  %v729_v33 = vsel %vm723_vm15, %v6778_v29, 0.0  ;;  %v1061_v29 = vrot.slane %v676_v37, %v1060_v36  ;;  %vm6437_vm15 = vmmov 1  }
 0x209   :  { %5775 = vmatpush1.bf16.msra.mxu1 %v5774_v38  ;;  %v1064_v38 = vsub.s32 1, %v6557_v13 }
 0x20a   :  { %5777 = vmatprep.subr.bf16.mxu1 %v5776_v39 }
 0x20b   :  { %v1065_v9 = vrot.slane %v676_v37, %v1064_v38 }
 0x20d   :  { %5779 = vmatpush1.bf16.msra.mxu1 %v5778_v45 }
 0x20e   :  { %5781 = vmatprep.subr.bf16.mxu1 %v5780_v46 }
 0x211   :  { %5783 = vmatpush1.bf16.msra.mxu1 %v5782_v52 }
 0x212   :  { %5785 = vmatprep.subr.bf16.mxu1 %v5784_v53  ;;  %v4944_v53 = vld [vmem:[%s7976_s3 + $0x188] sm:$0xff] }
 0x213   :  { %v5816_v55 = vpack.c.bf16 %v4946_v54, %v4944_v53  ;;  %v4986_v53 = vld [vmem:[%s7976_s3 + $0x2d8] sm:$0xff] }
 0x214   :  { %4913 = vmatmul.mubr.msk.f32.vlgmr.msra.gmra.mrb[4].mxu1 %vm780_vm12, %v721_v2  ;;  %v4952_v2 = vld [vmem:[%s7976_s3 + $0x1c8] sm:$0xff] }
 0x215   :  { %5787 = vmatpush1.bf16.msra.mxu1 %v5786_v60  ;;  %938 = vmatprep.mubr.f32.mxu1 %v6432_v0  ;;  %v5818_v60 = vpack.c.bf16 %v4945_v57, %v4943_v56  ;;  %v4983_v56 = vld [vmem:[%s7976_s3 + $0x2c0] sm:$0xff]  ;;  %v4985_v57 = vld [vmem:[%s7976_s3 + $0x2d0] sm:$0xff] }
 0x216   :  { %5789 = vmatprep.subr.bf16.mxu1 %v5788_v61  ;;  %v5820_v61 = vpack.c.bf16 %v4950_v59, %v4948_v58  ;;  %v5858_v58 = vpack.c.bf16 %v4985_v57, %v4983_v56  ;;  %v4988_v59 = vld [vmem:[%s7976_s3 + $0x2e8] sm:$0xff]  ;;  %v1270_v56 = vld [vmem:[%s7976_s3 + $0x38] sm:$0xff]  ;;  %v1245_v57 = vand.u32 3, %v6557_v13 }
 0x218   :  { %4914 = vmatmul.mubr.msk.f32.gmra.mrb[6].mxu1 %vm780_vm12, %v722_v8  ;;  %vm7179_vm5 = vcmp.ne.s32.totalorder %v1245_v57, 0  ;;  %vm7331_vm6 = vcmp.ne.s32.totalorder %v1245_v57, 3  ;;  %v5005_v57 = vld [vmem:[%s7976_s3 + $0x358] sm:$0xff] }
 0x219   :  { %5791 = vmatpush1.bf16.msra.mxu1 %v5790_v4  ;;  %1040 = vmatprep.mubr.f32.mxu1 %v6432_v0  ;;  %v4951_v4 = vld [vmem:[%s7976_s3 + $0x1c0] sm:$0xff] }
 0x21a   :  { %5793 = vmatprep.subr.bf16.mxu1 %v5792_v5  ;;  %v4953_v5 = vld [vmem:[%s7976_s3 + $0x1d0] sm:$0xff] }
 0x21b   :  { %v5826_v7 = vpack.c.bf16 %v4953_v5, %v4951_v4  ;;  %v1662_v4 = vld [vmem:[%s7977_s4 + $0x80] sm:$0xff]  ;;  %v1663_v5 = vld [vmem:[%s7977_s4 + $0x88] sm:$0xff] }
 0x21d   :  { %5795 = vmatpush1.bf16.msra.mxu1 %v5794_v12  ;;  %v4960_v12 = vld [vmem:[%s7976_s3 + $0x208] sm:$0xff] }
 0x21e   :  { %5797 = vmatprep.subr.bf16.mxu1 %v5796_v14  ;;  %v4962_v14 = vld [vmem:[%s7976_s3 + $0x218] sm:$0xff] }
 0x21f   :  { %v5832_v16 = vpack.c.bf16 %v4962_v14, %v4960_v12  ;;  %v1648_v14 = vld [vmem:[%s7977_s4 + $0x10] sm:$0xff] }
 0x221   :  { %5799 = vmatpush1.bf16.msra.mxu1 %v5798_v20  ;;  %v4964_v20 = vld [vmem:[%s7976_s3 + $0x228] sm:$0xff] }
 0x222   :  { %5801 = vmatprep.subr.bf16.mxu1 %v5800_v21  ;;  %v4966_v21 = vld [vmem:[%s7976_s3 + $0x238] sm:$0xff] }
 0x223   :  { %v5836_v24 = vpack.c.bf16 %v4966_v21, %v4964_v20  ;;  %v1650_v21 = vld [vmem:[%s7977_s4 + $0x20] sm:$0xff] }
 0x225   :  { %5803 = vmatpush1.bf16.msra.mxu1 %v5802_v27  ;;  %v4968_v27 = vld [vmem:[%s7976_s3 + $0x248] sm:$0xff] }
 0x226   :  { %5805 = vmatprep.subr.bf16.mxu1 %v5804_v28  ;;  %v4970_v28 = vld [vmem:[%s7976_s3 + $0x258] sm:$0xff] }
 0x227   :  { %v5840_v31 = vpack.c.bf16 %v4970_v28, %v4968_v27  ;;  %v1652_v28 = vld [vmem:[%s7977_s4 + $0x30] sm:$0xff] }
 0x229   :  { %5807 = vmatpush1.bf16.msra.mxu1 %v5806_v32  ;;  %v4967_v32 = vld [vmem:[%s7976_s3 + $0x240] sm:$0xff] }
 0x22c   :  { %4939 = vmatmul.mubr.msk.f32.vlgmr.msra.gmra.mrb[4].mxu1 %vm780_vm12, %v729_v33  ;;  %v4969_v33 = vld [vmem:[%s7976_s3 + $0x250] sm:$0xff] }
 0x22d   :  { %1046 = vmatprep.mubr.f32.mxu1 %v6432_v0  ;;  %v5842_v37 = vpack.c.bf16 %v4969_v33, %v4967_v32  ;;  %v1671_v32 = vld [vmem:[%s7977_s4 + $0xc8] sm:$0xff] }
 0x230   :  { %4940 = vmatmul.mubr.msk.f32.gmra.mrb[6].mxu1 %vm780_vm12, %v730_v35  ;;  %v4974_v35 = vld [vmem:[%s7976_s3 + $0x278] sm:$0xff]  ;;  %vm7538_vm12 = vmpackc.low %vm1912_vm11, %vm1912_vm11 }
 0x2ff   :  { %v1042_v39 = vpop.f32.mrb[4].mxu1 }
 0x300   :  { %v1044_v40 = vpop.f32.mrb[5].mxu1  ;;  %v1068_v18 = vadd.f32 %v1061_v29, %v1042_v39  ;;  %v4971_v39 = vld [vmem:[%s7976_s3 + $0x260] sm:$0xff] }
 0x301   :  { %v1069_v41 = vadd.f32 %v1065_v9, %v1044_v40  ;;  %v4976_v40 = vld [vmem:[%s7976_s3 + $0x288] sm:$0xff] }
 0x302   :  { %v1072_v47 = vmax.f32 %v1068_v18, 0.0  ;;  %v4978_v18 = vld [vmem:[%s7976_s3 + $0x298] sm:$0xff] }
 0x303   :  { %v1048_v43 = vpop.f32.mrb[6].mxu1  ;;  %v1073_v49 = vmax.f32 %v1069_v41, 0.0 }
 0x304   :  { %v1070_v44 = vadd.f32 %v1061_v29, %v1048_v43  ;;  %v1050_v45 = vpop.f32.mrb[7].mxu1  ;;  %v5844_v29 = vpack.c.bf16 %v4974_v35, %v4972_v34  ;;  %v5848_v43 = vpack.c.bf16 %v4978_v18, %v4976_v40  ;;  %v1654_v35 = vld [vmem:[%s7977_s4 + $0x40] sm:$0xff]  ;;  %v1656_v18 = vld [vmem:[%s7977_s4 + $0x50] sm:$0xff] }
 0x305   :  { %v1071_v46 = vadd.f32 %v1065_v9, %v1050_v45  ;;  %v4973_v9 = vld [vmem:[%s7976_s3 + $0x270] sm:$0xff] }
 0x306   :  { %v1074_v48 = vmax.f32 %v1070_v44, 0.0  ;;  %v5846_v41 = vpack.c.bf16 %v4973_v9, %v4971_v39  ;;  %v4975_v44 = vld [vmem:[%s7976_s3 + $0x280] sm:$0xff]  ;;  %v4977_v45 = vld [vmem:[%s7976_s3 + $0x290] sm:$0xff]  ;;  %v1673_v39 = vld [vmem:[%s7977_s4 + $0xd8] sm:$0xff] }
 0x307   :  { %v1075_v50 = vmax.f32 %v1071_v46, 0.0  ;;  %v4980_v46 = vld [vmem:[%s7976_s3 + $0x2a8] sm:$0xff] }
 0x308   :  { %v5810_v51 = vpack.c.bf16 %v1074_v48, %v1072_v47  ;;  %v4982_v47 = vld [vmem:[%s7976_s3 + $0x2b8] sm:$0xff]  ;;  %v5850_v48 = vpack.c.bf16 %v4977_v45, %v4975_v44  ;;  %v1675_v44 = vld [vmem:[%s7977_s4 + $0xe8] sm:$0xff] }
 0x309   :  { %v5808_v52 = vpack.c.bf16 %v1075_v50, %v1073_v49  ;;  %v5852_v49 = vpack.c.bf16 %v4982_v47, %v4980_v46  ;;  %v4979_v50 = vld [vmem:[%s7976_s3 + $0x2a0] sm:$0xff] }
 0x30a   :  { %v1658_v47 = vld [vmem:[%s7977_s4 + $0x60] sm:$0xff] }
 0x30b   :  { %5809 = vmatprep.subr.bf16.mxu0 %v5808_v52 }
 0x30c   :  { %5811 = vmatpush1.bf16.msra.mxu0 %v5810_v51 }
 0x30d   :  { %5813 = vmatprep.subr.bf16.mxu0 %v5808_v52  ;;  %v4984_v52 = vld [vmem:[%s7976_s3 + $0x2c8] sm:$0xff] }
 0x30f   :  { %4941 = vmatmul.mubr.msk.f32.vlgmr.msra.gmra.mrb[4].mxu0 %vm1076_vm2, %v6641_v1  ;;  %v4954_v1 = vld [vmem:[%s7976_s3 + $0x1d8] sm:$0xff] }
 0x310   :  { %5815 = vmatpush1.bf16.msra.mxu0 %v5810_v51  ;;  %1216 = vmatprep.mubr.f32.mxu0 %v6432_v0  ;;  %v5824_v42 = vpack.c.bf16 %v4954_v1, %v4952_v2  ;;  %v4981_v51 = vld [vmem:[%s7976_s3 + $0x2b0] sm:$0xff]  ;;  %v5862_v2 = vpack.c.bf16 %v4989_v63, %v4987_v62  ;;  %v1264_v1 = vld [vmem:[%s7976_s3 + $0x8] sm:$0xff]  ;;  %v1267_v63 = vld [vmem:[%s7976_s3 + $0x20] sm:$0xff] }
 0x311   :  { %5817 = vmatprep.subr.bf16.mxu0 %v5816_v55  ;;  %v5854_v54 = vpack.c.bf16 %v4981_v51, %v4979_v50  ;;  %v5856_v55 = vpack.c.bf16 %v4986_v53, %v4984_v52  ;;  %v1263_v52 = vld [vmem:[%s7976_s3] sm:$0xff]  ;;  %v1265_v53 = vld [vmem:[%s7976_s3 + $0x10] sm:$0xff] }
 0x313   :  { %4942 = vmatmul.mubr.msk.f32.vlgmr.msra.gmra.mrb[6].mxu0 %vm1076_vm2, %v6650_v22  ;;  %v4958_v22 = vld [vmem:[%s7976_s3 + $0x1f8] sm:$0xff] }
 0x314   :  { %5819 = vmatpush1.bf16.msra.mxu0 %v5818_v60  ;;  %v5828_v8 = vpack.c.bf16 %v4958_v22, %v4956_v6  ;;  %v4990_v60 = vld [vmem:[%s7976_s3 + $0x2f8] sm:$0xff]  ;;  %v1646_v6 = vld [vmem:[%s7977_s4] sm:$0xff]  ;;  %v5960_v22 = vpack.c.bf16 %v1663_v5, %v1662_v4 }
 0x315   :  { %5821 = vmatprep.subr.bf16.mxu0 %v5820_v61  ;;  %v5860_v61 = vpack.c.bf16 %v4990_v60, %v4988_v59  ;;  %v1274_v4 = vld [vmem:[%s7976_s3 + $0x58] sm:$0xff] }
 0x316   :  { %5961 = vmatprep.subr.bf16.mxu1 %v5960_v22 }
 0x318   :  { %5823 = vmatpush1.bf16.msra.mxu0 %v5822_v3  ;;  %v1266_v3 = vld [vmem:[%s7976_s3 + $0x18] sm:$0xff] }
 0x319   :  { %5825 = vmatprep.subr.bf16.mxu0 %v5824_v42  ;;  %v5864_v42 = vpack.c.bf16 %v1266_v3, %v1264_v1  ;;  %v5007_v3 = vld [vmem:[%s7976_s3 + $0x368] sm:$0xff] }
 0x31c   :  { %5827 = vmatpush1.bf16.msra.mxu0 %v5826_v7  ;;  %v1647_v7 = vld [vmem:[%s7977_s4 + $0x8] sm:$0xff] }
 0x31d   :  { %5829 = vmatprep.subr.bf16.mxu0 %v5828_v8  ;;  %v1664_v8 = vld [vmem:[%s7977_s4 + $0x90] sm:$0xff]  ;;  %v5962_v11 = vpack.c.bf16 %v1647_v7, %v1646_v6 }
 0x31e   :  { %v5964_v12 = vpack.c.bf16 %v1665_v10, %v1664_v8  ;;  %v1271_v8 = vld [vmem:[%s7976_s3 + $0x40] sm:$0xff]  ;;  %v1273_v10 = vld [vmem:[%s7976_s3 + $0x50] sm:$0xff] }
 0x31f   :  { %5963 = vmatpush3.bf16.msra.mxu1 %v5962_v11  ;;  %v1276_v11 = vld [vmem:[%s7976_s3 + $0x68] sm:$0xff] }
 0x320   :  { %5831 = vmatpush1.bf16.msra.mxu0 %v5830_v15  ;;  %v1649_v15 = vld [vmem:[%s7977_s4 + $0x18] sm:$0xff]  ;;  %5965 = vmatprep.subr.bf16.mxu1 %v5964_v12 }
 0x321   :  { %5833 = vmatprep.subr.bf16.mxu0 %v5832_v16  ;;  %v1666_v16 = vld [vmem:[%s7977_s4 + $0xa0] sm:$0xff]  ;;  %v5966_v19 = vpack.c.bf16 %v1649_v15, %v1648_v14  ;;  %v1278_v12 = vld [vmem:[%s7976_s3 + $0x78] sm:$0xff]  ;;  %v5874_v14 = vpack.c.bf16 %v1273_v10, %v1271_v8  ;;  %v4995_v8 = vld [vmem:[%s7976_s3 + $0x308] sm:$0xff] }
 0x322   :  { %v5968_v20 = vpack.c.bf16 %v1667_v17, %v1666_v16  ;;  %v5876_v15 = vpack.c.bf16 %v1278_v12, %v1276_v11  ;;  %v1275_v16 = vld [vmem:[%s7976_s3 + $0x60] sm:$0xff]  ;;  %v1277_v17 = vld [vmem:[%s7976_s3 + $0x70] sm:$0xff]  ;;  %v4997_v10 = vld [vmem:[%s7976_s3 + $0x318] sm:$0xff] }
 0x323   :  { %5967 = vmatpush3.bf16.msra.mxu1 %v5966_v19  ;;  %v1280_v19 = vld [vmem:[%s7976_s3 + $0x88] sm:$0xff] }
 0x324   :  { %5835 = vmatpush1.bf16.msra.mxu0 %v5834_v23  ;;  %v1651_v23 = vld [vmem:[%s7977_s4 + $0x28] sm:$0xff]  ;;  %5969 = vmatprep.subr.bf16.mxu1 %v5968_v20  ;;  %v1282_v20 = vld [vmem:[%s7976_s3 + $0x98] sm:$0xff] }
 0x325   :  { %5837 = vmatprep.subr.bf16.mxu0 %v5836_v24  ;;  %v1668_v24 = vld [vmem:[%s7977_s4 + $0xb0] sm:$0xff]  ;;  %v5970_v26 = vpack.c.bf16 %v1651_v23, %v1650_v21  ;;  %v5878_v21 = vpack.c.bf16 %v1277_v17, %v1275_v16  ;;  %v5880_v23 = vpack.c.bf16 %v1282_v20, %v1280_v19  ;;  %v4999_v19 = vld [vmem:[%s7976_s3 + $0x328] sm:$0xff] }
 0x326   :  { %v5972_v27 = vpack.c.bf16 %v1669_v25, %v1668_v24  ;;  %v1279_v24 = vld [vmem:[%s7976_s3 + $0x80] sm:$0xff]  ;;  %v1281_v25 = vld [vmem:[%s7976_s3 + $0x90] sm:$0xff] }
 0x327   :  { %5971 = vmatpush3.bf16.msra.mxu1 %v5970_v26  ;;  %v1284_v26 = vld [vmem:[%s7976_s3 + $0xa8] sm:$0xff]  ;;  %v4996_v16 = vld [vmem:[%s7976_s3 + $0x310] sm:$0xff] }
 0x328   :  { %5839 = vmatpush1.bf16.msra.mxu0 %v5838_v30  ;;  %v1653_v30 = vld [vmem:[%s7977_s4 + $0x38] sm:$0xff]  ;;  %5973 = vmatprep.subr.bf16.mxu1 %v5972_v27 }
 0x329   :  { %5841 = vmatprep.subr.bf16.mxu0 %v5840_v31  ;;  %v1670_v31 = vld [vmem:[%s7977_s4 + $0xc0] sm:$0xff]  ;;  %v5974_v33 = vpack.c.bf16 %v1653_v30, %v1652_v28  ;;  %v1286_v27 = vld [vmem:[%s7976_s3 + $0xb8] sm:$0xff]  ;;  %v5882_v28 = vpack.c.bf16 %v1281_v25, %v1279_v24 }
 0x32a   :  { %v5976_v34 = vpack.c.bf16 %v1671_v32, %v1670_v31  ;;  %v5884_v30 = vpack.c.bf16 %v1286_v27, %v1284_v26  ;;  %v1283_v31 = vld [vmem:[%s7976_s3 + $0xa0] sm:$0xff]  ;;  %v1285_v32 = vld [vmem:[%s7976_s3 + $0xb0] sm:$0xff] }
 0x32b   :  { %5975 = vmatpush3.bf16.msra.mxu1 %v5974_v33  ;;  %v1288_v33 = vld [vmem:[%s7976_s3 + $0xc8] sm:$0xff]  ;;  %v4998_v25 = vld [vmem:[%s7976_s3 + $0x320] sm:$0xff]  ;;  %v5000_v26 = vld [vmem:[%s7976_s3 + $0x330] sm:$0xff] }
 0x32c   :  { %5843 = vmatpush1.bf16.msra.mxu0 %v5842_v37  ;;  %v1655_v37 = vld [vmem:[%s7977_s4 + $0x48] sm:$0xff]  ;;  %5977 = vmatprep.subr.bf16.mxu1 %v5976_v34  ;;  %v1290_v34 = vld [vmem:[%s7976_s3 + $0xd8] sm:$0xff] }
 0x32d   :  { %5845 = vmatprep.subr.bf16.mxu0 %v5844_v29  ;;  %v1672_v29 = vld [vmem:[%s7977_s4 + $0xd0] sm:$0xff]  ;;  %v5978_v9 = vpack.c.bf16 %v1655_v37, %v1654_v35  ;;  %v5886_v35 = vpack.c.bf16 %v1285_v32, %v1283_v31  ;;  %v5888_v37 = vpack.c.bf16 %v1290_v34, %v1288_v33  ;;  %v5918_v31 = vpack.c.bf16 %v5000_v26, %v4998_v25  ;;  %v5002_v33 = vld [vmem:[%s7976_s3 + $0x340] sm:$0xff]  ;;  %v5039_v25 = vld [vmem:[%s7976_s3 + $0x468] sm:$0xff] }
 0x32e   :  { %v5980_v40 = vpack.c.bf16 %v1673_v39, %v1672_v29  ;;  %v1287_v29 = vld [vmem:[%s7976_s3 + $0xc0] sm:$0xff]  ;;  %v1289_v39 = vld [vmem:[%s7976_s3 + $0xd0] sm:$0xff]  ;;  %v5041_v26 = vld [vmem:[%s7976_s3 + $0x478] sm:$0xff] }
 0x32f   :  { %5979 = vmatpush3.bf16.msra.mxu1 %v5978_v9  ;;  %v1292_v9 = vld [vmem:[%s7976_s3 + $0xe8] sm:$0xff]  ;;  %v5004_v34 = vld [vmem:[%s7976_s3 + $0x350] sm:$0xff] }
 0x330   :  { %5847 = vmatpush1.bf16.msra.mxu0 %v5846_v41  ;;  %v1657_v41 = vld [vmem:[%s7977_s4 + $0x58] sm:$0xff]  ;;  %5981 = vmatprep.subr.bf16.mxu1 %v5980_v40 }
 0x331   :  { %5849 = vmatprep.subr.bf16.mxu0 %v5848_v43  ;;  %v1674_v43 = vld [vmem:[%s7977_s4 + $0xe0] sm:$0xff]  ;;  %v5982_v45 = vpack.c.bf16 %v1657_v41, %v1656_v18  ;;  %v1294_v40 = vld [vmem:[%s7976_s3 + $0xf8] sm:$0xff]  ;;  %v5890_v18 = vpack.c.bf16 %v1289_v39, %v1287_v29 }
 0x332   :  { %v5984_v46 = vpack.c.bf16 %v1675_v44, %v1674_v43  ;;  %v5892_v41 = vpack.c.bf16 %v1294_v40, %v1292_v9  ;;  %v1291_v43 = vld [vmem:[%s7976_s3 + $0xe0] sm:$0xff]  ;;  %v1293_v44 = vld [vmem:[%s7976_s3 + $0xf0] sm:$0xff]  ;;  %v5011_v40 = vld [vmem:[%s7976_s3 + $0x388] sm:$0xff] }
 0x333   :  { %5983 = vmatpush3.bf16.msra.mxu1 %v5982_v45  ;;  %v1296_v45 = vld [vmem:[%s7976_s3 + $0x108] sm:$0xff]  ;;  %v5006_v39 = vld [vmem:[%s7976_s3 + $0x360] sm:$0xff]  ;;  %v5008_v9 = vld [vmem:[%s7976_s3 + $0x370] sm:$0xff] }
 0x334   :  { %5851 = vmatpush1.bf16.msra.mxu0 %v5850_v48  ;;  %v1659_v48 = vld [vmem:[%s7977_s4 + $0x68] sm:$0xff]  ;;  %5985 = vmatprep.subr.bf16.mxu1 %v5984_v46  ;;  %v1298_v46 = vld [vmem:[%s7976_s3 + $0x118] sm:$0xff] }
 0x335   :  { %5853 = vmatprep.subr.bf16.mxu0 %v5852_v49  ;;  %v5986_v51 = vpack.c.bf16 %v1659_v48, %v1658_v47  ;;  %v5894_v47 = vpack.c.bf16 %v1293_v44, %v1291_v43  ;;  %v5896_v48 = vpack.c.bf16 %v1298_v46, %v1296_v45  ;;  %v5010_v44 = vld [vmem:[%s7976_s3 + $0x380] sm:$0xff]  ;;  %v5012_v45 = vld [vmem:[%s7976_s3 + $0x390] sm:$0xff]  ;;  %v5015_v46 = vld [vmem:[%s7976_s3 + $0x3a8] sm:$0xff] }
 0x337   :  { %5987 = vmatpush3.bf16.msra.mxu1 %v5986_v51  ;;  %v1300_v51 = vld [vmem:[%s7976_s3 + $0x128] sm:$0xff] }
 0x338   :  { %5855 = vmatpush1.bf16.msra.mxu0 %v5854_v54 }
 0x339   :  { %5857 = vmatprep.subr.bf16.mxu0 %v5856_v55  ;;  %v1268_v55 = vld [vmem:[%s7976_s3 + $0x28] sm:$0xff] }
 0x33a   :  { %v5868_v62 = vpack.c.bf16 %v1270_v56, %v1268_v55  ;;  %v1299_v55 = vld [vmem:[%s7976_s3 + $0x120] sm:$0xff]  ;;  %v1301_v56 = vld [vmem:[%s7976_s3 + $0x130] sm:$0xff] }
 0x33c   :  { %5859 = vmatpush1.bf16.msra.mxu0 %v5858_v58 }
 0x33d   :  { %5861 = vmatprep.subr.bf16.mxu0 %v5860_v61  ;;  %v5866_v61 = vpack.c.bf16 %v1265_v53, %v1263_v52  ;;  %v1302_v52 = vld [vmem:[%s7976_s3 + $0x138] sm:$0xff] }
 0x340   :  { %5863 = vmatpush1.bf16.msra.mxu0 %v5862_v2  ;;  %v1269_v2 = vld [vmem:[%s7976_s3 + $0x30] sm:$0xff] }
 0x341   :  { %5865 = vmatprep.subr.bf16.mxu0 %v5864_v42  ;;  %v1272_v42 = vld [vmem:[%s7976_s3 + $0x48] sm:$0xff]  ;;  %v5870_v6 = vpack.c.bf16 %v1269_v2, %v1267_v63  ;;  %v1303_v2 = vld [vmem:[%s7976_s3 + $0x140] sm:$0xff] }
 0x342   :  { %v5872_v7 = vpack.c.bf16 %v1274_v4, %v1272_v42  ;;  %v1308_v42 = vld [vmem:[%s7976_s3 + $0x168] sm:$0xff]  ;;  %v1310_v4 = vld [vmem:[%s7976_s3 + $0x178] sm:$0xff] }
 0x3e2   :  { %v1145_v49 = vpop.f32.mrb[4].mxu0 }
 0x3e3   :  { %v1147_v50 = vpop.f32.mrb[5].mxu0 }
 0x3e6   :  { %v1218_v54 = vpop.f32.mrb[6].mxu0 }
 0x3e7   :  { %v7164_v58 = vmax.f32 %v1145_v49, %v1218_v54  ;;  %v1220_v59 = vpop.f32.mrb[7].mxu0  ;;  %v1295_v49 = vld [vmem:[%s7976_s3 + $0x100] sm:$0xff]  ;;  %v5900_v54 = vpack.c.bf16 %v1302_v52, %v1300_v51  ;;  %v5016_v51 = vld [vmem:[%s7976_s3 + $0x3b0] sm:$0xff]  ;;  %v5019_v52 = vld [vmem:[%s7976_s3 + $0x3c8] sm:$0xff] }
 0x3e8   :  { %v7166_v60 = vmax.f32 %v1147_v50, %v1220_v59  ;;  %v1297_v50 = vld [vmem:[%s7976_s3 + $0x110] sm:$0xff]  ;;  %v1304_v59 = vld [vmem:[%s7976_s3 + $0x148] sm:$0xff] }
 0x3e9   :  { %v5898_v53 = vpack.c.bf16 %v1297_v50, %v1295_v49  ;;  %v1229_v17 = vrot.slane %v7164_v58, 7  ;;  %v5014_v50 = vld [vmem:[%s7976_s3 + $0x3a0] sm:$0xff] }
 0x3ea   :  { %v1230_v1 = vrot.slane %v7166_v60, 7  ;;  %4991 = vmatprep.mubr.msk.f32.mxu0 %vm1360_vm3, %v7166_v60  ;;  %v1236_v11 = vrot.slane %v7166_v60, 1  ;;  %v5001_v60 = vld [vmem:[%s7976_s3 + $0x338] sm:$0xff] }
 0x3eb   :  { %1428 = vmatmul.mubr.f32.vlgmr.msra.gmra.mrb[8].mxu0 %v7164_v58  ;;  %v5916_v24 = vpack.c.bf16 %v5001_v60, %v4999_v19  ;;  %v1233_v27 = vsel %vm65_vm1, 0.0, %v1229_v17  ;;  %v5035_v17 = vld [vmem:[%s7976_s3 + $0x448] sm:$0xff]  ;;  %v5037_v19 = vld [vmem:[%s7976_s3 + $0x458] sm:$0xff] }
 0x3ec   :  { %5867 = vmatpush1.bf16.msra.mxu0 %v5866_v61  ;;  %v1234_v5 = vsel %vm65_vm1, 0.0, %v1230_v1  ;;  %v1306_v61 = vld [vmem:[%s7976_s3 + $0x158] sm:$0xff]  ;;  %v1305_v1 = vld [vmem:[%s7976_s3 + $0x150] sm:$0xff] }
 0x3ed   :  { %5869 = vmatprep.subr.bf16.mxu0 %v5868_v62  ;;  %v1257_v22 = vsel %vm7179_vm5, %v1234_v5, 0.0  ;;  %v5902_v62 = vpack.c.bf16 %v1301_v56, %v1299_v55  ;;  %v5904_v63 = vpack.c.bf16 %v1306_v61, %v1304_v59  ;;  %v5906_v5 = vpack.c.bf16 %v1305_v1, %v1303_v2  ;;  %v5018_v56 = vld [vmem:[%s7976_s3 + $0x3c0] sm:$0xff]  ;;  %v5020_v59 = vld [vmem:[%s7976_s3 + $0x3d0] sm:$0xff]  ;;  %v5023_v61 = vld [vmem:[%s7976_s3 + $0x3e8] sm:$0xff] }
 0x3ee   :  { %4992 = vmatprep.mubr.msk.f32.mxu0 %vm1360_vm3, %v1257_v22  ;;  %v1307_v22 = vld [vmem:[%s7976_s3 + $0x160] sm:$0xff] }
 0x3ef   :  { %v5022_v1 = vld [vmem:[%s7976_s3 + $0x3e0] sm:$0xff] }
 0x3f0   :  { %5871 = vmatpush1.bf16.msra.mxu0 %v5870_v6  ;;  %v5908_v6 = vpack.c.bf16 %v1310_v4, %v1308_v42  ;;  %v5024_v42 = vld [vmem:[%s7976_s3 + $0x3f0] sm:$0xff]  ;;  %v5027_v4 = vld [vmem:[%s7976_s3 + $0x408] sm:$0xff] }
 0x3f1   :  { %5873 = vmatprep.subr.bf16.mxu0 %v5872_v7  ;;  %v1309_v7 = vld [vmem:[%s7976_s3 + $0x170] sm:$0xff] }
 0x3f2   :  { %v5910_v12 = vpack.c.bf16 %v1309_v7, %v1307_v22  ;;  %v5026_v7 = vld [vmem:[%s7976_s3 + $0x400] sm:$0xff] }
 0x3f4   :  { %5875 = vmatpush1.bf16.msra.mxu0 %v5874_v14  ;;  %v5912_v14 = vpack.c.bf16 %v4997_v10, %v4995_v8  ;;  %v5028_v8 = vld [vmem:[%s7976_s3 + $0x410] sm:$0xff]  ;;  %v5031_v10 = vld [vmem:[%s7976_s3 + $0x428] sm:$0xff] }
 0x3f5   :  { %5877 = vmatprep.subr.bf16.mxu0 %v5876_v15  ;;  %v4994_v15 = vld [vmem:[%s7976_s3 + $0x300] sm:$0xff] }
 0x3f6   :  { %v5914_v20 = vpack.c.bf16 %v4996_v16, %v4994_v15  ;;  %v5030_v15 = vld [vmem:[%s7976_s3 + $0x420] sm:$0xff]  ;;  %v5032_v16 = vld [vmem:[%s7976_s3 + $0x430] sm:$0xff] }
 0x3f7   :  { %v5950_v60 = vpack.c.bf16 %v5032_v16, %v5030_v15 }
 0x3f8   :  { %5879 = vmatpush1.bf16.msra.mxu0 %v5878_v21  ;;  %v1240_v21 = vsel %vm78_vm4, %v1236_v11, 0.0  ;;  %v5033_v11 = vld [vmem:[%s7976_s3 + $0x438] sm:$0xff] }
 0x3f9   :  { %5881 = vmatprep.subr.bf16.mxu0 %v5880_v23  ;;  %v1226_v23 = vld [vmem:[#allocation2 + $0x2] ss:$8 sm:$0x3] }
 0x3fc   :  { %5883 = vmatpush1.bf16.msra.mxu0 %v5882_v28  ;;  %v5003_v28 = vld [vmem:[%s7976_s3 + $0x348] sm:$0xff] }
 0x3fd   :  { %5885 = vmatprep.subr.bf16.mxu0 %v5884_v30  ;;  %v1262_v30 = vsel %vm7331_vm6, %v1240_v21, 0.0  ;;  %v5920_v32 = vpack.c.bf16 %v5005_v57, %v5003_v28  ;;  %v5034_v21 = vld [vmem:[%s7976_s3 + $0x440] sm:$0xff]  ;;  %v5956_v28 = vpack.c.bf16 %v5041_v26, %v5039_v25 }
 0x3fe   :  { %v5038_v57 = vld [vmem:[%s7976_s3 + $0x460] sm:$0xff] }
 0x400   :  { %5887 = vmatpush1.bf16.msra.mxu0 %v5886_v35  ;;  %v5009_v35 = vld [vmem:[%s7976_s3 + $0x378] sm:$0xff] }
 0x401   :  { %5889 = vmatprep.subr.bf16.mxu0 %v5888_v37  ;;  %v5922_v37 = vpack.c.bf16 %v5004_v34, %v5002_v33  ;;  %v5924_v29 = vpack.c.bf16 %v5009_v35, %v5007_v3  ;;  %v1676_v34 = vld [vmem:[%s7977_s4 + $0xf0] sm:$0xff]  ;;  %v1677_v3 = vld [vmem:[%s7977_s4 + $0xf8] sm:$0xff] }
 0x402   :  { %v5988_v35 = vpack.c.bf16 %v1677_v3, %v1676_v34  ;;  %v1783_v34 = vld [vmem:[#allocation2 + $0x16] ss:$0 sm:$0xff] }
 0x404   :  { %5891 = vmatpush1.bf16.msra.mxu0 %v5890_v18  ;;  %v5013_v18 = vld [vmem:[%s7976_s3 + $0x398] sm:$0xff]  ;;  %5989 = vmatprep.subr.bf16.mxu1 %v5988_v35 }
 0x405   :  { %5893 = vmatprep.subr.bf16.mxu0 %v5892_v41  ;;  %v5926_v41 = vpack.c.bf16 %v5008_v9, %v5006_v39  ;;  %v5928_v43 = vpack.c.bf16 %v5013_v18, %v5011_v40  ;;  %v1641_v39 = vrot.slane %v1226_v23, %v1064_v38  ;;  %v1637_v9 = vrot.slane %v1226_v23, %v1060_v36  ;;  %v1678_v38 = vld [vmem:[#allocation2 + $0x3] ss:$0 sm:$0xff] }
 0x408   :  { %5895 = vmatpush1.bf16.msra.mxu0 %v5894_v47  ;;  %v5017_v47 = vld [vmem:[%s7976_s3 + $0x3b8] sm:$0xff] }
 0x409   :  { %5897 = vmatprep.subr.bf16.mxu0 %v5896_v48  ;;  %v5930_v48 = vpack.c.bf16 %v5012_v45, %v5010_v44  ;;  %v5932_v49 = vpack.c.bf16 %v5017_v47, %v5015_v46  ;;  %v1750_v44 = vld [vmem:[#allocation2] sm:$0xe0]  ;;  %v1751_v45 = vld [vmem:[#allocation2 + $0x10] sm:$0x3] }
 0x40a   :  { %v1756_v46 = vrot.slane %v1750_v44, 6  ;;  %v1757_v47 = vrot.slane %v1751_v45, 6 }
 0x40c   :  { %5899 = vmatpush1.bf16.msra.mxu0 %v5898_v53  ;;  %v5021_v53 = vld [vmem:[%s7976_s3 + $0x3d8] sm:$0xff] }
 0x40d   :  { %5901 = vmatprep.subr.bf16.mxu0 %v5900_v54  ;;  %v5934_v54 = vpack.c.bf16 %v5016_v51, %v5014_v50  ;;  %v5936_v55 = vpack.c.bf16 %v5021_v53, %v5019_v52  ;;  %v1763_v50 = vrot.slane %v1751_v45, 2 }
 0x410   :  { %5903 = vmatpush1.bf16.msra.mxu0 %v5902_v62  ;;  %v5025_v62 = vld [vmem:[%s7976_s3 + $0x3f8] sm:$0xff] }
 0x411   :  { %5905 = vmatprep.subr.bf16.mxu0 %v5904_v63  ;;  %v5938_v63 = vpack.c.bf16 %v5020_v59, %v5018_v56  ;;  %v5940_v2 = vpack.c.bf16 %v5025_v62, %v5023_v61 }
 0x414   :  { %5907 = vmatpush1.bf16.msra.mxu0 %v5906_v5  ;;  %v5029_v5 = vld [vmem:[%s7976_s3 + $0x418] sm:$0xff] }
 0x415   :  { %5909 = vmatprep.subr.bf16.mxu0 %v5908_v6  ;;  %v5942_v6 = vpack.c.bf16 %v5024_v42, %v5022_v1  ;;  %v5944_v22 = vpack.c.bf16 %v5029_v5, %v5027_v4 }
 0x418   :  { %5911 = vmatpush1.bf16.msra.mxu0 %v5910_v12  ;;  %v5946_v12 = vpack.c.bf16 %v5028_v8, %v5026_v7 }
 0x419   :  { %5913 = vmatprep.subr.bf16.mxu0 %v5912_v14  ;;  %v5948_v14 = vpack.c.bf16 %v5033_v11, %v5031_v10 }
 0x41b   :  { %4993 = vmatmul.mubr.msk.f32.vlgmr.msra.gmra.mrb[8].mxu0 %vm7179_vm5, %v1233_v27 }
 0x41c   :  { %5915 = vmatpush1.bf16.msra.mxu0 %v5914_v20  ;;  %5042 = vmatprep.mubr.msk.f32.mxu0 %vm1360_vm3, %v1262_v30  ;;  %v5952_v20 = vpack.c.bf16 %v5037_v19, %v5035_v17  ;;  %v5040_v30 = vld [vmem:[%s7976_s3 + $0x470] sm:$0xff]  ;;  %v1816_v17 = vld [vmem:[%s7978_s5] sm:$0xff]  ;;  %v1817_v19 = vld [vmem:[%s7978_s5 + $0x8] sm:$0xff] }
 0x41d   :  { %5917 = vmatprep.subr.bf16.mxu0 %v5916_v24  ;;  %v5036_v24 = vld [vmem:[%s7976_s3 + $0x450] sm:$0xff] }
 0x41e   :  { %v5954_v27 = vpack.c.bf16 %v5036_v24, %v5034_v21  ;;  %v1819_v21 = vld [vmem:[%s7978_s5 + $0x18] sm:$0xff] }
 0x420   :  { %5919 = vmatpush1.bf16.msra.mxu0 %v5918_v31  ;;  %v5958_v31 = vpack.c.bf16 %v5040_v30, %v5038_v57 }
 0x421   :  { %5921 = vmatprep.subr.bf16.mxu0 %v5920_v32  ;;  %v1235_v32 = vrot.slane %v7164_v58, 1  ;;  %v1661_v58 = vld [vmem:[%s7977_s4 + $0x78] sm:$0xff] }
 0x423   :  { %v1239_v33 = vsel %vm78_vm4, %v1235_v32, 0.0  ;;  %vm1755_vm4 = vcmask 1041408   ;;  %v1782_v32 = vld [vmem:[#allocation2 + $0x15] ss:$0 sm:$0xff] }
 0x424   :  { %5923 = vmatpush1.bf16.msra.mxu0 %v5922_v37  ;;  %v1660_v37 = vld [vmem:[%s7977_s4 + $0x70] sm:$0xff]  ;;  %v1758_v53 = vsel %vm1755_vm4, %v1756_v46, %v1757_v47  ;;  %vm7567_vm0 = vmpackc.low %vm1755_vm4, %vm6437_vm15  ;;  %s6442_s4 = smov 104  }
 0x425   :  { %5925 = vmatprep.subr.bf16.mxu0 %v5924_v29  ;;  %v5990_v29 = vpack.c.bf16 %v1661_v58, %v1660_v37 }
 0x427   :  { %5991 = vmatpush3.bf16.msra.mxu1 %v5990_v29 }
 0x428   :  { %5927 = vmatpush1.bf16.msra.mxu0 %v5926_v41 }
 0x429   :  { %5929 = vmatprep.subr.bf16.mxu0 %v5928_v43 }
 0x42c   :  { %5931 = vmatpush1.bf16.msra.mxu0 %v5930_v48  ;;  %v1749_v48 = vld [vmem:[#allocation2 + $0x4] ss:$0 sm:$0xff] }
 0x42d   :  { %5933 = vmatprep.subr.bf16.mxu0 %v5932_v49  ;;  %v1762_v49 = vrot.slane %v1750_v44, 2  ;;  %v1752_v36 = vadd.f32 %v1750_v44, %v1749_v48 }
 0x42f   :  { %v1768_v61 = vrot.slane %v1752_v36, 5 }
 0x430   :  { %5935 = vmatpush1.bf16.msra.mxu0 %v5934_v54  ;;  %v1764_v54 = vsel %vm1761_vm7, %v1762_v49, %v1763_v50  ;;  %v7551_v49 = vld [vmem:[%s7984_s11] sm:$0xff] }
 0x431   :  { %5937 = vmatprep.subr.bf16.mxu0 %v5936_v55 }
 0x434   :  { %5939 = vmatpush1.bf16.msra.mxu0 %v5938_v63 }
 0x435   :  { %5941 = vmatprep.subr.bf16.mxu0 %v5940_v2 }
 0x438   :  { %5943 = vmatpush1.bf16.msra.mxu0 %v5942_v6 }
 0x439   :  { %5945 = vmatprep.subr.bf16.mxu0 %v5944_v22 }
 0x43c   :  { %5947 = vmatpush1.bf16.msra.mxu0 %v5946_v12 }
 0x43d   :  { %5949 = vmatprep.subr.bf16.mxu0 %v5948_v14 }
 0x440   :  { %5951 = vmatpush1.bf16.msra.mxu0 %v5950_v60  ;;  %v5992_v60 = vpack.c.bf16 %v1817_v19, %v1816_v17 }
 0x441   :  { %5953 = vmatprep.subr.bf16.mxu0 %v5952_v20  ;;  %v1818_v20 = vld [vmem:[%s7978_s5 + $0x10] sm:$0xff] }
 0x442   :  { %5993 = vmatprep.subr.bf16.mxu1 %v5992_v60  ;;  %v5996_v24 = vpack.c.bf16 %v1819_v21, %v1818_v20 }
 0x444   :  { %5955 = vmatpush1.bf16.msra.mxu0 %v5954_v27 }
 0x445   :  { %5957 = vmatprep.subr.bf16.mxu0 %v5956_v28 }
 0x448   :  { %5959 = vmatpush1.bf16.msra.mxu0 %v5958_v31 }
 0x44b   :  { %5043 = vmatmul.mubr.msk.f32.vlgmr.msra.gmra.mrb[8].mxu0 %vm7331_vm6, %v1239_v33 }
 0x51e   :  { %v1626_v40 = vpop.f32.mrb[8].mxu0 }
 0x51f   :  { %v1628_v18 = vpop.f32.mrb[9].mxu0  ;;  %v1644_v43 = vadd.f32 %v1637_v9, %v1626_v40 }
 0x520   :  { %v1645_v41 = vadd.f32 %v1641_v39, %v1628_v18  ;;  %v1820_v39 = vld [vmem:[#allocation2 + $0x17] ss:$0 sm:$0xff] }
 0x522   :  { %1743 = vmatprep.mubr.f32.mxu1 %v1645_v41 }
 0x523   :  { %1744 = vmatmul.mubr.f32.vlgmr.msra.gmra.mrb[8].mxu1 %v1644_v43 }
 0x524   :  { %5995 = vmatpush3.bf16.msra.mxu1 %v5992_v60 }
 0x525   :  { %5997 = vmatprep.subr.bf16.mxu1 %v5996_v24 }
 0x528   :  { %5999 = vmatpush3.bf16.msra.mxu1 %v5996_v24 }
 0x5f6   :  { %v5223_v51 = vpop.f32.mrb[8].mxu1 }
 0x5f7   :  { %v5224_v52 = vpop.f32.mrb[9].mxu1 }
 0x5f8   :  { %v5225_v13 = vadd.f32 %v5224_v52, %v5223_v51  ;;  %v7556_v51 = vld [vmem:[%s7984_s11 + $0x8] sm:$0x3] }
 0x5fa   :  { %v1746_v55 = vadd.f32 %v5225_v13, %v1678_v38 }
 0x5fc   :  { %v1760_v56 = vadd.f32 %v1758_v53, %v1746_v55  ;;  %v1766_v59 = vadd.f32 %v1764_v54, %v1746_v55 }
 0x5fe   :  { %v1771_v62 = vrot.slane %v1760_v56, 7  ;;  %v7489_v63 = vrot.slane %v1766_v59, 6 }
 0x600   :  { %v1776_v2 = vsel %vm65_vm1, %v1768_v61, %v1771_v62  ;;  %v1788_v5 = vsel %vm1787_vm10, %v7489_v63, 0.0 }
 0x601   :  { %v1778_v1 = vsel %vm1777_vm9, %v1776_v2, %v1752_v36 }
 0x602   :  { %v7494_v42 = vsel %vm1761_vm7, %v1778_v1, %v7489_v63 }
 0x603   :  { %v1784_v4 = vsel %vm510_vm8, %v7494_v42, 0.0 }
 0x604   :  { %1785 = vadd.xlane.f32.xlu0 %v1784_v4 }
 0x608   :  { %1789 = vadd.xlane.f32.xlu0 %v1788_v5 }
 0x691   :  { %v1786_v6 = vpop.xlane.xlu0 %1785 }
 0x692   :  { %v1792_v22 = vmul.f32 0.03125, %v1786_v6 }
 0x694   :  { %v1794_v7 = vsub.f32 %v7494_v42, %v1792_v22 }
 0x695   :  { %v1790_v8 = vpop.xlane.xlu0 %1789 }
 0x696   :  { %v1793_v10 = vmul.f32 0.03125, %v1790_v8  ;;  %v1796_v11 = vmul.f32 %v1794_v7, %v1794_v7 }
 0x698   :  { %v1795_v12 = vsub.f32 %v7489_v63, %v1793_v10  ;;  %v1798_v14 = vsel %vm510_vm8, %v1796_v11, 0.0 }
 0x699   :  { %1799 = vadd.xlane.f32.xlu1 %v1798_v14 }
 0x69a   :  { %v1797_v15 = vmul.f32 %v1795_v12, %v1795_v12 }
 0x69c   :  { %v1801_v16 = vsel %vm1787_vm10, %v1797_v15, 0.0  ;;  %v4521_v15 = vld [vmem:[#allocation2 + $0x30] ss:$0 sm:$0xff] }
 0x69d   :  { %1802 = vadd.xlane.f32.xlu1 %v1801_v16 }
 0x726   :  { %v1800_v25 = vpop.xlane.xlu1 %1799 }
 0x727   :  { %v1804_v26 = vmul.f32 0.03125, %v1800_v25 }
 0x729   :  { %v1806_v27 = vadd.f32 1e-05, %v1804_v26 }
 0x72a   :  { %v1803_v28 = vpop.xlane.xlu1 %1802 }
 0x72b   :  { %6289 = vrsqrt.f32 %v1806_v27  ;;  %v1805_v57 = vmul.f32 0.03125, %v1803_v28 }
 0x72d   :  { %v1807_v30 = vadd.f32 1e-05, %v1805_v57 }
 0x72f   :  { %6291 = vrsqrt.f32 %v1807_v30 }
 0x735   :  { %v6290_v31 = vpop.eup %6289 }
 0x736   :  { %v1810_v33 = vmul.f32 %v6290_v31, %v1794_v7 }
 0x738   :  { %v1812_v3 = vmul.f32 %v1810_v33, %v1782_v32 }
 0x739   :  { %v6292_v35 = vpop.eup %6291 }
 0x73a   :  { %v1811_v37 = vmul.f32 %v6292_v35, %v1795_v12  ;;  %v1814_v58 = vadd.f32 %v1812_v3, %v1783_v34 }
 0x73c   :  { %v1813_v29 = vmul.f32 %v1811_v37, %v1782_v32  ;;  %5447 = vmatprep.mubr.msk.f32.mxu1 %vm510_vm8, %v1814_v58 }
 0x73e   :  { %v1815_v23 = vadd.f32 %v1813_v29, %v1783_v34 }
 0x740   :  { %5448 = vmatmul.mubr.msk.f32.vlgmr.msra.gmra.mrb[10].mxu1 %vm510_vm8, %v1815_v23 }
 0x813   :  { %v5449_v9 = vpop.f32.mrb[10].mxu1 }
 0x814   :  { %v7518_v40 = vadd.f32 %v5449_v9, %v1820_v39  ;;  %v1893_v18 = vpop.f32.mrb[11].mxu1 }
 0x815   :  { %v7520_v41 = vadd.f32 %v1893_v18, %v1820_v39 }
 0x817   :  { %5454 = vmatprep.mubr.msk.f32.mxu1 %vm1912_vm11, %v7520_v41  ;;  %v7526_v43 = vpack.i.bf16 %v7518_v40, %v7520_v41 }
 0x819   :  { %6210 = vrot.lane.b32.xlu0 %v7526_v43, %s6433_s24 }
 0x81d   :  { %6220 = vrot.lane.b32.xlu0 %v7526_v43, %s6434_s25 }
 0x821   :  { %2108 = vrot.lane.b32.xlu0 %v7520_v41, %s6435_s10 }
 0x825   :  { %2110 = vrot.lane.b32.xlu0 %v7518_v40, %s6435_s10 }
 0x88b   :  { %v6211_v44 = vpop.permute.xlu0 %6210 }
 0x88c   :  { %v6213_v45 = vunpack.i.h.bf16 %v6211_v44  ;;  %v6212_v46 = vunpack.i.l.bf16 %v6211_v44 }
 0x88e   :  { %v6000_v48 = vpack.c.bf16 %v6213_v45, %v6212_v46 }
 0x88f   :  { %v6221_v7 = vpop.permute.xlu0 %6220 }
 0x890   :  { %6002 = vmatprep.subr.msk.bf16.mxu1 %vm7538_vm12, %v6000_v48  ;;  %v6223_v10 = vunpack.i.h.bf16 %v6221_v7  ;;  %v6222_v11 = vunpack.i.l.bf16 %v6221_v7 }
 0x891   :  { %6005 = vmatpush3.bf16.xpose.msk.msra.mxu1 %vm7538_vm12, %v6000_v48 }
 0x892   :  { %v6012_v17 = vpack.c.bf16 %v6223_v10, %v6222_v11 }
 0x893   :  { %v2109_v24 = vpop.permute.xlu0 %2108 }
 0x897   :  { %v2111_v25 = vpop.permute.xlu0 %2110 }
 0x898   :  { %5455 = vmatmul.mubr.msk.f32.vlgmr.msra.gmra.mrb[12].mxu1 %vm1912_vm11, %v7518_v40 }
 0x96b   :  { %v5456_v50 = vpop.f32.mrb[12].mxu1 }
 0x96c   :  { %v1987_v38 = vpop.f32.mrb[13].mxu1  ;;  %v1993_v13 = vadd.f32 %v5456_v50, %v7556_v51 }
 0x96d   :  { %v1988_v52 = vadd.f32 %v1987_v38, %v7551_v49 }
 0x96e   :  { %v2001_v53 = vsel %vm2000_vm14, %v1993_v13, -inf }
 0x96f   :  { %v1997_v36 = vsel %vm1996_vm13, %v1988_v52, -inf }
 0x970   :  { %1998 = vmax.xlane.f32.xlu1 %v1997_v36 }
 0x974   :  { %2002 = vmax.xlane.f32.xlu1 %v2001_v53 }
 0x9fd   :  { %v1999_v54 = vpop.xlane.xlu1 %1998 }
 0x9fe   :  { %v2004_v55 = vsub.f32 %v1988_v52, %v1999_v54  ;;  %v1903_v54 = vld [vmem:[%s7979_s6 + $0x8] sm:$0xff] }
 0xa00   :  { %v2006_v61 = vmul.f32 1.442695, %v2004_v55  ;;  %v1902_v55 = vld [vmem:[%s7979_s6] sm:$0xff] }
 0xa01   :  { %v2003_v56 = vpop.xlane.xlu1 %2002 }
 0xa02   :  { %v2005_v59 = vsub.f32 %v1993_v13, %v2003_v56 }
 0xa04   :  { %v2008_v62 = vmul.f32 1.442695, %v2005_v59 }
 0xa06   :  { %6293 = vpow2.f32 %v2008_v62 }
 0xa07   :  { %6295 = vpow2.f32 %v2006_v61 }
 0xa10   :  { %v6294_v2 = vpop.eup %6293 }
 0xa11   :  { %v2013_v1 = vsel %vm2000_vm14, %v6294_v2, 0.0  ;;  %v6296_v4 = vpop.eup %6295 }
 0xa12   :  { %2014 = vadd.xlane.f32.xlu1 %v2013_v1  ;;  %v2010_v5 = vsel %vm1996_vm13, %v6296_v4, 0.0 }
 0xa16   :  { %2011 = vadd.xlane.f32.xlu1 %v2010_v5 }
 0xa27   :  { %6215 = vrot.lane.b32.xlu1 %v7526_v43, %s6436_s29 }
 0xa9f   :  { %v2015_v6 = vpop.xlane.xlu1 %2014 }
 0xaa0   :  { %6297 = vrcp.f32 %v2015_v6 }
 0xaa3   :  { %v2012_v22 = vpop.xlane.xlu1 %2011 }
 0xaa4   :  { %6299 = vrcp.f32 %v2012_v22 }
 0xaa7   :  { %v6216_v8 = vpop.permute.xlu1 %6215 }
 0xaa8   :  { %v6218_v12 = vunpack.i.h.bf16 %v6216_v8  ;;  %v6217_v14 = vunpack.i.l.bf16 %v6216_v8 }
 0xaaa   :  { %v6006_v16 = vpack.c.bf16 %v6218_v12, %v6217_v14  ;;  %v6298_v19 = vpop.eup %6297 }
 0xaab   :  { %v2019_v21 = vmul.f32 %v6298_v19, %v6294_v2 }
 0xaac   :  { %6008 = vmatprep.subr.msk.bf16.mxu1 %vm7567_vm0, %v6006_v16 }
 0xaad   :  { %6011 = vmatpush3.bf16.msk.msra.mxu1 %vm7567_vm0, %v6006_v16 }
 0xaae   :  { %v6300_v60 = vpop.eup %6299  ;;  %6014 = vmatprep.subr.msk.bf16.mxu1 %vm7538_vm12, %v6012_v17 }
 0xaaf   :  { %v2017_v20 = vmul.f32 %v6300_v60, %v6296_v4 }
 0xab1   :  { %5461 = vmatprep.mubr.msk.f32.mxu1 %vm1996_vm13, %v2017_v20 }
 0xab2   :  { %5462 = vmatmul.mubr.msk.f32.vlgmr.msra.gmra.mrb[14].mxu1 %vm1996_vm13, %v2019_v21 }
 0xab3   :  { %5468 = vmatprep.mubr.msk.f32.mxu1 %vm1912_vm11, %v2109_v24 }
 0xab6   :  { %6017 = vmatpush3.bf16.xpose.msk.msra.mxu1 %vm7538_vm12, %v6012_v17 }
 0xabd   :  { %5469 = vmatmul.mubr.msk.f32.vlgmr.msra.gmra.mrb[16].mxu1 %vm1912_vm11, %v2111_v25 }
 0xb85   :  { %v7583_v26 = vpop.f32.mrb[14].mxu1 }
 0xb86   :  { %v2099_v27 = vpop.f32.mrb[15].mxu1 }
 0xb90   :  { %v5470_v28 = vpop.f32.mrb[16].mxu1 }
 0xb91   :  { %v2196_v57 = vadd.f32 %v5470_v28, %v7556_v51  ;;  %v2190_v30 = vpop.f32.mrb[17].mxu1  ;;  %v1904_v28 = vld [vmem:[%s7979_s6 + $0x10] sm:$0xff] }
 0xb92   :  { %v2191_v31 = vadd.f32 %v2190_v30, %v7551_v49 }
 0xb93   :  { %v2202_v32 = vsel %vm2000_vm14, %v2196_v57, -inf }
 0xb94   :  { %2203 = vmax.xlane.f32.xlu0 %v2202_v32  ;;  %v2199_v33 = vsel %vm1996_vm13, %v2191_v31, -inf }
 0xb95   :  { %2200 = vmax.xlane.f32.xlu1 %v2199_v33 }
 0xba6   :  { %6225 = vrot.lane.b32.xlu1 %v7526_v43, %s6438_s30 }
 0xbaa   :  { %2471 = vrot.lane.b32.xlu1 %v7520_v41, %s6439_s13 }
 0xbae   :  { %2473 = vrot.lane.b32.xlu1 %v7518_v40, %s6439_s13 }
 0xc21   :  { %v2204_v34 = vpop.xlane.xlu0 %2203 }
 0xc22   :  { %v2206_v3 = vsub.f32 %v2196_v57, %v2204_v34  ;;  %v2201_v35 = vpop.xlane.xlu1 %2200 }
 0xc23   :  { %v2205_v37 = vsub.f32 %v2191_v31, %v2201_v35 }
 0xc24   :  { %v2209_v58 = vmul.f32 1.442695, %v2206_v3 }
 0xc25   :  { %v2207_v29 = vmul.f32 1.442695, %v2205_v37 }
 0xc26   :  { %v6226_v23 = vpop.permute.xlu1 %6225 }
 0xc27   :  { %6301 = vpow2.f32 %v2207_v29  ;;  %v6228_v39 = vunpack.i.h.bf16 %v6226_v23  ;;  %v6227_v9 = vunpack.i.l.bf16 %v6226_v23 }
 0xc28   :  { %6303 = vpow2.f32 %v2209_v58 }
 0xc29   :  { %v6018_v18 = vpack.c.bf16 %v6228_v39, %v6227_v9 }
 0xc2a   :  { %v2472_v4 = vpop.permute.xlu1 %2471 }
 0xc2b   :  { %6020 = vmatprep.subr.msk.bf16.mxu1 %vm7567_vm0, %v6018_v18 }
 0xc2c   :  { %6023 = vmatpush3.bf16.msk.msra.mxu1 %vm7567_vm0, %v6018_v18 }
 0xc2d   :  { %5478 = vmatprep.subr.mxu1 %v1903_v54 }
 0xc2e   :  { %v2474_v5 = vpop.permute.xlu1 %2473 }
 0xc31   :  { %v6302_v44 = vpop.eup %6301 }
 0xc32   :  { %v2211_v45 = vsel %vm1996_vm13, %v6302_v44, 0.0  ;;  %v6304_v46 = vpop.eup %6303 }
 0xc33   :  { %2212 = vadd.xlane.f32.xlu0 %v2211_v45  ;;  %v2214_v48 = vsel %vm2000_vm14, %v6304_v46, 0.0 }
 0xc37   :  { %2215 = vadd.xlane.f32.xlu0 %v2214_v48 }
 0xc4d   :  { %6230 = vrot.lane.b32.xlu0 %v7526_v43, %s6440_s14 }
 0xcc0   :  { %v2213_v50 = vpop.xlane.xlu0 %2212 }
 0xcc1   :  { %6305 = vrcp.f32 %v2213_v50 }
 0xcc4   :  { %v2216_v38 = vpop.xlane.xlu0 %2215 }
 0xcc5   :  { %6307 = vrcp.f32 %v2216_v38 }
 0xcc8   :  { %v6231_v56 = vpop.permute.xlu0 %6230 }
 0xcc9   :  { %v6233_v59 = vunpack.i.h.bf16 %v6231_v56  ;;  %v6232_v61 = vunpack.i.l.bf16 %v6231_v56 }
 0xccb   :  { %v6306_v52 = vpop.eup %6305  ;;  %v6024_v1 = vpack.c.bf16 %v6233_v59, %v6232_v61 }
 0xccc   :  { %v2218_v13 = vmul.f32 %v6306_v52, %v6302_v44 }
 0xcce   :  { %5475 = vmatprep.mubr.msk.f32.mxu1 %vm1996_vm13, %v2218_v13 }
 0xccf   :  { %v6308_v36 = vpop.eup %6307 }
 0xcd0   :  { %v2220_v53 = vmul.f32 %v6308_v36, %v6304_v46 }
 0xcd2   :  { %5476 = vmatmul.mubr.msk.f32.vlgmr.msra.gmra.mrb[18].mxu1 %vm1996_vm13, %v2220_v53 }
 0xcd3   :  { %5479 = vmatpush3.msra.mxu1 %v1903_v54 }
 0xcd4   :  { %5483 = vmatprep.subr.mxu1 %v1902_v55 }
 0xda5   :  { %v5477_v62 = vpop.f32.mrb[18].mxu1 }
 0xda6   :  { %v2300_v2 = vpop.f32.mrb[19].mxu1 }
 0xda7   :  { %5480 = vmatprep.mubr.msk.f32.mxu1 %vm1912_vm11, %v2300_v2 }
 0xda8   :  { %5481 = vmatmul.mubr.msk.f32.vlgmr.msra.gmra.mrb[20].mxu1 %vm1912_vm11, %v5477_v62 }
 0xda9   :  { %5484 = vmatpush3.msra.mxu1 %v1902_v55  ;;  %5485 = vmatprep.mubr.msk.f32.mxu1 %vm1912_vm11, %v2099_v27 }
 0xdaa   :  { %6026 = vmatprep.subr.msk.bf16.mxu1 %vm7538_vm12, %v6024_v1 }
 0xdb0   :  { %5486 = vmatmul.mubr.msk.f32.vlgmr.msra.gmra.mrb[20].mxu1 %vm1912_vm11, %v7583_v26 }
 0xdb1   :  { %6029 = vmatpush3.bf16.xpose.msk.msra.mxu1 %vm7538_vm12, %v6024_v1  ;;  %5492 = vmatprep.mubr.msk.f32.mxu1 %vm1912_vm11, %v2472_v4 }
 0xdb8   :  { %5493 = vmatmul.mubr.msk.f32.vlgmr.msra.gmra.mrb[22].mxu1 %vm1912_vm11, %v2474_v5 }
 0xe8b   :  { %v5494_v6 = vpop.f32.mrb[22].mxu1 }
 0xe8c   :  { %v2559_v22 = vadd.f32 %v5494_v6, %v7556_v51  ;;  %v2553_v7 = vpop.f32.mrb[23].mxu1 }
 0xe8d   :  { %v2554_v8 = vadd.f32 %v2553_v7, %v7551_v49 }
 0xe8e   :  { %v2565_v10 = vsel %vm2000_vm14, %v2559_v22, -inf }
 0xe8f   :  { %2566 = vmax.xlane.f32.xlu0 %v2565_v10  ;;  %v2562_v11 = vsel %vm1996_vm13, %v2554_v8, -inf  ;;  %v1905_v10 = vld [vmem:[%s7979_s6 + $0x18] sm:$0xff] }
 0xe90   :  { %2563 = vmax.xlane.f32.xlu1 %v2562_v11 }
 0xea1   :  { %6235 = vrot.lane.b32.xlu1 %v7526_v43, %s6441_s17 }
 0xea5   :  { %2755 = vrot.lane.b32.xlu1 %v7520_v41, %s6442_s4 }
 0xea9   :  { %2757 = vrot.lane.b32.xlu1 %v7518_v40, %s6442_s4 }
 0xf1c   :  { %v2567_v12 = vpop.xlane.xlu0 %2566 }
 0xf1d   :  { %v2569_v14 = vsub.f32 %v2559_v22, %v2567_v12  ;;  %v2564_v16 = vpop.xlane.xlu1 %2563 }
 0xf1e   :  { %v2568_v17 = vsub.f32 %v2554_v8, %v2564_v16  ;;  %v3041_v16 = vld [vmem:[#allocation2 + $0x20] ss:$0 sm:$0xff] }
 0xf1f   :  { %v2572_v19 = vmul.f32 1.442695, %v2569_v14 }
 0xf20   :  { %v2570_v60 = vmul.f32 1.442695, %v2568_v17 }
 0xf21   :  { %v6236_v20 = vpop.permute.xlu1 %6235 }
 0xf22   :  { %6309 = vpow2.f32 %v2570_v60  ;;  %v6238_v21 = vunpack.i.h.bf16 %v6236_v20  ;;  %v6237_v24 = vunpack.i.l.bf16 %v6236_v20 }
 0xf23   :  { %6311 = vpow2.f32 %v2572_v19 }
 0xf24   :  { %v6030_v25 = vpack.c.bf16 %v6238_v21, %v6237_v24 }
 0xf25   :  { %v2756_v39 = vpop.permute.xlu1 %2755 }
 0xf26   :  { %6032 = vmatprep.subr.msk.bf16.mxu1 %vm7567_vm0, %v6030_v25 }
 0xf27   :  { %6035 = vmatpush3.bf16.msk.msra.mxu1 %vm7567_vm0, %v6030_v25 }
 0xf28   :  { %5502 = vmatprep.subr.mxu1 %v1904_v28 }
 0xf29   :  { %v2758_v9 = vpop.permute.xlu1 %2757 }
 0xf2c   :  { %v6310_v41 = vpop.eup %6309 }
 0xf2d   :  { %v2574_v40 = vsel %vm1996_vm13, %v6310_v41, 0.0  ;;  %v6312_v26 = vpop.eup %6311 }
 0xf2e   :  { %2575 = vadd.xlane.f32.xlu0 %v2574_v40  ;;  %v2577_v27 = vsel %vm2000_vm14, %v6312_v26, 0.0 }
 0xf32   :  { %2578 = vadd.xlane.f32.xlu0 %v2577_v27 }
 0xf48   :  { %6240 = vrot.lane.b32.xlu0 %v7526_v43, %s6443_s18 }
 0xfbb   :  { %v2576_v57 = vpop.xlane.xlu0 %2575 }
 0xfbc   :  { %6313 = vrcp.f32 %v2576_v57 }
 0xfbf   :  { %v2579_v30 = vpop.xlane.xlu0 %2578 }
 0xfc0   :  { %6315 = vrcp.f32 %v2579_v30 }
 0xfc3   :  { %v6241_v32 = vpop.permute.xlu0 %6240 }
 0xfc4   :  { %v6243_v34 = vunpack.i.h.bf16 %v6241_v32  ;;  %v6242_v3 = vunpack.i.l.bf16 %v6241_v32  ;;  %v3076_v32 = vld [vmem:[%s7980_s7] sm:$0xff] }
 0xfc6   :  { %v6314_v31 = vpop.eup %6313  ;;  %v6036_v58 = vpack.c.bf16 %v6243_v34, %v6242_v3  ;;  %v3078_v3 = vld [vmem:[%s7980_s7 + $0x10] sm:$0xff] }
 0xfc7   :  { %v2581_v33 = vmul.f32 %v6314_v31, %v6310_v41 }
 0xfc9   :  { %5499 = vmatprep.mubr.msk.f32.mxu1 %vm1996_vm13, %v2581_v33  ;;  %v3077_v33 = vld [vmem:[%s7980_s7 + $0x8] sm:$0xff] }
 0xfca   :  { %v6316_v35 = vpop.eup %6315  ;;  %v6048_v34 = vpack.c.bf16 %v3077_v33, %v3076_v32 }
 0xfcb   :  { %v2583_v37 = vmul.f32 %v6316_v35, %v6312_v26  ;;  %v3079_v35 = vld [vmem:[%s7980_s7 + $0x18] sm:$0xff] }
 0xfcc   :  { %6049 = vmatprep.subr.bf16.mxu0 %v6048_v34 }
 0xfcd   :  { %5500 = vmatmul.mubr.msk.f32.vlgmr.msra.gmra.mrb[24].mxu1 %vm1996_vm13, %v2583_v37  ;;  %6051 = vmatpush3.bf16.msra.mxu0 %v6048_v34  ;;  %v6052_v37 = vpack.c.bf16 %v3079_v35, %v3078_v3 }
 0xfce   :  { %5503 = vmatpush3.msra.mxu1 %v1904_v28 }
 0xfcf   :  { %6038 = vmatprep.subr.msk.bf16.mxu1 %vm7538_vm12, %v6036_v58  ;;  %6053 = vmatprep.subr.bf16.mxu0 %v6052_v37 }
 0xfd1   :  { %6055 = vmatpush3.bf16.msra.mxu0 %v6052_v37 }
0x10a0   :  { %v5501_v29 = vpop.f32.mrb[24].mxu1 }
0x10a1   :  { %v2663_v23 = vpop.f32.mrb[25].mxu1 }
0x10a2   :  { %5504 = vmatprep.mubr.msk.f32.mxu1 %vm1912_vm11, %v2663_v23 }
0x10a3   :  { %5505 = vmatmul.mubr.msk.f32.vlgmr.msra.gmra.mrb[20].mxu1 %vm1912_vm11, %v5501_v29 }
0x10a4   :  { %6041 = vmatpush3.bf16.xpose.msk.msra.mxu1 %vm7538_vm12, %v6036_v58  ;;  %5511 = vmatprep.mubr.msk.f32.mxu1 %vm1912_vm11, %v2756_v39 }
0x10ab   :  { %5512 = vmatmul.mubr.msk.f32.vlgmr.msra.gmra.mrb[26].mxu1 %vm1912_vm11, %v2758_v9 }
0x117e   :  { %v5513_v18 = vpop.f32.mrb[26].mxu1 }
0x117f   :  { %v2843_v44 = vadd.f32 %v5513_v18, %v7556_v51  ;;  %v2837_v45 = vpop.f32.mrb[27].mxu1 }
0x1180   :  { %v2838_v46 = vadd.f32 %v2837_v45, %v7551_v49  ;;  %v3044_v45 = vld [vmem:[#allocation2 + $0x21] ss:$0 sm:$0xff] }
0x1181   :  { %v2849_v48 = vsel %vm2000_vm14, %v2843_v44, -inf }
0x1182   :  { %2850 = vmax.xlane.f32.xlu0 %v2849_v48  ;;  %v2846_v50 = vsel %vm1996_vm13, %v2838_v46, -inf  ;;  %v3045_v48 = vld [vmem:[#allocation2 + $0x22] ss:$0 sm:$0xff] }
0x1183   :  { %2847 = vmax.xlane.f32.xlu1 %v2846_v50 }
0x1194   :  { %6245 = vrot.lane.b32.xlu1 %v7526_v43, %s6444_s20 }
0x120f   :  { %v2851_v38 = vpop.xlane.xlu0 %2850 }
0x1210   :  { %v2853_v52 = vsub.f32 %v2843_v44, %v2851_v38  ;;  %v2848_v13 = vpop.xlane.xlu1 %2847 }
0x1211   :  { %v2852_v36 = vsub.f32 %v2838_v46, %v2848_v13 }
0x1212   :  { %v2856_v53 = vmul.f32 1.442695, %v2853_v52 }
0x1213   :  { %v2854_v54 = vmul.f32 1.442695, %v2852_v36 }
0x1214   :  { %v6246_v55 = vpop.permute.xlu1 %6245 }
0x1215   :  { %6317 = vpow2.f32 %v2854_v54  ;;  %v6248_v56 = vunpack.i.h.bf16 %v6246_v55  ;;  %v6247_v59 = vunpack.i.l.bf16 %v6246_v55  ;;  %v3173_v54 = vld [vmem:[%s7981_s8] sm:$0xff]  ;;  %v3174_v55 = vld [vmem:[%s7981_s8 + $0x8] sm:$0xff] }
0x1216   :  { %6319 = vpow2.f32 %v2856_v53 }
0x1217   :  { %v6042_v61 = vpack.c.bf16 %v6248_v56, %v6247_v59  ;;  %v6056_v56 = vpack.c.bf16 %v3174_v55, %v3173_v54  ;;  %v3175_v59 = vld [vmem:[%s7981_s8 + $0x10] sm:$0xff]  ;;  %v3265_v54 = vld [vmem:[#allocation2 + $0x25] ss:$0 sm:$0xff] }
0x1219   :  { %6044 = vmatprep.subr.msk.bf16.mxu1 %vm7567_vm0, %v6042_v61 }
0x121a   :  { %6047 = vmatpush3.bf16.msk.msra.mxu1 %vm7567_vm0, %v6042_v61  ;;  %v3176_v61 = vld [vmem:[%s7981_s8 + $0x18] sm:$0xff] }
0x121b   :  { %5521 = vmatprep.subr.mxu1 %v1905_v10 }
0x121f   :  { %v6318_v62 = vpop.eup %6317 }
0x1220   :  { %v2858_v43 = vsel %vm1996_vm13, %v6318_v62, 0.0  ;;  %v6320_v2 = vpop.eup %6319 }
0x1221   :  { %2859 = vadd.xlane.f32.xlu0 %v2858_v43  ;;  %v2861_v1 = vsel %vm2000_vm14, %v6320_v2, 0.0  ;;  %v3177_v43 = vld [vmem:[%s7981_s8 + $0x20] sm:$0xff] }
0x1225   :  { %2862 = vadd.xlane.f32.xlu0 %v2861_v1 }
0x12ae   :  { %v2860_v4 = vpop.xlane.xlu0 %2859 }
0x12af   :  { %6321 = vrcp.f32 %v2860_v4  ;;  %v3179_v4 = vld [vmem:[%s7981_s8 + $0x30] sm:$0xff] }
0x12b2   :  { %v2863_v5 = vpop.xlane.xlu0 %2862 }
0x12b3   :  { %6323 = vrcp.f32 %v2863_v5  ;;  %v3180_v5 = vld [vmem:[%s7981_s8 + $0x38] sm:$0xff] }
0x12b9   :  { %v6322_v6 = vpop.eup %6321 }
0x12ba   :  { %v2865_v22 = vmul.f32 %v6322_v6, %v6318_v62  ;;  %v6060_v62 = vpack.c.bf16 %v3176_v61, %v3175_v59  ;;  %v6068_v6 = vpack.c.bf16 %v3180_v5, %v3179_v4  ;;  %v3302_v4 = vld [vmem:[#allocation2 + $0x27] ss:$0 sm:$0xff] }
0x12bc   :  { %5518 = vmatprep.mubr.msk.f32.mxu1 %vm1996_vm13, %v2865_v22  ;;  %v3080_v22 = vld [vmem:[#allocation2 + $0x23] ss:$0 sm:$0xff] }
0x12bd   :  { %v6324_v7 = vpop.eup %6323 }
0x12be   :  { %v2867_v8 = vmul.f32 %v6324_v7, %v6320_v2  ;;  %v3178_v2 = vld [vmem:[%s7981_s8 + $0x28] sm:$0xff] }
0x12bf   :  { %v6064_v1 = vpack.c.bf16 %v3178_v2, %v3177_v43 }
0x12c0   :  { %5519 = vmatmul.mubr.msk.f32.vlgmr.msra.gmra.mrb[28].mxu1 %vm1996_vm13, %v2867_v8 }
0x12c1   :  { %5522 = vmatpush3.msra.mxu1 %v1905_v10 }
0x12c2   :  { %6057 = vmatprep.subr.bf16.mxu1 %v6056_v56 }
0x1393   :  { %v5520_v11 = vpop.f32.mrb[28].mxu1 }
0x1394   :  { %v2947_v12 = vpop.f32.mrb[29].mxu1 }
0x1395   :  { %5523 = vmatprep.mubr.msk.f32.mxu1 %vm1912_vm11, %v2947_v12 }
0x1396   :  { %5524 = vmatmul.mubr.msk.f32.vlgmr.msra.gmra.mrb[20].mxu1 %vm1912_vm11, %v5520_v11 }
0x1397   :  { %6059 = vmatpush3.bf16.msra.mxu1 %v6056_v56  ;;  %v3266_v56 = vld [vmem:[#allocation2 + $0x26] ss:$0 sm:$0xff] }
0x1398   :  { %6061 = vmatprep.subr.bf16.mxu1 %v6060_v62 }
0x139b   :  { %6063 = vmatpush3.bf16.msra.mxu1 %v6060_v62 }
0x139c   :  { %6065 = vmatprep.subr.bf16.mxu1 %v6064_v1 }
0x139f   :  { %6067 = vmatpush3.bf16.msra.mxu1 %v6064_v1 }
0x13a0   :  { %6069 = vmatprep.subr.bf16.mxu1 %v6068_v6 }
0x13a3   :  { %6071 = vmatpush3.bf16.msra.mxu1 %v6068_v6 }
0x1469   :  { %v5525_v14 = vpop.f32.mrb[20].mxu1 }
0x146a   :  { %v3028_v17 = vpop.f32.mrb[21].mxu1  ;;  %v3040_v19 = vadd.f32 %v5525_v14, %v7489_v63 }
0x146b   :  { %v3039_v60 = vadd.f32 %v3028_v17, %v7494_v42 }
0x146c   :  { %v7676_v21 = vadd.f32 %v3041_v16, %v3040_v19 }
0x146d   :  { %v7674_v20 = vadd.f32 %v3041_v16, %v3039_v60 }
0x146e   :  { %v3049_v25 = vsel %vm1787_vm10, %v7676_v21, 0.0 }
0x146f   :  { %v3046_v24 = vsel %vm510_vm8, %v7674_v20, 0.0 }
0x1470   :  { %3047 = vadd.xlane.f32.xlu0 %v3046_v24 }
0x1474   :  { %3050 = vadd.xlane.f32.xlu0 %v3049_v25 }
0x14fd   :  { %v3048_v41 = vpop.xlane.xlu0 %3047 }
0x14fe   :  { %v3052_v40 = vmul.f32 0.03125, %v3048_v41 }
0x1500   :  { %v3054_v26 = vsub.f32 %v7674_v20, %v3052_v40 }
0x1501   :  { %v3051_v27 = vpop.xlane.xlu0 %3050 }
0x1502   :  { %v3053_v63 = vmul.f32 0.03125, %v3051_v27  ;;  %v3056_v28 = vmul.f32 %v3054_v26, %v3054_v26 }
0x1504   :  { %v3055_v42 = vsub.f32 %v7676_v21, %v3053_v63  ;;  %v3058_v57 = vsel %vm510_vm8, %v3056_v28, 0.0 }
0x1505   :  { %3059 = vadd.xlane.f32.xlu0 %v3058_v57 }
0x1506   :  { %v3057_v30 = vmul.f32 %v3055_v42, %v3055_v42 }
0x1508   :  { %v3061_v31 = vsel %vm1787_vm10, %v3057_v30, 0.0 }
0x1509   :  { %3062 = vadd.xlane.f32.xlu0 %v3061_v31 }
0x1592   :  { %v3060_v58 = vpop.xlane.xlu0 %3059 }
0x1593   :  { %v3064_v29 = vmul.f32 0.03125, %v3060_v58 }
0x1595   :  { %v3066_v23 = vadd.f32 1e-05, %v3064_v29 }
0x1596   :  { %v3063_v39 = vpop.xlane.xlu0 %3062 }
0x1597   :  { %6325 = vrsqrt.f32 %v3066_v23  ;;  %v3065_v9 = vmul.f32 0.03125, %v3063_v39  ;;  %v5086_v39 = vld [vmem:[%s7978_s5 + $0x20] sm:$0xff] }
0x1599   :  { %v3067_v18 = vadd.f32 1e-05, %v3065_v9  ;;  %v5087_v9 = vld [vmem:[%s7978_s5 + $0x28] sm:$0xff] }
0x159b   :  { %6327 = vrsqrt.f32 %v3067_v18  ;;  %v6072_v18 = vpack.c.bf16 %v5087_v9, %v5086_v39 }
0x159d   :  { %6073 = vmatprep.subr.bf16.mxu0 %v6072_v18 }
0x15a1   :  { %v6326_v44 = vpop.eup %6325 }
0x15a2   :  { %v3070_v46 = vmul.f32 %v6326_v44, %v3054_v26  ;;  %v3181_v26 = vld [vmem:[#allocation2 + $0x24] ss:$0 sm:$0xff]  ;;  %v5088_v44 = vld [vmem:[%s7978_s5 + $0x30] sm:$0xff] }
0x15a4   :  { %v3072_v50 = vmul.f32 %v3070_v46, %v3044_v45 }
0x15a5   :  { %v6328_v38 = vpop.eup %6327 }
0x15a6   :  { %v3071_v52 = vmul.f32 %v6328_v38, %v3055_v42  ;;  %v3074_v13 = vadd.f32 %v3072_v50, %v3045_v48 }
0x15a8   :  { %v3073_v36 = vmul.f32 %v3071_v52, %v3044_v45  ;;  %5534 = vmatprep.mubr.msk.f32.mxu0 %vm510_vm8, %v3074_v13  ;;  %v5089_v45 = vld [vmem:[%s7978_s5 + $0x38] sm:$0xff] }
0x15a9   :  { %v6076_v46 = vpack.c.bf16 %v5089_v45, %v5088_v44 }
0x15aa   :  { %v3075_v53 = vadd.f32 %v3073_v36, %v3045_v48 }
0x15ac   :  { %5535 = vmatmul.mubr.msk.f32.vlgmr.msra.gmra.mrb[10].mxu0 %vm510_vm8, %v3075_v53 }
0x15ad   :  { %6075 = vmatpush3.bf16.msra.mxu0 %v6072_v18 }
0x15ae   :  { %6077 = vmatprep.subr.bf16.mxu0 %v6076_v46 }
0x15b1   :  { %6079 = vmatpush3.bf16.msra.mxu0 %v6076_v46 }
0x167f   :  { %v5536_v7 = vpop.f32.mrb[10].mxu0 }
0x1680   :  { %v3159_v8 = vadd.f32 %v5536_v7, %v3080_v22  ;;  %v3153_v10 = vpop.f32.mrb[11].mxu0 }
0x1681   :  { %v3154_v11 = vadd.f32 %v3153_v10, %v3080_v22 }
0x1682   :  { %v3166_v12 = vmul.f32 0.70710677, %v3159_v8  ;;  %v3163_v25 = vmul.f32 0.5, %v3159_v8 }
0x1683   :  { %v3165_v14 = vmul.f32 0.70710677, %v3154_v11  ;;  %v3162_v60 = vmul.f32 0.5, %v3154_v11 }
0x1684   :  { %6329 = verf.f32 %v3166_v12 }
0x1685   :  { %6331 = verf.f32 %v3165_v14 }
0x168e   :  { %v6330_v16 = vpop.eup %6329 }
0x168f   :  { %v6332_v17 = vpop.eup %6331  ;;  %v3170_v19 = vadd.f32 1.0, %v6330_v16 }
0x1690   :  { %v3169_v24 = vadd.f32 1.0, %v6332_v17 }
0x1691   :  { %v3172_v40 = vmul.f32 %v3170_v19, %v3163_v25 }
0x1692   :  { %v3171_v41 = vmul.f32 %v3169_v24, %v3162_v60 }
0x1694   :  { %5553 = vmatprep.mubr.msk.f32.mxu1 %vm1360_vm3, %v3171_v41 }
0x1695   :  { %5554 = vmatmul.mubr.msk.f32.vlgmr.msra.gmra.mrb[30].mxu1 %vm1360_vm3, %v3172_v40 }
0x1768   :  { %v5555_v27 = vpop.f32.mrb[30].mxu1 }
0x1769   :  { %v3260_v63 = vadd.f32 %v5555_v27, %v3181_v26  ;;  %v3254_v28 = vpop.f32.mrb[31].mxu1 }
0x176a   :  { %v3255_v42 = vadd.f32 %v3254_v28, %v3181_v26 }
0x176b   :  { %v7727_v57 = vadd.f32 %v3260_v63, %v7676_v21 }
0x176c   :  { %v7730_v30 = vadd.f32 %v3255_v42, %v7674_v20 }
0x176d   :  { %v3270_v31 = vsel %vm1787_vm10, %v7727_v57, 0.0 }
0x176e   :  { %3271 = vadd.xlane.f32.xlu0 %v3270_v31  ;;  %v3267_v32 = vsel %vm510_vm8, %v7730_v30, 0.0 }
0x176f   :  { %3268 = vadd.xlane.f32.xlu1 %v3267_v32 }
0x17fb   :  { %v3272_v33 = vpop.xlane.xlu0 %3271 }
0x17fc   :  { %v3274_v34 = vmul.f32 0.03125, %v3272_v33  ;;  %v3269_v3 = vpop.xlane.xlu1 %3268 }
0x17fd   :  { %v3273_v35 = vmul.f32 0.03125, %v3269_v3 }
0x17fe   :  { %v3276_v37 = vsub.f32 %v7727_v57, %v3274_v34 }
0x17ff   :  { %v3275_v21 = vsub.f32 %v7730_v30, %v3273_v35 }
0x1800   :  { %v3278_v29 = vmul.f32 %v3276_v37, %v3276_v37 }
0x1801   :  { %v3277_v58 = vmul.f32 %v3275_v21, %v3275_v21 }
0x1802   :  { %v3282_v23 = vsel %vm1787_vm10, %v3278_v29, 0.0 }
0x1803   :  { %v3279_v20 = vsel %vm510_vm8, %v3277_v58, 0.0 }
0x1804   :  { %3280 = vadd.xlane.f32.xlu0 %v3279_v20 }
0x1808   :  { %3283 = vadd.xlane.f32.xlu0 %v3282_v23 }
0x1891   :  { %v3281_v48 = vpop.xlane.xlu0 %3280 }
0x1892   :  { %v3285_v50 = vmul.f32 0.03125, %v3281_v48 }
0x1894   :  { %v3287_v38 = vadd.f32 1e-05, %v3285_v50 }
0x1895   :  { %v3284_v52 = vpop.xlane.xlu0 %3283 }
0x1896   :  { %6333 = vrsqrt.f32 %v3287_v38  ;;  %v3286_v13 = vmul.f32 0.03125, %v3284_v52 }
0x1898   :  { %v3288_v36 = vadd.f32 1e-05, %v3286_v13 }
0x189a   :  { %6335 = vrsqrt.f32 %v3288_v36 }
0x18a0   :  { %v6334_v53 = vpop.eup %6333 }
0x18a1   :  { %v3291_v55 = vmul.f32 %v6334_v53, %v3275_v21 }
0x18a3   :  { %v3293_v59 = vmul.f32 %v3291_v55, %v3265_v54 }
0x18a4   :  { %v6336_v61 = vpop.eup %6335 }
0x18a5   :  { %v3292_v62 = vmul.f32 %v6336_v61, %v3276_v37  ;;  %v3295_v43 = vadd.f32 %v3293_v59, %v3266_v56 }
0x18a7   :  { %v3294_v2 = vmul.f32 %v3292_v62, %v3265_v54  ;;  %5564 = vmatprep.mubr.msk.f32.mxu0 %vm510_vm8, %v3295_v43 }
0x18a9   :  { %v3296_v1 = vadd.f32 %v3294_v2, %v3266_v56 }
0x18ab   :  { %5565 = vmatmul.mubr.msk.f32.vlgmr.msra.gmra.mrb[12].mxu0 %vm510_vm8, %v3296_v1 }
0x197e   :  { %v5566_v5 = vpop.f32.mrb[12].mxu0 }
0x197f   :  { %v7754_v6 = vadd.f32 %v5566_v5, %v3302_v4  ;;  %v3375_v22 = vpop.f32.mrb[13].mxu0 }
0x1980   :  { %v7756_v7 = vadd.f32 %v3375_v22, %v3302_v4 }
0x1982   :  { %5571 = vmatprep.mubr.msk.f32.mxu0 %vm1912_vm11, %v7756_v7  ;;  %v7762_v8 = vpack.i.bf16 %v7754_v6, %v7756_v7 }
0x1984   :  { %6250 = vrot.lane.b32.xlu0 %v7762_v8, %s6433_s24 }
0x19f6   :  { %v6251_v10 = vpop.permute.xlu0 %6250 }
0x19f7   :  { %v6253_v11 = vunpack.i.h.bf16 %v6251_v10  ;;  %v6252_v12 = vunpack.i.l.bf16 %v6251_v10 }
0x19f9   :  { %v6080_v14 = vpack.c.bf16 %v6253_v11, %v6252_v12 }
0x19fb   :  { %6082 = vmatprep.subr.msk.bf16.mxu0 %vm7538_vm12, %v6080_v14 }
0x19fc   :  { %6085 = vmatpush3.bf16.xpose.msk.msra.mxu0 %vm7538_vm12, %v6080_v14 }
0x1a03   :  { %5572 = vmatmul.mubr.msk.f32.vlgmr.msra.gmra.mrb[14].mxu0 %vm1912_vm11, %v7754_v6 }
0x1ad6   :  { %v5573_v16 = vpop.f32.mrb[14].mxu0 }
0x1ad7   :  { %v3475_v17 = vadd.f32 %v5573_v16, %v7556_v51  ;;  %v3469_v19 = vpop.f32.mrb[15].mxu0 }
0x1ad8   :  { %v3470_v60 = vadd.f32 %v3469_v19, %v7551_v49 }
0x1ad9   :  { %v3481_v24 = vsel %vm2000_vm14, %v3475_v17, -inf }
0x1ada   :  { %3482 = vmax.xlane.f32.xlu0 %v3481_v24  ;;  %v3478_v25 = vsel %vm1996_vm13, %v3470_v60, -inf }
0x1adb   :  { %3479 = vmax.xlane.f32.xlu1 %v3478_v25 }
0x1aec   :  { %6255 = vrot.lane.b32.xlu1 %v7762_v8, %s6436_s29 }
0x1af0   :  { %3588 = vrot.lane.b32.xlu0 %v7756_v7, %s6435_s10  ;;  %6260 = vrot.lane.b32.xlu1 %v7762_v8, %s6434_s25 }
0x1b67   :  { %v3483_v41 = vpop.xlane.xlu0 %3482 }
0x1b68   :  { %v3485_v40 = vsub.f32 %v3475_v17, %v3483_v41  ;;  %v3480_v26 = vpop.xlane.xlu1 %3479 }
0x1b69   :  { %v3484_v27 = vsub.f32 %v3470_v60, %v3480_v26 }
0x1b6a   :  { %v3488_v63 = vmul.f32 1.442695, %v3485_v40 }
0x1b6b   :  { %v3486_v28 = vmul.f32 1.442695, %v3484_v27  ;;  %v3589_v46 = vpop.permute.xlu0 %3588 }
0x1b6c   :  { %6337 = vpow2.f32 %v3488_v63  ;;  %v6256_v42 = vpop.permute.xlu1 %6255 }
0x1b6d   :  { %v6258_v31 = vunpack.i.h.bf16 %v6256_v42  ;;  %v6257_v32 = vunpack.i.l.bf16 %v6256_v42  ;;  %6339 = vpow2.f32 %v3486_v28 }
0x1b6f   :  { %v6086_v33 = vpack.c.bf16 %v6258_v31, %v6257_v32  ;;  %v5093_v32 = vld [vmem:[%s7979_s6 + $0x28] sm:$0xff] }
0x1b70   :  { %v6261_v34 = vpop.permute.xlu1 %6260  ;;  %5595 = vmatprep.subr.mxu0 %v5093_v32 }
0x1b71   :  { %v6263_v3 = vunpack.i.h.bf16 %v6261_v34  ;;  %v6262_v35 = vunpack.i.l.bf16 %v6261_v34  ;;  %6088 = vmatprep.subr.msk.bf16.mxu1 %vm7567_vm0, %v6086_v33  ;;  %5596 = vmatpush3.msra.mxu0 %v5093_v32 }
0x1b72   :  { %6091 = vmatpush3.bf16.msk.msra.mxu1 %vm7567_vm0, %v6086_v33  ;;  %v5092_v33 = vld [vmem:[%s7979_s6 + $0x20] sm:$0xff] }
0x1b73   :  { %v6092_v37 = vpack.c.bf16 %v6263_v3, %v6262_v35  ;;  %5600 = vmatprep.subr.mxu0 %v5092_v33  ;;  %v6379_v35 = vld [vmem:[%s7984_s11 + $0x8] sm:$0x3] }
0x1b75   :  { %6094 = vmatprep.subr.msk.bf16.mxu1 %vm7538_vm12, %v6092_v37 }
0x1b76   :  { %v6338_v21 = vpop.eup %6337 }
0x1b77   :  { %v3493_v58 = vsel %vm2000_vm14, %v6338_v21, 0.0  ;;  %v6340_v20 = vpop.eup %6339 }
0x1b78   :  { %3494 = vadd.xlane.f32.xlu1 %v3493_v58  ;;  %v3490_v29 = vsel %vm1996_vm13, %v6340_v20, 0.0  ;;  %v6380_v58 = vld [vmem:[%s7984_s11] sm:$0xff] }
0x1b7c   :  { %3491 = vadd.xlane.f32.xlu1 %v3490_v29 }
0x1b8d   :  { %3590 = vrot.lane.b32.xlu1 %v7754_v6, %s6435_s10 }
0x1c05   :  { %v3495_v23 = vpop.xlane.xlu1 %3494 }
0x1c06   :  { %6341 = vrcp.f32 %v3495_v23 }
0x1c09   :  { %v3492_v39 = vpop.xlane.xlu1 %3491 }
0x1c0a   :  { %6343 = vrcp.f32 %v3492_v39 }
0x1c0d   :  { %v3591_v48 = vpop.permute.xlu1 %3590 }
0x1c10   :  { %v6342_v9 = vpop.eup %6341 }
0x1c11   :  { %v3499_v45 = vmul.f32 %v6342_v9, %v6338_v21 }
0x1c14   :  { %v6344_v18 = vpop.eup %6343 }
0x1c15   :  { %v3497_v44 = vmul.f32 %v6344_v18, %v6340_v20 }
0x1c17   :  { %5578 = vmatprep.mubr.msk.f32.mxu1 %vm1996_vm13, %v3497_v44 }
0x1c18   :  { %5579 = vmatmul.mubr.msk.f32.vlgmr.msra.gmra.mrb[32].mxu1 %vm1996_vm13, %v3499_v45 }
0x1c19   :  { %6097 = vmatpush3.bf16.xpose.msk.msra.mxu1 %vm7538_vm12, %v6092_v37  ;;  %5585 = vmatprep.mubr.msk.f32.mxu1 %vm1912_vm11, %v3589_v46 }
0x1c20   :  { %5586 = vmatmul.mubr.msk.f32.vlgmr.msra.gmra.mrb[34].mxu1 %vm1912_vm11, %v3591_v48 }
0x1ceb   :  { %v7798_v50 = vpop.f32.mrb[32].mxu1 }
0x1cec   :  { %v7800_v38 = vpop.f32.mrb[33].mxu1 }
0x1cf3   :  { %v5587_v52 = vpop.f32.mrb[34].mxu1 }
0x1cf4   :  { %v3676_v13 = vadd.f32 %v5587_v52, %v7556_v51  ;;  %v3670_v36 = vpop.f32.mrb[35].mxu1 }
0x1cf5   :  { %v3671_v53 = vadd.f32 %v3670_v36, %v7551_v49 }
0x1cf6   :  { %v3682_v54 = vsel %vm2000_vm14, %v3676_v13, -inf }
0x1cf7   :  { %3683 = vmax.xlane.f32.xlu0 %v3682_v54  ;;  %v3679_v55 = vsel %vm1996_vm13, %v3671_v53, -inf }
0x1cf8   :  { %3680 = vmax.xlane.f32.xlu1 %v3679_v55 }
0x1d09   :  { %6265 = vrot.lane.b32.xlu1 %v7762_v8, %s6438_s30 }
0x1d0d   :  { %6270 = vrot.lane.b32.xlu0 %v7762_v8, %s6440_s14  ;;  %3951 = vrot.lane.b32.xlu1 %v7756_v7, %s6439_s13 }
0x1d11   :  { %4235 = vrot.lane.b32.xlu0 %v7756_v7, %s6442_s4 }
0x1d84   :  { %v3684_v51 = vpop.xlane.xlu0 %3683 }
0x1d85   :  { %v3686_v49 = vsub.f32 %v3676_v13, %v3684_v51  ;;  %v3681_v56 = vpop.xlane.xlu1 %3680 }
0x1d86   :  { %v3685_v59 = vsub.f32 %v3671_v53, %v3681_v56 }
0x1d87   :  { %v3689_v61 = vmul.f32 1.442695, %v3686_v49 }
0x1d88   :  { %v3687_v62 = vmul.f32 1.442695, %v3685_v59  ;;  %v6271_v43 = vpop.permute.xlu0 %6270 }
0x1d89   :  { %6345 = vpow2.f32 %v3689_v61  ;;  %v6266_v2 = vpop.permute.xlu1 %6265  ;;  %v6273_v1 = vunpack.i.h.bf16 %v6271_v43  ;;  %v6272_v4 = vunpack.i.l.bf16 %v6271_v43 }
0x1d8a   :  { %v6268_v5 = vunpack.i.h.bf16 %v6266_v2  ;;  %v6267_v22 = vunpack.i.l.bf16 %v6266_v2  ;;  %6347 = vpow2.f32 %v3687_v62 }
0x1d8b   :  { %v6104_v11 = vpack.c.bf16 %v6273_v1, %v6272_v4 }
0x1d8c   :  { %v6098_v10 = vpack.c.bf16 %v6268_v5, %v6267_v22 }
0x1d8d   :  { %v3952_v17 = vpop.permute.xlu1 %3951 }
0x1d8e   :  { %6100 = vmatprep.subr.msk.bf16.mxu1 %vm7567_vm0, %v6098_v10 }
0x1d8f   :  { %6103 = vmatpush3.bf16.msk.msra.mxu1 %vm7567_vm0, %v6098_v10 }
0x1d90   :  { %6106 = vmatprep.subr.msk.bf16.mxu1 %vm7538_vm12, %v6104_v11 }
0x1d93   :  { %v6346_v7 = vpop.eup %6345 }
0x1d94   :  { %v3694_v12 = vsel %vm2000_vm14, %v6346_v7, 0.0  ;;  %v6348_v14 = vpop.eup %6347 }
0x1d95   :  { %3695 = vadd.xlane.f32.xlu1 %v3694_v12  ;;  %v3691_v16 = vsel %vm1996_vm13, %v6348_v14, 0.0 }
0x1d99   :  { %3692 = vadd.xlane.f32.xlu1 %v3691_v16  ;;  %v5094_v16 = vld [vmem:[%s7979_s6 + $0x30] sm:$0xff] }
0x1daa   :  { %3953 = vrot.lane.b32.xlu1 %v7754_v6, %s6439_s13 }
0x1dae   :  { %6275 = vrot.lane.b32.xlu1 %v7762_v8, %s6443_s18 }
0x1db2   :  { %4237 = vrot.lane.b32.xlu1 %v7754_v6, %s6442_s4  ;;  %v4236_v6 = vpop.permute.xlu0 %4235 }
0x1e22   :  { %v3696_v19 = vpop.xlane.xlu1 %3695 }
0x1e23   :  { %6349 = vrcp.f32 %v3696_v19 }
0x1e26   :  { %v3693_v60 = vpop.xlane.xlu1 %3692 }
0x1e27   :  { %6351 = vrcp.f32 %v3693_v60 }
0x1e2a   :  { %v3954_v24 = vpop.permute.xlu1 %3953 }
0x1e2d   :  { %v6350_v41 = vpop.eup %6349 }
0x1e2e   :  { %v6276_v25 = vpop.permute.xlu1 %6275  ;;  %v3700_v28 = vmul.f32 %v6350_v41, %v6346_v7 }
0x1e2f   :  { %v6278_v26 = vunpack.i.h.bf16 %v6276_v25  ;;  %v6277_v27 = vunpack.i.l.bf16 %v6276_v25 }
0x1e31   :  { %v6352_v40 = vpop.eup %6351  ;;  %v6116_v42 = vpack.c.bf16 %v6278_v26, %v6277_v27 }
0x1e32   :  { %v3698_v63 = vmul.f32 %v6352_v40, %v6348_v14  ;;  %v4238_v31 = vpop.permute.xlu1 %4237 }
0x1e34   :  { %5592 = vmatprep.mubr.msk.f32.mxu1 %vm1996_vm13, %v3698_v63 }
0x1e35   :  { %5593 = vmatmul.mubr.msk.f32.vlgmr.msra.gmra.mrb[36].mxu1 %vm1996_vm13, %v3700_v28 }
0x1e36   :  { %6109 = vmatpush3.bf16.xpose.msk.msra.mxu1 %vm7538_vm12, %v6104_v11  ;;  %5609 = vmatprep.mubr.msk.f32.mxu1 %vm1912_vm11, %v3952_v17 }
0x1e37   :  { %6118 = vmatprep.subr.msk.bf16.mxu1 %vm7538_vm12, %v6116_v42 }
0x1e3d   :  { %5610 = vmatmul.mubr.msk.f32.vlgmr.msra.gmra.mrb[38].mxu1 %vm1912_vm11, %v3954_v24 }
0x1e3e   :  { %6121 = vmatpush3.bf16.xpose.msk.msra.mxu1 %vm7538_vm12, %v6116_v42  ;;  %5628 = vmatprep.mubr.msk.f32.mxu1 %vm1912_vm11, %v4236_v6 }
0x1e45   :  { %5629 = vmatmul.mubr.msk.f32.vlgmr.msra.gmra.mrb[40].mxu1 %vm1912_vm11, %v4238_v31 }
0x1f08   :  { %v5594_v34 = vpop.f32.mrb[36].mxu1 }
0x1f09   :  { %v3780_v3 = vpop.f32.mrb[37].mxu1 }
0x1f0a   :  { %5597 = vmatprep.mubr.msk.f32.mxu0 %vm1912_vm11, %v3780_v3 }
0x1f0b   :  { %5598 = vmatmul.mubr.msk.f32.vlgmr.msra.gmra.mrb[16].mxu0 %vm1912_vm11, %v5594_v34 }
0x1f0c   :  { %5602 = vmatprep.mubr.msk.f32.mxu0 %vm1912_vm11, %v7800_v38  ;;  %5601 = vmatpush3.msra.mxu0 %v5092_v33  ;;  %v5095_v33 = vld [vmem:[%s7979_s6 + $0x38] sm:$0xff] }
0x1f10   :  { %v5611_v47 = vpop.f32.mrb[38].mxu1 }
0x1f11   :  { %v4039_v37 = vadd.f32 %v6379_v35, %v5611_v47  ;;  %v4033_v21 = vpop.f32.mrb[39].mxu1 }
0x1f12   :  { %v4034_v20 = vadd.f32 %v6380_v58, %v4033_v21 }
0x1f13   :  { %v4045_v29 = vsel %vm2000_vm14, %v4039_v37, -inf  ;;  %5603 = vmatmul.mubr.msk.f32.vlgmr.msra.gmra.mrb[16].mxu0 %vm1912_vm11, %v7798_v50 }
0x1f14   :  { %4046 = vmax.xlane.f32.xlu1 %v4045_v29  ;;  %v4042_v23 = vsel %vm1996_vm13, %v4034_v20, -inf }
0x1f15   :  { %4043 = vmax.xlane.f32.xlu0 %v4042_v23 }
0x1f18   :  { %v5630_v39 = vpop.f32.mrb[40].mxu1 }
0x1f19   :  { %v4317_v9 = vpop.f32.mrb[41].mxu1  ;;  %v4323_v44 = vadd.f32 %v6379_v35, %v5630_v39 }
0x1f1a   :  { %v4318_v18 = vadd.f32 %v6380_v58, %v4317_v9 }
0x1f1b   :  { %v4329_v46 = vsel %vm2000_vm14, %v4323_v44, -inf }
0x1f1c   :  { %v4326_v45 = vsel %vm1996_vm13, %v4318_v18, -inf }
0x1f1d   :  { %4327 = vmax.xlane.f32.xlu1 %v4326_v45 }
0x1f21   :  { %4330 = vmax.xlane.f32.xlu1 %v4329_v46 }
0x1fa1   :  { %v4047_v48 = vpop.xlane.xlu1 %4046 }
0x1fa2   :  { %v4049_v38 = vsub.f32 %v4039_v37, %v4047_v48  ;;  %v4044_v52 = vpop.xlane.xlu0 %4043 }
0x1fa3   :  { %v4048_v13 = vsub.f32 %v4034_v20, %v4044_v52  ;;  %v5132_v52 = vld [vmem:[%s7980_s7 + $0x20] sm:$0xff] }
0x1fa4   :  { %v4052_v36 = vmul.f32 1.442695, %v4049_v38 }
0x1fa5   :  { %v4050_v50 = vmul.f32 1.442695, %v4048_v13  ;;  %v5133_v13 = vld [vmem:[%s7980_s7 + $0x28] sm:$0xff] }
0x1fa6   :  { %6353 = vpow2.f32 %v4052_v36  ;;  %v6128_v36 = vpack.c.bf16 %v5133_v13, %v5132_v52  ;;  %v4765_v52 = vld [vmem:[%s7982_s9] sm:$0xff] }
0x1fa7   :  { %6355 = vpow2.f32 %v4050_v50  ;;  %v5134_v50 = vld [vmem:[%s7980_s7 + $0x30] sm:$0xff] }
0x1fa8   :  { %6129 = vmatprep.subr.bf16.mxu1 %v6128_v36 }
0x1fa9   :  { %6131 = vmatpush3.bf16.msra.mxu1 %v6128_v36  ;;  %v6445_v36 = vmov 0.0|0.0  }
0x1faa   :  { %v4328_v53 = vpop.xlane.xlu1 %4327 }
0x1fab   :  { %v4332_v54 = vsub.f32 %v4318_v18, %v4328_v53  ;;  %v5135_v53 = vld [vmem:[%s7980_s7 + $0x38] sm:$0xff] }
0x1fad   :  { %v4334_v56 = vmul.f32 1.442695, %v4332_v54  ;;  %v6132_v54 = vpack.c.bf16 %v5135_v53, %v5134_v50  ;;  %v4767_v50 = vld [vmem:[%s7982_s9 + $0x10] sm:$0xff]  ;;  %v4768_v53 = vld [vmem:[%s7982_s9 + $0x18] sm:$0xff] }
0x1fae   :  { %v4331_v55 = vpop.xlane.xlu1 %4330 }
0x1faf   :  { %v4333_v51 = vsub.f32 %v4323_v44, %v4331_v55  ;;  %6133 = vmatprep.subr.bf16.mxu1 %v6132_v54 }
0x1fb0   :  { %v6354_v49 = vpop.eup %6353  ;;  %6135 = vmatpush3.bf16.msra.mxu1 %v6132_v54  ;;  %v6156_v54 = vpack.c.bf16 %v4768_v53, %v4767_v50 }
0x1fb1   :  { %v4336_v59 = vmul.f32 1.442695, %v4333_v51  ;;  %v4057_v61 = vsel %vm2000_vm14, %v6354_v49, 0.0  ;;  %v6356_v62 = vpop.eup %6355  ;;  %6152 = vmatprep.subr.bf16.mxu1 %v6445_v36 }
0x1fb2   :  { %4058 = vadd.xlane.f32.xlu0 %v4057_v61  ;;  %v4054_v43 = vsel %vm1996_vm13, %v6356_v62, 0.0 }
0x1fb3   :  { %6357 = vpow2.f32 %v4336_v59 }
0x1fb4   :  { %6359 = vpow2.f32 %v4334_v56 }
0x1fb6   :  { %4055 = vadd.xlane.f32.xlu0 %v4054_v43  ;;  %v4524_v43 = vld [vmem:[#allocation2 + $0x31] ss:$0 sm:$0xff] }
0x1fbd   :  { %v6358_v2 = vpop.eup %6357 }
0x1fbe   :  { %v4341_v1 = vsel %vm2000_vm14, %v6358_v2, 0.0  ;;  %v6360_v4 = vpop.eup %6359 }
0x1fbf   :  { %4342 = vadd.xlane.f32.xlu1 %v4341_v1  ;;  %v4338_v5 = vsel %vm1996_vm13, %v6360_v4, 0.0  ;;  %v4525_v1 = vld [vmem:[#allocation2 + $0x32] ss:$0 sm:$0xff] }
0x1fc3   :  { %4339 = vadd.xlane.f32.xlu1 %v4338_v5 }
0x1fcc   :  { %6280 = vrot.lane.b32.xlu0 %v7762_v8, %s6441_s17 }
0x1fd4   :  { %6285 = vrot.lane.b32.xlu1 %v7762_v8, %s6444_s20 }
0x203f   :  { %v4059_v22 = vpop.xlane.xlu0 %4058 }
0x2040   :  { %6361 = vrcp.f32 %v4059_v22 }
0x2043   :  { %v4056_v10 = vpop.xlane.xlu0 %4055 }
0x2044   :  { %6363 = vrcp.f32 %v4056_v10 }
0x2047   :  { %v6281_v11 = vpop.permute.xlu0 %6280 }
0x2048   :  { %v6283_v7 = vunpack.i.h.bf16 %v6281_v11  ;;  %v6282_v12 = vunpack.i.l.bf16 %v6281_v11 }
0x204a   :  { %v6110_v14 = vpack.c.bf16 %v6283_v7, %v6282_v12  ;;  %v6362_v19 = vpop.eup %6361  ;;  %v5138_v12 = vld [vmem:[%s7981_s8 + $0x40] sm:$0xff] }
0x204b   :  { %v4063_v24 = vmul.f32 %v6362_v19, %v6354_v49  ;;  %v5141_v19 = vld [vmem:[%s7981_s8 + $0x58] sm:$0xff] }
0x204c   :  { %v4343_v17 = vpop.xlane.xlu1 %4342  ;;  %6112 = vmatprep.subr.msk.bf16.mxu0 %vm7567_vm0, %v6110_v14 }
0x204d   :  { %6115 = vmatpush3.bf16.msk.msra.mxu0 %vm7567_vm0, %v6110_v14  ;;  %v5139_v14 = vld [vmem:[%s7981_s8 + $0x48] sm:$0xff] }
0x204e   :  { %v6364_v8 = vpop.eup %6363  ;;  %5619 = vmatprep.subr.mxu0 %v5094_v16 }
0x204f   :  { %v4061_v60 = vmul.f32 %v6364_v8, %v6356_v62 }
0x2050   :  { %v4340_v25 = vpop.xlane.xlu1 %4339 }
0x2051   :  { %5616 = vmatprep.mubr.msk.f32.mxu0 %vm1996_vm13, %v4061_v60  ;;  %6365 = vrcp.f32 %v4340_v25  ;;  %v5142_v60 = vld [vmem:[%s7981_s8 + $0x60] sm:$0xff] }
0x2052   :  { %5617 = vmatmul.mubr.msk.f32.vlgmr.msra.gmra.mrb[18].mxu0 %vm1996_vm13, %v4063_v24  ;;  %6367 = vrcp.f32 %v4343_v17  ;;  %v5140_v17 = vld [vmem:[%s7981_s8 + $0x50] sm:$0xff]  ;;  %v5143_v24 = vld [vmem:[%s7981_s8 + $0x68] sm:$0xff] }
0x2053   :  { %5620 = vmatpush3.msra.mxu0 %v5094_v16  ;;  %v6136_v16 = vpack.c.bf16 %v5139_v14, %v5138_v12  ;;  %v6140_v8 = vpack.c.bf16 %v5141_v19, %v5140_v17  ;;  %v6144_v25 = vpack.c.bf16 %v5143_v24, %v5142_v60 }
0x2054   :  { %v6286_v41 = vpop.permute.xlu1 %6285 }
0x2055   :  { %v6288_v40 = vunpack.i.h.bf16 %v6286_v41  ;;  %v6287_v26 = vunpack.i.l.bf16 %v6286_v41  ;;  %v5144_v41 = vld [vmem:[%s7981_s8 + $0x70] sm:$0xff] }
0x2057   :  { %v6122_v27 = vpack.c.bf16 %v6288_v40, %v6287_v26  ;;  %v5145_v40 = vld [vmem:[%s7981_s8 + $0x78] sm:$0xff] }
0x2058   :  { %v6148_v26 = vpack.c.bf16 %v5145_v40, %v5144_v41 }
0x2059   :  { %6124 = vmatprep.subr.msk.bf16.mxu0 %vm7567_vm0, %v6122_v27 }
0x205b   :  { %v6366_v63 = vpop.eup %6365 }
0x205c   :  { %v6368_v6 = vpop.eup %6367  ;;  %v4345_v31 = vmul.f32 %v6366_v63, %v6360_v4 }
0x205d   :  { %v4347_v32 = vmul.f32 %v6368_v6, %v6358_v2 }
0x2125   :  { %v5618_v28 = vpop.f32.mrb[18].mxu0 }
0x2126   :  { %v4143_v42 = vpop.f32.mrb[19].mxu0 }
0x2127   :  { %5621 = vmatprep.mubr.msk.f32.mxu0 %vm1912_vm11, %v4143_v42 }
0x2128   :  { %5622 = vmatmul.mubr.msk.f32.vlgmr.msra.gmra.mrb[16].mxu0 %vm1912_vm11, %v5618_v28 }
0x2129   :  { %6127 = vmatpush3.bf16.msk.msra.mxu0 %vm7567_vm0, %v6122_v27  ;;  %5635 = vmatprep.mubr.msk.f32.mxu0 %vm1996_vm13, %v4345_v31  ;;  %v4561_v27 = vld [vmem:[#allocation2 + $0x33] ss:$0 sm:$0xff] }
0x212a   :  { %5638 = vmatprep.subr.mxu0 %v5095_v33 }
0x212c   :  { %5636 = vmatmul.mubr.msk.f32.vlgmr.msra.gmra.mrb[20].mxu0 %vm1996_vm13, %v4347_v32 }
0x212d   :  { %5639 = vmatpush3.msra.mxu0 %v5095_v33 }
0x212e   :  { %6137 = vmatprep.subr.bf16.mxu0 %v6136_v16 }
0x21ff   :  { %v5637_v34 = vpop.f32.mrb[20].mxu0 }
0x2200   :  { %v4427_v3 = vpop.f32.mrb[21].mxu0 }
0x2201   :  { %5640 = vmatprep.mubr.msk.f32.mxu0 %vm1912_vm11, %v4427_v3 }
0x2202   :  { %5641 = vmatmul.mubr.msk.f32.vlgmr.msra.gmra.mrb[16].mxu0 %vm1912_vm11, %v5637_v34 }
0x2203   :  { %6139 = vmatpush3.bf16.msra.mxu0 %v6136_v16 }
0x2204   :  { %6141 = vmatprep.subr.bf16.mxu0 %v6140_v8 }
0x2207   :  { %6143 = vmatpush3.bf16.msra.mxu0 %v6140_v8 }
0x2208   :  { %6145 = vmatprep.subr.bf16.mxu0 %v6144_v25 }
0x220b   :  { %6147 = vmatpush3.bf16.msra.mxu0 %v6144_v25 }
0x220c   :  { %6149 = vmatprep.subr.bf16.mxu0 %v6148_v26 }
0x220f   :  { %6151 = vmatpush3.bf16.msra.mxu0 %v6148_v26 }
0x22d5   :  { %v5642_v47 = vpop.f32.mrb[16].mxu0 }
0x22d6   :  { %v4520_v35 = vadd.f32 %v5642_v47, %v7727_v57  ;;  %v4508_v37 = vpop.f32.mrb[17].mxu0 }
0x22d7   :  { %v4519_v21 = vadd.f32 %v4508_v37, %v7730_v30 }
0x22d8   :  { %v4523_v58 = vadd.f32 %v4521_v15, %v4520_v35 }
0x22d9   :  { %v7894_v20 = vadd.f32 %v4521_v15, %v4519_v21 }
0x22da   :  { %v4529_v29 = vsel %vm1787_vm10, %v4523_v58, 0.0 }
0x22db   :  { %4530 = vadd.xlane.f32.xlu1 %v4529_v29  ;;  %v4526_v23 = vsel %vm510_vm8, %v7894_v20, 0.0 }
0x22dc   :  { %4527 = vadd.xlane.f32.xlu0 %v4526_v23 }
0x2368   :  { %v4531_v39 = vpop.xlane.xlu1 %4530 }
0x2369   :  { %v4533_v9 = vmul.f32 0.03125, %v4531_v39  ;;  %v4528_v18 = vpop.xlane.xlu0 %4527 }
0x236a   :  { %v4532_v44 = vmul.f32 0.03125, %v4528_v18 }
0x236b   :  { %v4535_v45 = vsub.f32 %v4523_v58, %v4533_v9  ;;  %v4662_v58 = vld [vmem:[#allocation2 + $0x34] ss:$0 sm:$0xff] }
0x236c   :  { %v4534_v57 = vsub.f32 %v7894_v20, %v4532_v44 }
0x236d   :  { %v4537_v48 = vmul.f32 %v4535_v45, %v4535_v45 }
0x236e   :  { %v4536_v46 = vmul.f32 %v4534_v57, %v4534_v57 }
0x236f   :  { %v4541_v38 = vsel %vm1787_vm10, %v4537_v48, 0.0 }
0x2370   :  { %v4538_v30 = vsel %vm510_vm8, %v4536_v46, 0.0 }
0x2371   :  { %4539 = vadd.xlane.f32.xlu0 %v4538_v30 }
0x2375   :  { %4542 = vadd.xlane.f32.xlu0 %v4541_v38 }
0x23fe   :  { %v4540_v55 = vpop.xlane.xlu0 %4539 }
0x23ff   :  { %v4544_v51 = vmul.f32 0.03125, %v4540_v55 }
0x2401   :  { %v4546_v49 = vadd.f32 1e-05, %v4544_v51 }
0x2402   :  { %v4543_v56 = vpop.xlane.xlu0 %4542 }
0x2403   :  { %6369 = vrsqrt.f32 %v4546_v49  ;;  %v4545_v59 = vmul.f32 0.03125, %v4543_v56 }
0x2405   :  { %v4547_v61 = vadd.f32 1e-05, %v4545_v59  ;;  %v4748_v59 = vld [vmem:[#allocation2 + $0x12] ss:$0 sm:$0xff] }
0x2407   :  { %6371 = vrsqrt.f32 %v4547_v61 }
0x240d   :  { %v6370_v62 = vpop.eup %6369 }
0x240e   :  { %v4550_v2 = vmul.f32 %v6370_v62, %v4534_v57  ;;  %v4749_v62 = vld [vmem:[#allocation2 + $0x13] ss:$0 sm:$0xff] }
0x2410   :  { %v4552_v4 = vmul.f32 %v4550_v2, %v4524_v43 }
0x2411   :  { %v6372_v5 = vpop.eup %6371 }
0x2412   :  { %v4551_v22 = vmul.f32 %v6372_v5, %v4535_v45  ;;  %v4554_v10 = vadd.f32 %v4552_v4, %v4525_v1 }
0x2414   :  { %v4553_v11 = vmul.f32 %v4551_v22, %v4524_v43  ;;  %5651 = vmatprep.mubr.msk.f32.mxu1 %vm510_vm8, %v4554_v10 }
0x2416   :  { %v4555_v7 = vadd.f32 %v4553_v11, %v4525_v1  ;;  %v4769_v1 = vld [vmem:[#allocation2 + $0x14] ss:$0 sm:$0xff] }
0x2418   :  { %5652 = vmatmul.mubr.msk.f32.vlgmr.msra.gmra.mrb[42].mxu1 %vm510_vm8, %v4555_v7 }
0x24eb   :  { %v5653_v63 = vpop.f32.mrb[42].mxu1 }
0x24ec   :  { %v4640_v28 = vadd.f32 %v5653_v63, %v4561_v27  ;;  %v4634_v42 = vpop.f32.mrb[43].mxu1 }
0x24ed   :  { %v4635_v6 = vadd.f32 %v4634_v42, %v4561_v27 }
0x24ee   :  { %v4646_v31 = vmul.f32 0.70710677, %v4640_v28  ;;  %v4644_v35 = vmul.f32 0.5, %v4640_v28 }
0x24ef   :  { %v4645_v32 = vmul.f32 0.70710677, %v4635_v6  ;;  %v4643_v47 = vmul.f32 0.5, %v4635_v6 }
0x24f0   :  { %6373 = verf.f32 %v4646_v31 }
0x24f1   :  { %6375 = verf.f32 %v4645_v32 }
0x24fa   :  { %v6374_v33 = vpop.eup %6373 }
0x24fb   :  { %v6376_v34 = vpop.eup %6375  ;;  %v4650_v3 = vadd.f32 1.0, %v6374_v33 }
0x24fc   :  { %v4649_v15 = vadd.f32 1.0, %v6376_v34 }
0x24fd   :  { %v4652_v21 = vmul.f32 %v4650_v3, %v4644_v35 }
0x24fe   :  { %v4651_v37 = vmul.f32 %v4649_v15, %v4643_v47 }
0x2500   :  { %5670 = vmatprep.mubr.msk.f32.mxu0 %vm1360_vm3, %v4651_v37 }
0x2501   :  { %5671 = vmatmul.mubr.msk.f32.vlgmr.msra.gmra.mrb[22].mxu0 %vm1360_vm3, %v4652_v21 }
0x25d4   :  { %v5672_v29 = vpop.f32.mrb[22].mxu0 }
0x25d5   :  { %v4735_v23 = vpop.f32.mrb[23].mxu0 }
0x25d6   :  { %v4736_v39 = vadd.f32 %v4735_v23, %v4662_v58 }
0x25d8   :  { %v4743_v9 = vadd.f32 %v4736_v39, %v7894_v20  ;;  %v4766_v20 = vld [vmem:[%s7982_s9 + $0x8] sm:$0xff]  ;;  %s4850_s9 = sshll.u32 %s6447_s15, 4  ;;  %s4851_s9 = int_to_ptr.vmem [resolvable:$true] %s4850_s9 }
0x25d9   :  { %v6153_v13 = vpack.c.bf16 %v4766_v20, %v4765_v52  ;;  %s6403_s16 = scalar_lea.vmem %s4851_s9, 32  ;;  %p6408_p9 = scmp.lt.s32.totalorder %s4851_s9, %s4851_s9 }
0x25da   :  { %v4745_v18 = vrot.slane %v4743_v9, 4  ;;  %p6404_p8 = scmp.ne.s32.totalorder %s4851_s9, %s6403_s16  ;;  %p6409_p10 = scmp.lt.s32.totalorder %s6403_s16, %s6403_s16 }
0x25db   :  { %6154 = vmatpush3.bf16.msra.mxu1 %v6153_v13 }
0x25dc   :  { %v4747_v44 = vsel %vm65_vm1, %v4743_v9, %v4745_v18  ;;  %6155 = vmatprep.subr.bf16.mxu1 %v6445_v36  ;;  %vm6446_vm1 = vmmov 0   ;;  %p6410_p11 = por %p6409_p10, %p6408_p9 }
0x25dd   :  { %v4750_v45 = vsel %vm1787_vm10, %v4747_v44, 0.0  ;;  %5681 = vmatprep.mubr.msk.f32.mxu1 %vm6446_vm1, %v6432_v0 }
0x25de   :  { %4751 = vadd.xlane.f32.xlu0 %v4750_v45  ;;  %p6411_p12 = pnand %p6410_p11, %p6404_p8 }
0x25df   :  { %6157 = vmatpush3.bf16.msra.mxu1 %v6156_v54 }
0x266b   :  { %v4752_v57 = vpop.xlane.xlu0 %4751 }
0x266c   :  { %v4753_v46 = vmul.f32 0.03125, %v4752_v57 }
0x266e   :  { %v4754_v30 = vsub.f32 %v4747_v44, %v4753_v46 }
0x2670   :  { %v4755_v48 = vmul.f32 %v4754_v30, %v4754_v30 }
0x2672   :  { %v4756_v38 = vsel %vm1787_vm10, %v4755_v48, 0.0 }
0x2673   :  { %4757 = vadd.xlane.f32.xlu0 %v4756_v38 }
0x2700   :  { %v4758_v55 = vpop.xlane.xlu0 %4757 }
0x2701   :  { %v4759_v51 = vmul.f32 0.03125, %v4758_v55 }
0x2703   :  { %v4760_v49 = vadd.f32 1e-05, %v4759_v51 }
0x2705   :  { %6377 = vrsqrt.f32 %v4760_v49 }
0x270f   :  { %v6378_v56 = vpop.eup %6377 }
0x2710   :  { %v4762_v61 = vmul.f32 %v6378_v56, %v4754_v30 }
0x2712   :  { %v4763_v43 = vmul.f32 %v4762_v61, %v4748_v59 }
0x2714   :  { %v4764_v2 = vadd.f32 %v4763_v43, %v4749_v62 }
0x2716   :  { %5682 = vmatmul.mubr.msk.f32.vlgmr.msra.gmra.mrb[44].mxu1 %vm510_vm8, %v4764_v2 }
0x27e9   :  { %v4839_v4 = vpop.f32.mrb[44].mxu1 }
0x27ea   :  { %v4840_v5 = vadd.f32 %v4839_v4, %v4769_v1  ;;  %v5683_v22 = vpop.f32.mrb[45].mxu1 }
0x27ec   :  { %4843 = vst.msk [vmem:[#allocation5] sm:$0x3] %vm2000_vm14, %v4840_v5 }
0x27ed   :  { %6414 = shalt.err (!%p6411_p12)
}
0x27ee   :  { %s6415_s21 = scalar_lea.hbm %s7985_s12, 32 }
0x27ef   :  { %p6416_p13 = scmp.ne.s32.totalorder %s7985_s12, %s6415_s21  ;;  %p6419_p0 = scmp.lt.u32.totalorder %s6415_s21, %s7985_s12 }
0x27f1   :  { %p6421_p1 = pnand %p6419_p0, %p6416_p13 }
0x27f3   :  { %6424 = shalt.err (!%p6421_p1)
}
0x27f4   :  { %4853 = dma.vmem_to_hbm [thread:$0]  %s4851_s9, 32, %s7985_s12, [#allocation4]  }
0x27f5   :  { %6427 = dma.done.wait [#allocation4], 32  }
0x27f6   :  { %6428 = vsyncadd [#allocation4], 4294967264 }
0x27f7   :  { %4857 = vsyncpa [#allocation3], 1 }
0x27f8   :  { %4858 = vsyncpa [#allocation4], 1 }

</bundles_post_ra>
